<compile_context>
chip_gen: v5e
topology: v5e:2x2
jax: 0.10.0
libtpu: 0.0.40
codegen_flags: <defaults>
</compile_context>

<pallas_src>
import functools

import jax
import jax.numpy as jnp
from jax.experimental import pallas as pl
from jax.experimental.pallas import tpu as pltpu

D_IN = 28 * 28    # 784
D_HID = 512
D_OUT = 10
D_OUT_PAD = 128   # lane-dense padded logits width (multiple of 128)


def _round_up(n, m):
    return ((n + m - 1) // m) * m


def mlp_kernel(x_ref, w1_ref, b1_ref, w2_ref, b2_ref, w3_ref, b3_ref, o_ref):
    # Native MXU path: bf16 x bf16 -> f32 accumulate. Bias-add / ReLU in f32
    # on the VPU; re-quantize activations to bf16 only at the matmul inputs.
    x = x_ref[...]                                                     # bf16
    h1 = jnp.dot(x, w1_ref[...], preferred_element_type=jnp.float32) + b1_ref[...]
    h1 = jnp.maximum(h1, 0.0).astype(jnp.bfloat16)

    h2 = jnp.dot(h1, w2_ref[...], preferred_element_type=jnp.float32) + b2_ref[...]
    h2 = jnp.maximum(h2, 0.0).astype(jnp.bfloat16)

    logits = jnp.dot(h2, w3_ref[...], preferred_element_type=jnp.float32) + b3_ref[...]
    o_ref[...] = logits.astype(o_ref.dtype)


def prepare_params(params):
    """One-time weight prep: bf16 cast + lane-dense pad of the final layer.

    Call once and reuse; keeps the HBM->HBM cast/pad ops out of the per-call path.
    """
    w1, b1, w2, b2, w3, b3 = params
    w1b = w1.astype(jnp.bfloat16)
    w2b = w2.astype(jnp.bfloat16)
    w3p = jnp.pad(w3, ((0, 0), (0, D_OUT_PAD - D_OUT))).astype(jnp.bfloat16)
    b3p = jnp.pad(b3, ((0, 0), (0, D_OUT_PAD - D_OUT))).astype(jnp.float32)
    return (w1b, b1.astype(jnp.float32), w2b, b2.astype(jnp.float32), w3p, b3p)


def _pick_tile(batch, tile_b):
    b8 = _round_up(batch, 8)
    t = min(tile_b, b8)
    if b8 >= 16:
        # Guarantee >= 2 grid steps so ("parallel",) can shard the batch grid
        # across both TensorCores on v7x (no effect on single-TC v5e/v6e).
        t = min(t, _round_up((b8 + 1) // 2, 8))
    return t


def mlp_forward(x_nchw, prepped, *, tile_b=512, single_buffer_weights=True):
    """x_nchw: (B, 1, 28, 28) float32 -> logits (B, 10) float32."""
    w1b, b1, w2b, b2, w3p, b3p = prepped
    B = x_nchw.shape[0]

    # nn.Flatten(): (B, 1, 28, 28) -> (B, 784); stream the input tile as bf16.
    x2d = x_nchw.reshape(B, D_IN).astype(jnp.bfloat16)

    tile_b_eff = _pick_tile(B, tile_b)
    B_pad = _round_up(B, tile_b_eff)
    if B_pad != B:
        x2d = jnp.pad(x2d, ((0, B_pad - B), (0, 0)))

    grid = (B_pad // tile_b_eff,)

    def weight_spec(shape):
        # Grid-invariant blocks: fetched once; single-buffer to halve their
        # VMEM footprint when the API supports it.
        if single_buffer_weights:
            return pl.BlockSpec(shape, lambda i: (0, 0),
                                pipeline_mode=pl.Buffered(1))
        return pl.BlockSpec(shape, lambda i: (0, 0))

    out = pl.pallas_call(
        mlp_kernel,
        out_shape=jax.ShapeDtypeStruct((B_pad, D_OUT_PAD), jnp.float32),
        grid_spec=pltpu.PrefetchScalarGridSpec(
            num_scalar_prefetch=0,
            grid=grid,
            in_specs=[
                # per-program batch tile of the flattened bf16 input
                pl.BlockSpec((tile_b_eff, D_IN), lambda i: (i, 0)),
                weight_spec((D_IN, D_HID)),
                weight_spec((1, D_HID)),
                weight_spec((D_HID, D_HID)),
                weight_spec((1, D_HID)),
                weight_spec((D_HID, D_OUT_PAD)),
                weight_spec((1, D_OUT_PAD)),
            ],
            out_specs=pl.BlockSpec((tile_b_eff, D_OUT_PAD), lambda i: (i, 0)),
        ),
        compiler_params=pltpu.CompilerParams(
            dimension_semantics=("parallel",),
            # VMEM at tile_b=512 (bf16 input, bf16 weights) is ~5 MiB total,
            # well under every generation's scoped default; only set
            # vmem_limit_bytes if tile_b is pushed past ~1024.
        ),
    )(x2d, w1b, b1, w2b, b2, w3p, b3p)

    # Drop batch padding and the 118 padded logit columns.
    return out[:B, :D_OUT]


def init_params(key):
    """PyTorch nn.Linear-style init; weights stored transposed as (in, out) f32."""
    k1, k2, k3, k4, k5, k6 = jax.random.split(key, 6)

    def uinit(k, shape, fan_in):
        bound = 1.0 / jnp.sqrt(fan_in)
        return jax.random.uniform(k, shape, jnp.float32, -bound, bound)

    w1 = uinit(k1, (D_IN, D_HID), float(D_IN))
    b1 = uinit(k2, (1, D_HID), float(D_IN))
    w2 = uinit(k3, (D_HID, D_HID), float(D_HID))
    b2 = uinit(k4, (1, D_HID), float(D_HID))
    w3 = uinit(k5, (D_HID, D_OUT), float(D_HID))
    b3 = uinit(k6, (1, D_OUT), float(D_HID))
    return (w1, b1, w2, b2, w3, b3)


def mlp_reference(x_nchw, prepped):
    """Pure-JAX reference applying the same bf16 quantization as the kernel."""
    w1b, b1, w2b, b2, w3p, b3p = prepped
    x = x_nchw.reshape(x_nchw.shape[0], D_IN).astype(jnp.bfloat16)
    h1 = jnp.maximum(jnp.dot(x, w1b, preferred_element_type=jnp.float32) + b1, 0.0)
    h1 = h1.astype(jnp.bfloat16)
    h2 = jnp.maximum(jnp.dot(h1, w2b, preferred_element_type=jnp.float32) + b2, 0.0)
    h2 = h2.astype(jnp.bfloat16)
    logits = jnp.dot(h2, w3p, preferred_element_type=jnp.float32) + b3p
    return logits[:, :D_OUT]


if __name__ == "__main__":
    key = jax.random.PRNGKey(0)
    kx, kp = jax.random.split(key)

    # FashionMNIST-style input: (B, 1, 28, 28), NCHW. Small demo batch; the
    # wrapper rounds/pads the batch tile internally.
    B = 4
    x = jax.random.normal(kx, (B, 1, 28, 28), jnp.float32)
    params = init_params(kp)

    # One-time weight prep (bf16 cast + pad), kept out of the per-call path.
    prepped = jax.block_until_ready(prepare_params(params))

    try:
        fwd = jax.jit(mlp_forward)
        logits = jax.block_until_ready(fwd(x, prepped))
    except Exception:
        # Fallback for JAX versions that reject single-buffered pipeline_mode.
        fwd = jax.jit(functools.partial(mlp_forward, single_buffer_weights=False))
        logits = jax.block_until_ready(fwd(x, prepped))

    ref = mlp_reference(x, prepped)
    assert logits.shape == (B, D_OUT)
    assert jnp.allclose(logits, ref, atol=1e-2, rtol=1e-2), "mismatch vs reference"

    print("KERNEL_OK")
</pallas_src>

<mosaic_0001>
module attributes {stable_mosaic.version = 11 : i64} {
  func.func @mlp_kernel(%arg0: i32, %arg1: memref<8x784xbf16, #tpu.memory_space<vmem>>, %arg2: memref<784x512xbf16, #tpu.memory_space<vmem>>, %arg3: memref<1x512xf32, #tpu.memory_space<vmem>>, %arg4: memref<512x512xbf16, #tpu.memory_space<vmem>>, %arg5: memref<1x512xf32, #tpu.memory_space<vmem>>, %arg6: memref<512x128xbf16, #tpu.memory_space<vmem>>, %arg7: memref<1x128xf32, #tpu.memory_space<vmem>>, %arg8: memref<8x128xf32, #tpu.memory_space<vmem>>) attributes {dimension_semantics = [#tpu.dimension_semantics<parallel>], iteration_bounds = array<i64: 1>, scalar_prefetch = 0 : i64, scratch_operands = 0 : i64, tpu.core_type = #tpu.core_type<tc>, window_params = [{transform_indices = @transform_0, window_bounds = array<i64: 8, 784>}, {pipeline_mode = #tpu.pipeline_mode<synchronous>, transform_indices = @transform_1, window_bounds = array<i64: 784, 512>}, {pipeline_mode = #tpu.pipeline_mode<synchronous>, transform_indices = @transform_2, window_bounds = array<i64: 1, 512>}, {pipeline_mode = #tpu.pipeline_mode<synchronous>, transform_indices = @transform_3, window_bounds = array<i64: 512, 512>}, {pipeline_mode = #tpu.pipeline_mode<synchronous>, transform_indices = @transform_4, window_bounds = array<i64: 1, 512>}, {pipeline_mode = #tpu.pipeline_mode<synchronous>, transform_indices = @transform_5, window_bounds = array<i64: 512, 128>}, {pipeline_mode = #tpu.pipeline_mode<synchronous>, transform_indices = @transform_6, window_bounds = array<i64: 1, 128>}, {transform_indices = @transform_7, window_bounds = array<i64: 8, 128>}]} {
    %c0 = arith.constant 0 : index
    %c0_0 = arith.constant 0 : index
    %0 = vector.load %arg1[%c0, %c0_0] : memref<8x784xbf16, #tpu.memory_space<vmem>>, vector<8x784xbf16>
    %c0_1 = arith.constant 0 : index
    %c0_2 = arith.constant 0 : index
    %1 = vector.load %arg2[%c0_1, %c0_2] : memref<784x512xbf16, #tpu.memory_space<vmem>>, vector<784x512xbf16>
    %cst = arith.constant dense<0.000000e+00> : vector<8x512xf32>
    %2 = tpu.matmul %0, %1, %cst {dimension_numbers = #tpu.dot_dimension_numbers<[1], [0], [0], [1], [0, 0, 1, 1], [], []>} : vector<8x784xbf16>, vector<784x512xbf16>, vector<8x512xf32> -> vector<8x512xf32>
    %c0_3 = arith.constant 0 : index
    %c0_4 = arith.constant 0 : index
    %3 = vector.load %arg3[%c0_3, %c0_4] : memref<1x512xf32, #tpu.memory_space<vmem>>, vector<1x512xf32>
    %4 = vector.broadcast %3 : vector<1x512xf32> to vector<8x512xf32>
    %5 = arith.addf %2, %4 : vector<8x512xf32>
    %cst_5 = arith.constant 0.000000e+00 : f32
    %6 = vector.broadcast %cst_5 : f32 to vector<8x512xf32>
    %7 = arith.maximumf %5, %6 : vector<8x512xf32>
    %8 = arith.truncf %7 : vector<8x512xf32> to vector<8x512xbf16>
    %c0_6 = arith.constant 0 : index
    %c0_7 = arith.constant 0 : index
    %9 = vector.load %arg4[%c0_6, %c0_7] : memref<512x512xbf16, #tpu.memory_space<vmem>>, vector<512x512xbf16>
    %cst_8 = arith.constant dense<0.000000e+00> : vector<8x512xf32>
    %10 = tpu.matmul %8, %9, %cst_8 {dimension_numbers = #tpu.dot_dimension_numbers<[1], [0], [0], [1], [0, 0, 1, 1], [], []>} : vector<8x512xbf16>, vector<512x512xbf16>, vector<8x512xf32> -> vector<8x512xf32>
    %c0_9 = arith.constant 0 : index
    %c0_10 = arith.constant 0 : index
    %11 = vector.load %arg5[%c0_9, %c0_10] : memref<1x512xf32, #tpu.memory_space<vmem>>, vector<1x512xf32>
    %12 = vector.broadcast %11 : vector<1x512xf32> to vector<8x512xf32>
    %13 = arith.addf %10, %12 : vector<8x512xf32>
    %cst_11 = arith.constant 0.000000e+00 : f32
    %14 = vector.broadcast %cst_11 : f32 to vector<8x512xf32>
    %15 = arith.maximumf %13, %14 : vector<8x512xf32>
    %16 = arith.truncf %15 : vector<8x512xf32> to vector<8x512xbf16>
    %c0_12 = arith.constant 0 : index
    %c0_13 = arith.constant 0 : index
    %17 = vector.load %arg6[%c0_12, %c0_13] : memref<512x128xbf16, #tpu.memory_space<vmem>>, vector<512x128xbf16>
    %cst_14 = arith.constant dense<0.000000e+00> : vector<8x128xf32>
    %18 = tpu.matmul %16, %17, %cst_14 {dimension_numbers = #tpu.dot_dimension_numbers<[1], [0], [0], [1], [0, 0, 1, 1], [], []>} : vector<8x512xbf16>, vector<512x128xbf16>, vector<8x128xf32> -> vector<8x128xf32>
    %c0_15 = arith.constant 0 : index
    %c0_16 = arith.constant 0 : index
    %19 = vector.load %arg7[%c0_15, %c0_16] : memref<1x128xf32, #tpu.memory_space<vmem>>, vector<1x128xf32>
    %20 = vector.broadcast %19 : vector<1x128xf32> to vector<8x128xf32>
    %21 = arith.addf %18, %20 : vector<8x128xf32>
    %c0_17 = arith.constant 0 : index
    %c0_18 = arith.constant 0 : index
    %22 = vector.load %arg8[%c0_17, %c0_18] : memref<8x128xf32, #tpu.memory_space<vmem>>, vector<8x128xf32>
    tpu.vector_store %arg8[%c0_17, %c0_18], %21 {strides = array<i32>} : memref<8x128xf32, #tpu.memory_space<vmem>>, vector<8x128xf32>,
    return
  }
  func.func @transform_0(%arg0: i32) -> (i32, i32) {
    %c0_i32 = arith.constant 0 : i32
    %c0_i32_0 = arith.constant 0 : i32
    return %arg0, %c0_i32 : i32, i32
  }
  func.func @transform_1(%arg0: i32) -> (i32, i32) {
    %c0_i32 = arith.constant 0 : i32
    %c0_i32_0 = arith.constant 0 : i32
    %c0_i32_1 = arith.constant 0 : i32
    return %c0_i32, %c0_i32_0 : i32, i32
  }
  func.func @transform_2(%arg0: i32) -> (i32, i32) {
    %c0_i32 = arith.constant 0 : i32
    %c0_i32_0 = arith.constant 0 : i32
    %c0_i32_1 = arith.constant 0 : i32
    return %c0_i32, %c0_i32_0 : i32, i32
  }
  func.func @transform_3(%arg0: i32) -> (i32, i32) {
    %c0_i32 = arith.constant 0 : i32
    %c0_i32_0 = arith.constant 0 : i32
    %c0_i32_1 = arith.constant 0 : i32
    return %c0_i32, %c0_i32_0 : i32, i32
  }
  func.func @transform_4(%arg0: i32) -> (i32, i32) {
    %c0_i32 = arith.constant 0 : i32
    %c0_i32_0 = arith.constant 0 : i32
    %c0_i32_1 = arith.constant 0 : i32
    return %c0_i32, %c0_i32_0 : i32, i32
  }
  func.func @transform_5(%arg0: i32) -> (i32, i32) {
    %c0_i32 = arith.constant 0 : i32
    %c0_i32_0 = arith.constant 0 : i32
    %c0_i32_1 = arith.constant 0 : i32
    return %c0_i32, %c0_i32_0 : i32, i32
  }
  func.func @transform_6(%arg0: i32) -> (i32, i32) {
    %c0_i32 = arith.constant 0 : i32
    %c0_i32_0 = arith.constant 0 : i32
    %c0_i32_1 = arith.constant 0 : i32
    return %c0_i32, %c0_i32_0 : i32, i32
  }
  func.func @transform_7(%arg0: i32) -> (i32, i32) {
    %c0_i32 = arith.constant 0 : i32
    %c0_i32_0 = arith.constant 0 : i32
    return %arg0, %c0_i32 : i32, i32
  }
}

module attributes {stable_mosaic.version = 11 : i64} {
  func.func @mlp_kernel(%arg0: i32, %arg1: memref<8x784xbf16, #tpu.memory_space<vmem>>, %arg2: memref<784x512xbf16, #tpu.memory_space<vmem>>, %arg3: memref<1x512xf32, #tpu.memory_space<vmem>>, %arg4: memref<512x512xbf16, #tpu.memory_space<vmem>>, %arg5: memref<1x512xf32, #tpu.memory_space<vmem>>, %arg6: memref<512x128xbf16, #tpu.memory_space<vmem>>, %arg7: memref<1x128xf32, #tpu.memory_space<vmem>>, %arg8: memref<8x128xf32, #tpu.memory_space<vmem>>) attributes {dimension_semantics = [#tpu.dimension_semantics<parallel>], iteration_bounds = array<i64: 1>, scalar_prefetch = 0 : i64, scratch_operands = 0 : i64, tpu.core_type = #tpu.core_type<tc>, window_params = [{transform_indices = @transform_0, window_bounds = array<i64: 8, 784>}, {pipeline_mode = #tpu.pipeline_mode<synchronous>, transform_indices = @transform_1, window_bounds = array<i64: 784, 512>}, {pipeline_mode = #tpu.pipeline_mode<synchronous>, transform_indices = @transform_2, window_bounds = array<i64: 1, 512>}, {pipeline_mode = #tpu.pipeline_mode<synchronous>, transform_indices = @transform_3, window_bounds = array<i64: 512, 512>}, {pipeline_mode = #tpu.pipeline_mode<synchronous>, transform_indices = @transform_4, window_bounds = array<i64: 1, 512>}, {pipeline_mode = #tpu.pipeline_mode<synchronous>, transform_indices = @transform_5, window_bounds = array<i64: 512, 128>}, {pipeline_mode = #tpu.pipeline_mode<synchronous>, transform_indices = @transform_6, window_bounds = array<i64: 1, 128>}, {transform_indices = @transform_7, window_bounds = array<i64: 8, 128>}]} {
    %c0 = arith.constant 0 : index
    %c0_0 = arith.constant 0 : index
    %0 = vector.load %arg1[%c0, %c0_0] : memref<8x784xbf16, #tpu.memory_space<vmem>>, vector<8x784xbf16>
    %c0_1 = arith.constant 0 : index
    %c0_2 = arith.constant 0 : index
    %1 = vector.load %arg2[%c0_1, %c0_2] : memref<784x512xbf16, #tpu.memory_space<vmem>>, vector<784x512xbf16>
    %cst = arith.constant dense<0.000000e+00> : vector<8x512xf32>
    %2 = tpu.matmul %0, %1, %cst {dimension_numbers = #tpu.dot_dimension_numbers<[1], [0], [0], [1], [0, 0, 1, 1], [], []>} : vector<8x784xbf16>, vector<784x512xbf16>, vector<8x512xf32> -> vector<8x512xf32>
    %c0_3 = arith.constant 0 : index
    %c0_4 = arith.constant 0 : index
    %3 = vector.load %arg3[%c0_3, %c0_4] : memref<1x512xf32, #tpu.memory_space<vmem>>, vector<1x512xf32>
    %4 = vector.broadcast %3 : vector<1x512xf32> to vector<8x512xf32>
    %5 = arith.addf %2, %4 : vector<8x512xf32>
    %cst_5 = arith.constant 0.000000e+00 : f32
    %6 = vector.broadcast %cst_5 : f32 to vector<8x512xf32>
    %7 = arith.maximumf %5, %6 : vector<8x512xf32>
    %8 = arith.truncf %7 : vector<8x512xf32> to vector<8x512xbf16>
    %c0_6 = arith.constant 0 : index
    %c0_7 = arith.constant 0 : index
    %9 = vector.load %arg4[%c0_6, %c0_7] : memref<512x512xbf16, #tpu.memory_space<vmem>>, vector<512x512xbf16>
    %cst_8 = arith.constant dense<0.000000e+00> : vector<8x512xf32>
    %10 = tpu.matmul %8, %9, %cst_8 {dimension_numbers = #tpu.dot_dimension_numbers<[1], [0], [0], [1], [0, 0, 1, 1], [], []>} : vector<8x512xbf16>, vector<512x512xbf16>, vector<8x512xf32> -> vector<8x512xf32>
    %c0_9 = arith.constant 0 : index
    %c0_10 = arith.constant 0 : index
    %11 = vector.load %arg5[%c0_9, %c0_10] : memref<1x512xf32, #tpu.memory_space<vmem>>, vector<1x512xf32>
    %12 = vector.broadcast %11 : vector<1x512xf32> to vector<8x512xf32>
    %13 = arith.addf %10, %12 : vector<8x512xf32>
    %cst_11 = arith.constant 0.000000e+00 : f32
    %14 = vector.broadcast %cst_11 : f32 to vector<8x512xf32>
    %15 = arith.maximumf %13, %14 : vector<8x512xf32>
    %16 = arith.truncf %15 : vector<8x512xf32> to vector<8x512xbf16>
    %c0_12 = arith.constant 0 : index
    %c0_13 = arith.constant 0 : index
    %17 = vector.load %arg6[%c0_12, %c0_13] : memref<512x128xbf16, #tpu.memory_space<vmem>>, vector<512x128xbf16>
    %cst_14 = arith.constant dense<0.000000e+00> : vector<8x128xf32>
    %18 = tpu.matmul %16, %17, %cst_14 {dimension_numbers = #tpu.dot_dimension_numbers<[1], [0], [0], [1], [0, 0, 1, 1], [], []>} : vector<8x512xbf16>, vector<512x128xbf16>, vector<8x128xf32> -> vector<8x128xf32>
    %c0_15 = arith.constant 0 : index
    %c0_16 = arith.constant 0 : index
    %19 = vector.load %arg7[%c0_15, %c0_16] : memref<1x128xf32, #tpu.memory_space<vmem>>, vector<1x128xf32>
    %20 = vector.broadcast %19 : vector<1x128xf32> to vector<8x128xf32>
    %21 = arith.addf %18, %20 : vector<8x128xf32>
    %c0_17 = arith.constant 0 : index
    %c0_18 = arith.constant 0 : index
    %22 = vector.load %arg8[%c0_17, %c0_18] : memref<8x128xf32, #tpu.memory_space<vmem>>, vector<8x128xf32>
    tpu.vector_store %arg8[%c0_17, %c0_18], %21 {strides = array<i32>} : memref<8x128xf32, #tpu.memory_space<vmem>>, vector<8x128xf32>,
    return
  }
  func.func @transform_0(%arg0: i32) -> (i32, i32) {
    %c0_i32 = arith.constant 0 : i32
    %c0_i32_0 = arith.constant 0 : i32
    return %arg0, %c0_i32 : i32, i32
  }
  func.func @transform_1(%arg0: i32) -> (i32, i32) {
    %c0_i32 = arith.constant 0 : i32
    %c0_i32_0 = arith.constant 0 : i32
    %c0_i32_1 = arith.constant 0 : i32
    return %c0_i32, %c0_i32_0 : i32, i32
  }
  func.func @transform_2(%arg0: i32) -> (i32, i32) {
    %c0_i32 = arith.constant 0 : i32
    %c0_i32_0 = arith.constant 0 : i32
    %c0_i32_1 = arith.constant 0 : i32
    return %c0_i32, %c0_i32_0 : i32, i32
  }
  func.func @transform_3(%arg0: i32) -> (i32, i32) {
    %c0_i32 = arith.constant 0 : i32
    %c0_i32_0 = arith.constant 0 : i32
    %c0_i32_1 = arith.constant 0 : i32
    return %c0_i32, %c0_i32_0 : i32, i32
  }
  func.func @transform_4(%arg0: i32) -> (i32, i32) {
    %c0_i32 = arith.constant 0 : i32
    %c0_i32_0 = arith.constant 0 : i32
    %c0_i32_1 = arith.constant 0 : i32
    return %c0_i32, %c0_i32_0 : i32, i32
  }
  func.func @transform_5(%arg0: i32) -> (i32, i32) {
    %c0_i32 = arith.constant 0 : i32
    %c0_i32_0 = arith.constant 0 : i32
    %c0_i32_1 = arith.constant 0 : i32
    return %c0_i32, %c0_i32_0 : i32, i32
  }
  func.func @transform_6(%arg0: i32) -> (i32, i32) {
    %c0_i32 = arith.constant 0 : i32
    %c0_i32_0 = arith.constant 0 : i32
    %c0_i32_1 = arith.constant 0 : i32
    return %c0_i32, %c0_i32_0 : i32, i32
  }
  func.func @transform_7(%arg0: i32) -> (i32, i32) {
    %c0_i32 = arith.constant 0 : i32
    %c0_i32_0 = arith.constant 0 : i32
    return %arg0, %c0_i32 : i32, i32
  }
}

</mosaic_0001>

<bundles_post_ra>
// kernel: mlp_forward.1
= control target key start
LH: loop header
LB: loop body
LE: loop exit
PB: predicated region body
PF: predicated region fallthrough
CT: control target
= control target key end

     0   :  { %12 = vsyncpa [#allocation3], 0  ;;  %s5106_s0 = inlined_call_operand.vmem [shape: bf16[8,784], index: 0, kind: input, shape index: {}]   ;;  %s5107_s1 = inlined_call_operand.hbm [shape: bf16[784,512], index: 1, kind: input, shape index: {}]   ;;  %s5108_s2 = inlined_call_operand.vmem [shape: f32[1,512], index: 2, kind: input, shape index: {}]   ;;  %s5109_s3 = inlined_call_operand.hbm [shape: bf16[512,512], index: 3, kind: input, shape index: {}]   ;;  %s5110_s4 = inlined_call_operand.vmem [shape: f32[1,512], index: 4, kind: input, shape index: {}]   ;;  %s5111_s5 = inlined_call_operand.vmem [shape: bf16[512,128], index: 5, kind: input, shape index: {}]   ;;  %s5112_s6 = inlined_call_operand.vmem [shape: f32[1,128], index: 6, kind: input, shape index: {}]   ;;  %s5113_s7 = inlined_call_operand.vmem [shape: f32[8,128], index: 7, kind: output, shape index: {}]  }
   0x1   :  { %s20_s26 = sshll.u32 %s5107_s1, 4  ;;  %s21_s26 = int_to_ptr.hbm [resolvable:$true] %s20_s26 }
   0x2   :  { %13 = vsyncpa [#allocation5], 0  ;;  %s4803_s27 = smov [#allocation2]   ;;  %s35_s8 = sshll.u32 %s5109_s3, 4  ;;  %s36_s8 = int_to_ptr.hbm [resolvable:$true] %s35_s8 }
   0x3   :  { %s22_s28 = sshll.u32 %s4803_s27, 4  ;;  %s4804_s9 = smov 256   ;;  %s23_s28 = int_to_ptr.vmem [resolvable:$true] %s22_s28 }
   0x4   :  { %s4805_s10 = smov 16   ;;  %s4806_s11 = smov [#allocation4]  }
   0x5   :  { %28 = dma.hbm_to_vmem [thread:$0]  %s21_s26, 25088, %s23_s28, [#allocation3], %s4804_s9, %s4804_s9, %s4805_s10  }
   0x6   :  { %s37_s12 = sshll.u32 %s4806_s11, 4  ;;  %s38_s12 = int_to_ptr.vmem [resolvable:$true] %s37_s12 }
   0x7   :  { %43 = dma.hbm_to_vmem [thread:$0]  %s36_s8, 16384, %s38_s12, [#allocation5], %s4804_s9, %s4804_s9, %s4805_s10  }
   0x8   :  { %4799 = dma.done.wait [#allocation3], 25088  }
   0x9   :  { %4800 = vsyncadd [#allocation3], 4294942208 }
   0xa   :  { %4801 = dma.done.wait [#allocation5], 16384  }
   0xb   :  { %4802 = vsyncadd [#allocation5], 4294950912  ;;  %v3076_v0 = vld [vmem:[#allocation2 + $0xe0] sm:$0xf]  ;;  %v4420_v1 = vld [vmem:[#allocation2 + $0xec] sm:$0xf0] }
   0xc   :  { %v3204_v2 = vld [vmem:[#allocation2 + $0x1e0] sm:$0xf]  ;;  %v3077_v3 = vor.u32 %v4420_v1, %v3076_v0  ;;  %v4452_v4 = vld [vmem:[#allocation2 + $0x1ec] sm:$0xf0]  ;;  %vm1273_vm0 = vcmask 130048  }
   0xd   :  { %v3332_v5 = vld [vmem:[#allocation2 + $0x2e0] sm:$0xf]  ;;  %v4484_v6 = vld [vmem:[#allocation2 + $0x2ec] sm:$0xf0]  ;;  %v3205_v7 = vor.u32 %v4452_v4, %v3204_v2 }
   0xe   :  { %v3333_v8 = vor.u32 %v4484_v6, %v3332_v5  ;;  %v3460_v9 = vld [vmem:[#allocation2 + $0x3e0] sm:$0xf]  ;;  %v4516_v10 = vld [vmem:[#allocation2 + $0x3ec] sm:$0xf0]  ;;  %1277 = vmatpush.bf16.msra.mxu0 %v3077_v3 }
   0xf   :  { %v3060_v11 = vld [vmem:[#allocation2 + $0xc0] sm:$0xf]  ;;  %v3461_v12 = vor.u32 %v4516_v10, %v3460_v9  ;;  %v4416_v13 = vld [vmem:[#allocation2 + $0xcc] sm:$0xf0]  ;;  %1290 = vmatpush.bf16.msra.mxu1 %v3205_v7 }
  0x10   :  { %v3188_v14 = vld [vmem:[#allocation2 + $0x1c0] sm:$0xf]  ;;  %v4448_v15 = vld [vmem:[#allocation2 + $0x1cc] sm:$0xf0]  ;;  %1303 = vmatpush.bf16.msra.mxu2 %v3333_v8  ;;  %v3061_v16 = vor.u32 %v4416_v13, %v3060_v11 }
  0x11   :  { %v3189_v17 = vor.u32 %v4448_v15, %v3188_v14  ;;  %v3316_v18 = vld [vmem:[#allocation2 + $0x2c0] sm:$0xf]  ;;  %v4480_v19 = vld [vmem:[#allocation2 + $0x2cc] sm:$0xf0]  ;;  %1316 = vmatpush.bf16.msra.mxu3 %v3461_v12 }
  0x12   :  { %v3444_v20 = vld [vmem:[#allocation2 + $0x3c0] sm:$0xf]  ;;  %v3317_v21 = vor.u32 %v4480_v19, %v3316_v18  ;;  %v4512_v22 = vld [vmem:[#allocation2 + $0x3cc] sm:$0xf0]  ;;  %1278 = vmatpush.bf16.msra.mxu0 %v3061_v16 }
  0x13   :  { %v3044_v23 = vld [vmem:[#allocation2 + $0xa0] sm:$0xf]  ;;  %v4412_v24 = vld [vmem:[#allocation2 + $0xac] sm:$0xf0]  ;;  %v3445_v25 = vor.u32 %v4512_v22, %v3444_v20  ;;  %1291 = vmatpush.bf16.msra.mxu1 %v3189_v17 }
  0x14   :  { %v3172_v26 = vld [vmem:[#allocation2 + $0x1a0] sm:$0xf]  ;;  %v4444_v27 = vld [vmem:[#allocation2 + $0x1ac] sm:$0xf0]  ;;  %v3045_v29 = vor.u32 %v4412_v24, %v3044_v23  ;;  %1304 = vmatpush.bf16.msra.mxu2 %v3317_v21 }
  0x15   :  { %v3300_v28 = vld [vmem:[#allocation2 + $0x2a0] sm:$0xf]  ;;  %v4476_v30 = vld [vmem:[#allocation2 + $0x2ac] sm:$0xf0]  ;;  %v3173_v33 = vor.u32 %v4444_v27, %v3172_v26  ;;  %1317 = vmatpush.bf16.msra.mxu3 %v3445_v25  ;;  %v60_v25 = vld [vmem:[%s5106_s0 + $0x8] sm:$0xff] }
  0x16   :  { %v3428_v31 = vld [vmem:[#allocation2 + $0x3a0] sm:$0xf]  ;;  %v4508_v32 = vld [vmem:[#allocation2 + $0x3ac] sm:$0xf0]  ;;  %v3301_v34 = vor.u32 %v4476_v30, %v3300_v28  ;;  %1279 = vmatpush.bf16.msra.mxu0 %v3045_v29 }
  0x17   :  { %v3028_v35 = vld [vmem:[#allocation2 + $0x80] sm:$0xf]  ;;  %v4408_v36 = vld [vmem:[#allocation2 + $0x8c] sm:$0xf0]  ;;  %v3429_v38 = vor.u32 %v4508_v32, %v3428_v31  ;;  %1292 = vmatpush.bf16.msra.mxu1 %v3173_v33 }
  0x18   :  { %v3156_v37 = vld [vmem:[#allocation2 + $0x180] sm:$0xf]  ;;  %v4440_v39 = vld [vmem:[#allocation2 + $0x18c] sm:$0xf0]  ;;  %v3029_v44 = vor.u32 %v4408_v36, %v3028_v35  ;;  %1305 = vmatpush.bf16.msra.mxu2 %v3301_v34  ;;  %v4418_v34 = vld [vmem:[#allocation2 + $0xe4] sm:$0xf]  ;;  %v275_v36 = vunpack.c.l.b16 %v60_v25 }
  0x19   :  { %v3284_v40 = vld [vmem:[#allocation2 + $0x280] sm:$0xf]  ;;  %v4472_v41 = vld [vmem:[#allocation2 + $0x28c] sm:$0xf0]  ;;  %v3157_v45 = vor.u32 %v4440_v39, %v3156_v37  ;;  %1318 = vmatpush.bf16.msra.mxu3 %v3429_v38  ;;  %v3078_v35 = vld [vmem:[#allocation2 + $0xf0] sm:$0xf0] }
  0x1a   :  { %v3412_v42 = vld [vmem:[#allocation2 + $0x380] sm:$0xf]  ;;  %v4504_v43 = vld [vmem:[#allocation2 + $0x38c] sm:$0xf0]  ;;  %v3285_v46 = vor.u32 %v4472_v41, %v3284_v40  ;;  %1280 = vmatpush.bf16.msra.mxu0 %v3029_v44 }
  0x1b   :  { %v3012_v47 = vld [vmem:[#allocation2 + $0x60] sm:$0xf]  ;;  %v4404_v48 = vld [vmem:[#allocation2 + $0x6c] sm:$0xf0]  ;;  %v3413_v50 = vor.u32 %v4504_v43, %v3412_v42  ;;  %1293 = vmatpush.bf16.msra.mxu1 %v3157_v45  ;;  %v276_v42 = vunpack.c.h.b16 %v60_v25  ;;  %v4438_v25 = vld [vmem:[#allocation2 + $0x184] sm:$0xf] }
  0x1c   :  { %v3140_v49 = vld [vmem:[#allocation2 + $0x160] sm:$0xf]  ;;  %v4436_v51 = vld [vmem:[#allocation2 + $0x16c] sm:$0xf0]  ;;  %v3013_v56 = vor.u32 %v4404_v48, %v3012_v47  ;;  %1306 = vmatpush.bf16.msra.mxu2 %v3285_v46  ;;  %v4450_v46 = vld [vmem:[#allocation2 + $0x1e4] sm:$0xf] }
  0x1d   :  { %v3268_v52 = vld [vmem:[#allocation2 + $0x260] sm:$0xf]  ;;  %v4468_v53 = vld [vmem:[#allocation2 + $0x26c] sm:$0xf0]  ;;  %v3141_v57 = vor.u32 %v4436_v51, %v3140_v49  ;;  %1319 = vmatpush.bf16.msra.mxu3 %v3413_v50  ;;  %v3206_v47 = vld [vmem:[#allocation2 + $0x1f0] sm:$0xf0]  ;;  %v3081_v49 = vor.u32 %v4418_v34, %v3078_v35 }
  0x1e   :  { %v3396_v54 = vld [vmem:[#allocation2 + $0x360] sm:$0xf]  ;;  %v4500_v55 = vld [vmem:[#allocation2 + $0x36c] sm:$0xf0]  ;;  %v3269_v58 = vor.u32 %v4468_v53, %v3268_v52  ;;  %1281 = vmatpush.bf16.msra.mxu0 %v3013_v56  ;;  %v4859_v53 = vpack.c.b16 %v275_v36, %v275_v36  ;;  %v3062_v56 = vld [vmem:[#allocation2 + $0xd0] sm:$0xf0] }
  0x1f   :  { %v2996_v59 = vld [vmem:[#allocation2 + $0x40] sm:$0xf]  ;;  %v4400_v60 = vld [vmem:[#allocation2 + $0x4c] sm:$0xf0]  ;;  %v3397_v62 = vor.u32 %v4500_v55, %v3396_v54  ;;  %1294 = vmatpush.bf16.msra.mxu1 %v3141_v57  ;;  %v4414_v55 = vld [vmem:[#allocation2 + $0xc4] sm:$0xf] }
  0x20   :  { %v3124_v61 = vld [vmem:[#allocation2 + $0x140] sm:$0xf]  ;;  %v4432_v63 = vld [vmem:[#allocation2 + $0x14c] sm:$0xf0]  ;;  %v2997_v4 = vor.u32 %v4400_v60, %v2996_v59  ;;  %1307 = vmatpush.bf16.msra.mxu2 %v3269_v58  ;;  %v4863_v60 = vpack.c.b16 %v276_v42, %v276_v42  ;;  %v3014_v34 = vld [vmem:[#allocation2 + $0x70] sm:$0xf0] }
  0x21   :  { %v3252_v0 = vld [vmem:[#allocation2 + $0x240] sm:$0xf]  ;;  %v4464_v1 = vld [vmem:[#allocation2 + $0x24c] sm:$0xf0]  ;;  %v3125_v5 = vor.u32 %v4432_v63, %v3124_v61  ;;  %1320 = vmatpush.bf16.msra.mxu3 %v3397_v62  ;;  %v3209_v61 = vor.u32 %v4450_v46, %v3206_v47  ;;  %v4446_v63 = vld [vmem:[#allocation2 + $0x1c4] sm:$0xf] }
  0x22   :  { %v3380_v2 = vld [vmem:[#allocation2 + $0x340] sm:$0xf]  ;;  %v4496_v3 = vld [vmem:[#allocation2 + $0x34c] sm:$0xf0]  ;;  %v3253_v6 = vor.u32 %v4464_v1, %v3252_v0  ;;  %1282 = vmatpush.bf16.msra.mxu0 %v2997_v4  ;;  %v3190_v0 = vld [vmem:[#allocation2 + $0x1d0] sm:$0xf0] }
  0x23   :  { %v2980_v7 = vld [vmem:[#allocation2 + $0x20] sm:$0xf]  ;;  %v4396_v8 = vld [vmem:[#allocation2 + $0x2c] sm:$0xf0]  ;;  %v3381_v10 = vor.u32 %v4496_v3, %v3380_v2  ;;  %1295 = vmatpush.bf16.msra.mxu1 %v3125_v5  ;;  %v3065_v2 = vor.u32 %v4414_v55, %v3062_v56  ;;  %v4398_v46 = vld [vmem:[#allocation2 + $0x44] sm:$0xf] }
  0x24   :  { %v3108_v9 = vld [vmem:[#allocation2 + $0x120] sm:$0xf]  ;;  %v4428_v11 = vld [vmem:[#allocation2 + $0x12c] sm:$0xf0]  ;;  %v2981_v17 = vor.u32 %v4396_v8, %v2980_v7  ;;  %1308 = vmatpush.bf16.msra.mxu2 %v3253_v6  ;;  %v4410_v7 = vld [vmem:[#allocation2 + $0xa4] sm:$0xf] }
  0x25   :  { %v3236_v12 = vld [vmem:[#allocation2 + $0x220] sm:$0xf]  ;;  %v4460_v13 = vld [vmem:[#allocation2 + $0x22c] sm:$0xf0]  ;;  %v3109_v21 = vor.u32 %v4428_v11, %v3108_v9  ;;  %1321 = vmatpush.bf16.msra.mxu3 %v3381_v10  ;;  %v3046_v8 = vld [vmem:[#allocation2 + $0xb0] sm:$0xf0]  ;;  %v3193_v10 = vor.u32 %v4446_v63, %v3190_v0 }
  0x26   :  { %v3364_v14 = vld [vmem:[#allocation2 + $0x320] sm:$0xf]  ;;  %v4492_v15 = vld [vmem:[#allocation2 + $0x32c] sm:$0xf0]  ;;  %v3237_v22 = vor.u32 %v4460_v13, %v3236_v12  ;;  %1283 = vmatpush.bf16.msra.mxu0 %v2981_v17  ;;  %v4442_v12 = vld [vmem:[#allocation2 + $0x1a4] sm:$0xf] }
  0x27   :  { %v2964_v16 = vld [vmem:[#allocation2] sm:$0xf]  ;;  %v4392_v18 = vld [vmem:[#allocation2 + $0xc] sm:$0xf0]  ;;  %v3365_v26 = vor.u32 %v4492_v15, %v3364_v14  ;;  %1296 = vmatpush.bf16.msra.mxu1 %v3109_v21  ;;  %v3174_v13 = vld [vmem:[#allocation2 + $0x1b0] sm:$0xf0]  ;;  %v3049_v15 = vor.u32 %v4410_v7, %v3046_v8 }
  0x28   :  { %v3092_v19 = vld [vmem:[#allocation2 + $0x100] sm:$0xf]  ;;  %v4424_v20 = vld [vmem:[#allocation2 + $0x10c] sm:$0xf0]  ;;  %v2965_v33 = vor.u32 %v4392_v18, %v2964_v16  ;;  %1309 = vmatpush.bf16.msra.mxu2 %v3237_v22  ;;  %v3030_v21 = vld [vmem:[#allocation2 + $0x90] sm:$0xf0] }
  0x29   :  { %v3220_v23 = vld [vmem:[#allocation2 + $0x200] sm:$0xf]  ;;  %v4456_v24 = vld [vmem:[#allocation2 + $0x20c] sm:$0xf0]  ;;  %v3093_v38 = vor.u32 %v4424_v20, %v3092_v19  ;;  %1322 = vmatpush.bf16.msra.mxu3 %v3365_v26  ;;  %v4406_v20 = vld [vmem:[#allocation2 + $0x84] sm:$0xf] }
  0x2a   :  { %v3348_v27 = vld [vmem:[#allocation2 + $0x300] sm:$0xf]  ;;  %v4488_v28 = vld [vmem:[#allocation2 + $0x30c] sm:$0xf0]  ;;  %v3221_v39 = vor.u32 %v4456_v24, %v3220_v23  ;;  %1284 = vmatpush.bf16.msra.mxu0 %v2965_v33  ;;  %v62_v22 = vld [vmem:[%s5106_s0 + $0x18] sm:$0xf]  ;;  %v3177_v23 = vor.u32 %v4442_v12, %v3174_v13 }
  0x2b   :  { %v3588_v29 = vld [vmem:[#allocation2 + $0x4e0] sm:$0xf]  ;;  %v4548_v30 = vld [vmem:[#allocation2 + $0x4ec] sm:$0xf0]  ;;  %v3349_v43 = vor.u32 %v4488_v28, %v3348_v27  ;;  %1297 = vmatpush.bf16.msra.mxu1 %v3093_v38  ;;  %v3158_v26 = vld [vmem:[#allocation2 + $0x190] sm:$0xf0]  ;;  %v3033_v28 = vor.u32 %v4406_v20, %v3030_v21  ;;  %v279_v35 = vunpack.c.l.b16 %v62_v22 }
  0x2c   :  { %v3716_v31 = vld [vmem:[#allocation2 + $0x5e0] sm:$0xf]  ;;  %v4580_v32 = vld [vmem:[#allocation2 + $0x5ec] sm:$0xf0]  ;;  %v3589_v44 = vor.u32 %v4548_v30, %v3588_v29  ;;  %1310 = vmatpush.bf16.msra.mxu2 %v3221_v39  ;;  %v4402_v33 = vld [vmem:[#allocation2 + $0x64] sm:$0xf]  ;;  %v3161_v36 = vor.u32 %v4438_v25, %v3158_v26 }
  0x2d   :  { %v59_v37 = vld [vmem:[%s5106_s0] sm:$0xff]  ;;  %v4584_v45 = vld [vmem:[#allocation2 + $0x60c] sm:$0xf0]  ;;  %v3717_v48 = vor.u32 %v4580_v32, %v3716_v31  ;;  %1323 = vmatpush.bf16.msra.mxu3 %v3349_v43  ;;  %v3142_v39 = vld [vmem:[#allocation2 + $0x170] sm:$0xf0] }
  0x2e   :  { %v3732_v40 = vld [vmem:[#allocation2 + $0x600] sm:$0xf]  ;;  %v273_v41 = vunpack.c.l.b16 %v59_v37  ;;  %v4544_v51 = vld [vmem:[#allocation2 + $0x4cc] sm:$0xf0]  ;;  %v274_v58 = vunpack.c.h.b16 %v59_v37  ;;  %1329 = vmatpush.bf16.msrb.mxu0 %v3589_v44  ;;  %v4434_v38 = vld [vmem:[#allocation2 + $0x164] sm:$0xf] }
  0x2f   :  { %v3572_v50 = vld [vmem:[#allocation2 + $0x4c0] sm:$0xf]  ;;  %v4576_v54 = vld [vmem:[#allocation2 + $0x5cc] sm:$0xf0]  ;;  %v3733_v59 = vor.u32 %v4584_v45, %v3732_v40  ;;  %1342 = vmatpush.bf16.msrb.mxu1 %v3717_v48  ;;  %1311 = vmatmul.bf16.vlgmr.msra.gmra.mxu2 %v4859_v53  ;;  %v2998_v47 = vld [vmem:[#allocation2 + $0x50] sm:$0xf0]  ;;  %v4874_v48 = vpack.c.b16 %v279_v35, %v279_v35 }
  0x30   :  { %v3700_v52 = vld [vmem:[#allocation2 + $0x5c0] sm:$0xf]  ;;  %v4861_v57 = vpack.c.b16 %v273_v41, %v273_v41  ;;  %v3573_v62 = vor.u32 %v4544_v51, %v3572_v50  ;;  %v4540_v4 = vld [vmem:[#allocation2 + $0x4ac] sm:$0xf0]  ;;  %v4867_v9 = vpack.c.b16 %v274_v58, %v274_v58  ;;  %1324 = vmatmul.bf16.vlgmr.msra.gmra.mxu3 %v4863_v60  ;;  %v3017_v41 = vor.u32 %v4402_v33, %v3014_v34  ;;  %v4430_v51 = vld [vmem:[#allocation2 + $0x144] sm:$0xf] }
  0x31   :  { %1368 = vmatpush.bf16.msrb.mxu3 %v3081_v49  ;;  %v3701_v1 = vor.u32 %v4576_v54, %v3700_v52  ;;  %v3556_v3 = vld [vmem:[#allocation2 + $0x4a0] sm:$0xf]  ;;  %v4572_v6 = vld [vmem:[#allocation2 + $0x5ac] sm:$0xf0]  ;;  %1362 = vmatpush.bf16.msrb.mxu2 %v3733_v59  ;;  %v3145_v49 = vor.u32 %v4434_v38, %v3142_v39  ;;  %v3126_v52 = vld [vmem:[#allocation2 + $0x150] sm:$0xf0]  ;;  %v3001_v55 = vor.u32 %v4398_v46, %v2998_v47 }
  0x32   :  { %v3684_v5 = vld [vmem:[#allocation2 + $0x5a0] sm:$0xf]  ;;  %1285 = vmatmul.bf16.vlgmr.msra.gmra.mxu0 %v4861_v57  ;;  %v3557_v11 = vor.u32 %v4540_v4, %v3556_v3  ;;  %v4536_v17 = vld [vmem:[#allocation2 + $0x48c] sm:$0xf0]  ;;  %1298 = vmatmul.bf16.vlgmr.msra.gmra.mxu1 %v4867_v9  ;;  %v2982_v63 = vld [vmem:[#allocation2 + $0x30] sm:$0xf0] }
  0x33   :  { %1330 = vmatpush.bf16.msrb.mxu0 %v3573_v62  ;;  %1343 = vmatpush.bf16.msrb.mxu1 %v3701_v1  ;;  %v3685_v14 = vor.u32 %v4572_v6, %v3684_v5  ;;  %v3540_v16 = vld [vmem:[#allocation2 + $0x480] sm:$0xf]  ;;  %v4568_v19 = vld [vmem:[#allocation2 + $0x58c] sm:$0xf0]  ;;  %v4394_v62 = vld [vmem:[#allocation2 + $0x24] sm:$0xf]  ;;  %v3129_v1 = vor.u32 %v4430_v51, %v3126_v52 }
  0x34   :  { %v3668_v18 = vld [vmem:[#allocation2 + $0x580] sm:$0xf]  ;;  %v3541_v24 = vor.u32 %v4536_v17, %v3540_v16  ;;  %v4532_v30 = vld [vmem:[#allocation2 + $0x46c] sm:$0xf0]  ;;  %v4426_v0 = vld [vmem:[#allocation2 + $0x124] sm:$0xf]  ;;  %v2985_v7 = vor.u32 %v4394_v62, %v2982_v63 }
  0x35   :  { %1381 = vmatpush.bf16.msra.mxu2 %v3209_v61  ;;  %1369 = vmatpush.bf16.msrb.mxu3 %v3065_v2  ;;  %v3669_v27 = vor.u32 %v4568_v19, %v3668_v18  ;;  %v3524_v29 = vld [vmem:[#allocation2 + $0x460] sm:$0xf]  ;;  %v4564_v32 = vld [vmem:[#allocation2 + $0x56c] sm:$0xf0]  ;;  %v3110_v3 = vld [vmem:[#allocation2 + $0x130] sm:$0xf0] }
  0x36   :  { %v3652_v31 = vld [vmem:[#allocation2 + $0x560] sm:$0xf]  ;;  %v3525_v37 = vor.u32 %v4532_v30, %v3524_v29  ;;  %v4528_v43 = vld [vmem:[#allocation2 + $0x44c] sm:$0xf0]  ;;  %v4390_v12 = vld [vmem:[#allocation2 + $0x4] sm:$0xf]  ;;  %v3113_v19 = vor.u32 %v4426_v0, %v3110_v3 }
  0x37   :  { %1331 = vmatpush.bf16.msrb.mxu0 %v3557_v11  ;;  %1344 = vmatpush.bf16.msrb.mxu1 %v3685_v14  ;;  %v3653_v40 = vor.u32 %v4564_v32, %v3652_v31  ;;  %v3508_v42 = vld [vmem:[#allocation2 + $0x440] sm:$0xf]  ;;  %v4560_v45 = vld [vmem:[#allocation2 + $0x54c] sm:$0xf0]  ;;  %v2966_v13 = vld [vmem:[#allocation2 + $0x10] sm:$0xf0] }
  0x38   :  { %v3636_v44 = vld [vmem:[#allocation2 + $0x540] sm:$0xf]  ;;  %v3509_v50 = vor.u32 %v4528_v43, %v3508_v42  ;;  %v4524_v58 = vld [vmem:[#allocation2 + $0x42c] sm:$0xf0]  ;;  %v4482_v14 = vld [vmem:[#allocation2 + $0x2e4] sm:$0xf]  ;;  %v2969_v25 = vor.u32 %v4390_v12, %v2966_v13 }
  0x39   :  { %1382 = vmatpush.bf16.msra.mxu2 %v3193_v10  ;;  %1370 = vmatpush.bf16.msrb.mxu3 %v3049_v15  ;;  %v3637_v54 = vor.u32 %v4560_v45, %v3636_v44  ;;  %v3492_v56 = vld [vmem:[#allocation2 + $0x420] sm:$0xf]  ;;  %v4556_v61 = vld [vmem:[#allocation2 + $0x52c] sm:$0xf0]  ;;  %v3334_v15 = vld [vmem:[#allocation2 + $0x2f0] sm:$0xf0] }
  0x3a   :  { %v3620_v59 = vld [vmem:[#allocation2 + $0x520] sm:$0xf]  ;;  %v3493_v2 = vor.u32 %v4524_v58, %v3492_v56  ;;  %v61_v5 = vld [vmem:[%s5106_s0 + $0x10] sm:$0xff]  ;;  %v4514_v16 = vld [vmem:[#allocation2 + $0x3e4] sm:$0xf] }
  0x3b   :  { %1332 = vmatpush.bf16.msrb.mxu0 %v3541_v24  ;;  %1345 = vmatpush.bf16.msrb.mxu1 %v3669_v27  ;;  %v3476_v4 = vld [vmem:[#allocation2 + $0x400] sm:$0xf]  ;;  %v3621_v6 = vor.u32 %v4556_v61, %v3620_v59  ;;  %v4520_v8 = vld [vmem:[#allocation2 + $0x40c] sm:$0xf0]  ;;  %v3462_v17 = vld [vmem:[#allocation2 + $0x3f0] sm:$0xf0]  ;;  %v277_v18 = vunpack.c.l.b16 %v61_v5 }
  0x3c   :  { %v3604_v10 = vld [vmem:[#allocation2 + $0x500] sm:$0xf]  ;;  %v4552_v11 = vld [vmem:[#allocation2 + $0x50c] sm:$0xf0]  ;;  %v3477_v20 = vor.u32 %v4520_v8, %v3476_v4  ;;  %v4546_v21 = vld [vmem:[#allocation2 + $0x4e4] sm:$0xf]  ;;  %v3465_v29 = vor.u32 %v4514_v16, %v3462_v17 }
  0x3d   :  { %1383 = vmatpush.bf16.msra.mxu2 %v3177_v23  ;;  %1371 = vmatpush.bf16.msrb.mxu3 %v3033_v28  ;;  %v3590_v22 = vld [vmem:[#allocation2 + $0x4f0] sm:$0xf0]  ;;  %v278_v23 = vunpack.c.h.b16 %v61_v5  ;;  %v3605_v24 = vor.u32 %v4552_v11, %v3604_v10  ;;  %v4422_v26 = vld [vmem:[#allocation2 + $0x104] sm:$0xf]  ;;  %v3337_v28 = vor.u32 %v4482_v14, %v3334_v15  ;;  %v4881_v34 = vpack.c.b16 %v277_v18, %v277_v18 }
  0x3e   :  { %v3094_v27 = vld [vmem:[#allocation2 + $0x110] sm:$0xf0]  ;;  %v4578_v30 = vld [vmem:[#allocation2 + $0x5e4] sm:$0xf]  ;;  %v3593_v33 = vor.u32 %v4546_v21, %v3590_v22 }
  0x3f   :  { %1333 = vmatpush.bf16.msrb.mxu0 %v3525_v37  ;;  %1346 = vmatpush.bf16.msrb.mxu1 %v3653_v40  ;;  %v3718_v31 = vld [vmem:[#allocation2 + $0x5f0] sm:$0xf0]  ;;  %v4478_v32 = vld [vmem:[#allocation2 + $0x2c4] sm:$0xf]  ;;  %v3097_v38 = vor.u32 %v4422_v26, %v3094_v27  ;;  %v4883_v39 = vpack.c.b16 %v278_v23, %v278_v23 }
  0x40   :  { %3746 = vmatmul.msk.bf16.vlgmr.msrb.gmra.mxu2 %vm1273_vm0, %v4874_v48  ;;  %v3318_v35 = vld [vmem:[#allocation2 + $0x2d0] sm:$0xf0]  ;;  %v4542_v40 = vld [vmem:[#allocation2 + $0x4c4] sm:$0xf]  ;;  %v3721_v42 = vor.u32 %v4578_v30, %v3718_v31 }
  0x41   :  { %1384 = vmatpush.bf16.msra.mxu2 %v3161_v36  ;;  %1372 = vmatpush.bf16.msrb.mxu3 %v3017_v41  ;;  %v4510_v36 = vld [vmem:[#allocation2 + $0x3c4] sm:$0xf]  ;;  %v3446_v37 = vld [vmem:[#allocation2 + $0x3d0] sm:$0xf0]  ;;  %v3321_v43 = vor.u32 %v4478_v32, %v3318_v35 }
  0x42   :  { %v3574_v41 = vld [vmem:[#allocation2 + $0x4d0] sm:$0xf0]  ;;  %v3449_v44 = vor.u32 %v4510_v36, %v3446_v37  ;;  %v4574_v45 = vld [vmem:[#allocation2 + $0x5c4] sm:$0xf] }
  0x43   :  { %1334 = vmatpush.bf16.msrb.mxu0 %v3509_v50  ;;  %1347 = vmatpush.bf16.msrb.mxu1 %v3637_v54  ;;  %v3702_v46 = vld [vmem:[#allocation2 + $0x5d0] sm:$0xf0]  ;;  %v4474_v47 = vld [vmem:[#allocation2 + $0x2a4] sm:$0xf] }
  0x44   :  { %v3302_v50 = vld [vmem:[#allocation2 + $0x2b0] sm:$0xf0]  ;;  %v4506_v51 = vld [vmem:[#allocation2 + $0x3a4] sm:$0xf]  ;;  %v3705_v56 = vor.u32 %v4574_v45, %v3702_v46 }
  0x45   :  { %1385 = vmatpush.bf16.msra.mxu2 %v3145_v49  ;;  %1373 = vmatpush.bf16.msrb.mxu3 %v3001_v55  ;;  %v3577_v49 = vor.u32 %v4542_v40, %v3574_v41  ;;  %v3430_v52 = vld [vmem:[#allocation2 + $0x3b0] sm:$0xf0]  ;;  %v4538_v54 = vld [vmem:[#allocation2 + $0x4a4] sm:$0xf]  ;;  %v3305_v58 = vor.u32 %v4474_v47, %v3302_v50 }
  0x46   :  { %v3558_v55 = vld [vmem:[#allocation2 + $0x4b0] sm:$0xf0]  ;;  %v3433_v59 = vor.u32 %v4506_v51, %v3430_v52  ;;  %v4570_v61 = vld [vmem:[#allocation2 + $0x5a4] sm:$0xf] }
  0x47   :  { %1335 = vmatpush.bf16.msrb.mxu0 %v3493_v2  ;;  %1348 = vmatpush.bf16.msrb.mxu1 %v3621_v6  ;;  %v3686_v62 = vld [vmem:[#allocation2 + $0x5b0] sm:$0xf0]  ;;  %v4470_v63 = vld [vmem:[#allocation2 + $0x284] sm:$0xf]  ;;  %v3561_v0 = vor.u32 %v4538_v54, %v3558_v55 }
  0x48   :  { %v4502_v2 = vld [vmem:[#allocation2 + $0x384] sm:$0xf]  ;;  %v3414_v3 = vld [vmem:[#allocation2 + $0x390] sm:$0xf0]  ;;  %v3689_v6 = vor.u32 %v4570_v61, %v3686_v62  ;;  %v3084_v61 = vld [vmem:[#allocation2 + $0xe8] sm:$0xf] }
  0x49   :  { %1386 = vmatpush.bf16.msra.mxu2 %v3129_v1  ;;  %1374 = vmatpush.bf16.msrb.mxu3 %v2985_v7  ;;  %v3286_v1 = vld [vmem:[#allocation2 + $0x290] sm:$0xf0]  ;;  %v4534_v4 = vld [vmem:[#allocation2 + $0x484] sm:$0xf]  ;;  %v3417_v8 = vor.u32 %v4502_v2, %v3414_v3  ;;  %v4421_v62 = vld [vmem:[#allocation2 + $0xf4] sm:$0xf0] }
  0x4a   :  { %v3542_v5 = vld [vmem:[#allocation2 + $0x490] sm:$0xf0]  ;;  %v3289_v7 = vor.u32 %v4470_v63, %v3286_v1  ;;  %v4566_v10 = vld [vmem:[#allocation2 + $0x584] sm:$0xf]  ;;  %v3340_v2 = vld [vmem:[#allocation2 + $0x2e8] sm:$0xf] }
  0x4b   :  { %1336 = vmatpush.bf16.msrb.mxu0 %v3477_v20  ;;  %1349 = vmatpush.bf16.msrb.mxu1 %v3605_v24  ;;  %v3670_v11 = vld [vmem:[#allocation2 + $0x590] sm:$0xf0]  ;;  %v4466_v12 = vld [vmem:[#allocation2 + $0x264] sm:$0xf]  ;;  %v3545_v13 = vor.u32 %v4534_v4, %v3542_v5  ;;  %v4485_v3 = vld [vmem:[#allocation2 + $0x2f4] sm:$0xf0] }
  0x4c   :  { %v3270_v14 = vld [vmem:[#allocation2 + $0x270] sm:$0xf0]  ;;  %v4498_v15 = vld [vmem:[#allocation2 + $0x364] sm:$0xf] }
  0x4d   :  { %1387 = vmatpush.bf16.msra.mxu2 %v3113_v19  ;;  %1375 = vmatpush.bf16.msrb.mxu3 %v2969_v25  ;;  %v3398_v16 = vld [vmem:[#allocation2 + $0x370] sm:$0xf0]  ;;  %v4530_v17 = vld [vmem:[#allocation2 + $0x464] sm:$0xf]  ;;  %v3673_v19 = vor.u32 %v4566_v10, %v3670_v11  ;;  %v3273_v20 = vor.u32 %v4466_v12, %v3270_v14  ;;  %v3085_v10 = vor.u32 %v4421_v62, %v3084_v61  ;;  %v3468_v11 = vld [vmem:[#allocation2 + $0x3e8] sm:$0xf] }
  0x4e   :  { %1337 = vmatmul.bf16.vlgmr.msrb.gmra.mxu0 %v4881_v34  ;;  %1350 = vmatmul.bf16.vlgmr.msrb.gmra.mxu1 %v4883_v39  ;;  %v3526_v18 = vld [vmem:[#allocation2 + $0x470] sm:$0xf0]  ;;  %v3401_v21 = vor.u32 %v4498_v15, %v3398_v16  ;;  %v4562_v22 = vld [vmem:[#allocation2 + $0x564] sm:$0xf]  ;;  %v4517_v12 = vld [vmem:[#allocation2 + $0x3f4] sm:$0xf0]  ;;  %v3341_v16 = vor.u32 %v4485_v3, %v3340_v2 }
  0x4f   :  { %1394 = vmatpush.bf16.msra.mxu0 %v3337_v28  ;;  %1407 = vmatpush.bf16.msra.mxu1 %v3465_v29  ;;  %v3654_v23 = vld [vmem:[#allocation2 + $0x570] sm:$0xf0]  ;;  %v4462_v24 = vld [vmem:[#allocation2 + $0x244] sm:$0xf]  ;;  %v3529_v25 = vor.u32 %v4530_v17, %v3526_v18  ;;  %v3212_v14 = vld [vmem:[#allocation2 + $0x1e8] sm:$0xf] }
  0x50   :  { %1376 = vmatmul.bf16.vlgmr.msrb.gmra.mxu3 %v4861_v57  ;;  %v3254_v26 = vld [vmem:[#allocation2 + $0x250] sm:$0xf0]  ;;  %v4494_v27 = vld [vmem:[#allocation2 + $0x344] sm:$0xf]  ;;  %v3657_v31 = vor.u32 %v4562_v22, %v3654_v23  ;;  %v4453_v15 = vld [vmem:[#allocation2 + $0x1f4] sm:$0xf0] }
  0x51   :  { %1420 = vmatpush.bf16.msra.mxu3 %v3593_v33  ;;  %1388 = vmatpush.bf16.msra.mxu2 %v3097_v38  ;;  %v3382_v28 = vld [vmem:[#allocation2 + $0x350] sm:$0xf0]  ;;  %v4526_v29 = vld [vmem:[#allocation2 + $0x444] sm:$0xf]  ;;  %v3257_v33 = vor.u32 %v4462_v24, %v3254_v26  ;;  %v3068_v18 = vld [vmem:[#allocation2 + $0xc8] sm:$0xf]  ;;  %v3213_v23 = vor.u32 %v4453_v15, %v3212_v14 }
  0x52   :  { %v3510_v30 = vld [vmem:[#allocation2 + $0x450] sm:$0xf0]  ;;  %v4558_v32 = vld [vmem:[#allocation2 + $0x544] sm:$0xf]  ;;  %v3385_v35 = vor.u32 %v4494_v27, %v3382_v28  ;;  %v4481_v22 = vld [vmem:[#allocation2 + $0x2d4] sm:$0xf0] }
  0x53   :  { %1395 = vmatpush.bf16.msra.mxu0 %v3321_v43  ;;  %1408 = vmatpush.bf16.msra.mxu1 %v3449_v44  ;;  %v3638_v36 = vld [vmem:[#allocation2 + $0x550] sm:$0xf0]  ;;  %v4458_v37 = vld [vmem:[#allocation2 + $0x224] sm:$0xf]  ;;  %v3513_v40 = vor.u32 %v4526_v29, %v3510_v30  ;;  %v3452_v24 = vld [vmem:[#allocation2 + $0x3c8] sm:$0xf] }
  0x54   :  { %1389 = vmatmul.bf16.vlgmr.msra.gmra.mxu2 %v4867_v9  ;;  %v3238_v38 = vld [vmem:[#allocation2 + $0x230] sm:$0xf0]  ;;  %v4490_v41 = vld [vmem:[#allocation2 + $0x324] sm:$0xf]  ;;  %v3641_v45 = vor.u32 %v4558_v32, %v3638_v36  ;;  %v3196_v27 = vld [vmem:[#allocation2 + $0x1c8] sm:$0xf] }
  0x55   :  { %1433 = vmatpush.bf16.msrb.mxu2 %v3721_v42  ;;  %1421 = vmatpush.bf16.msra.mxu3 %v3577_v49  ;;  %v3366_v42 = vld [vmem:[#allocation2 + $0x330] sm:$0xf0]  ;;  %v4522_v43 = vld [vmem:[#allocation2 + $0x424] sm:$0xf]  ;;  %v3241_v49 = vor.u32 %v4458_v37, %v3238_v38  ;;  %v4449_v28 = vld [vmem:[#allocation2 + $0x1d4] sm:$0xf0] }
  0x56   :  { %v3494_v44 = vld [vmem:[#allocation2 + $0x430] sm:$0xf0]  ;;  %v4554_v46 = vld [vmem:[#allocation2 + $0x524] sm:$0xf]  ;;  %v3369_v50 = vor.u32 %v4490_v41, %v3366_v42  ;;  %v3052_v30 = vld [vmem:[#allocation2 + $0xa8] sm:$0xf]  ;;  %v3197_v36 = vor.u32 %v4449_v28, %v3196_v27 }
  0x57   :  { %1396 = vmatpush.bf16.msra.mxu0 %v3305_v58  ;;  %1409 = vmatpush.bf16.msra.mxu1 %v3433_v59  ;;  %v3622_v47 = vld [vmem:[#allocation2 + $0x530] sm:$0xf0]  ;;  %v4454_v51 = vld [vmem:[#allocation2 + $0x204] sm:$0xf]  ;;  %v3497_v55 = vor.u32 %v4522_v43, %v3494_v44  ;;  %v3436_v37 = vld [vmem:[#allocation2 + $0x3a8] sm:$0xf] }
  0x58   :  { %v3222_v52 = vld [vmem:[#allocation2 + $0x210] sm:$0xf0]  ;;  %v4486_v54 = vld [vmem:[#allocation2 + $0x304] sm:$0xf]  ;;  %v4509_v38 = vld [vmem:[#allocation2 + $0x3b4] sm:$0xf0] }
  0x59   :  { %1434 = vmatpush.bf16.msrb.mxu2 %v3705_v56  ;;  %1422 = vmatpush.bf16.msra.mxu3 %v3561_v0  ;;  %v3350_v56 = vld [vmem:[#allocation2 + $0x310] sm:$0xf0]  ;;  %v4518_v58 = vld [vmem:[#allocation2 + $0x404] sm:$0xf]  ;;  %v3625_v0 = vor.u32 %v4554_v46, %v3622_v47  ;;  %v3225_v4 = vor.u32 %v4454_v51, %v3222_v52  ;;  %v3180_v41 = vld [vmem:[#allocation2 + $0x1a8] sm:$0xf]  ;;  %v3437_v46 = vor.u32 %v4509_v38, %v3436_v37 }
  0x5a   :  { %v3478_v59 = vld [vmem:[#allocation2 + $0x410] sm:$0xf0]  ;;  %v4582_v63 = vld [vmem:[#allocation2 + $0x604] sm:$0xf]  ;;  %v3353_v5 = vor.u32 %v4486_v54, %v3350_v56  ;;  %v4445_v42 = vld [vmem:[#allocation2 + $0x1b4] sm:$0xf0] }
  0x5b   :  { %1397 = vmatpush.bf16.msra.mxu0 %v3289_v7  ;;  %1410 = vmatpush.bf16.msra.mxu1 %v3417_v8  ;;  %v3734_v1 = vld [vmem:[#allocation2 + $0x610] sm:$0xf0]  ;;  %v3481_v8 = vor.u32 %v4518_v58, %v3478_v59  ;;  %v3036_v44 = vld [vmem:[#allocation2 + $0x88] sm:$0xf]  ;;  %v4505_v52 = vld [vmem:[#allocation2 + $0x394] sm:$0xf0] }
  0x5c   :  { %v3606_v7 = vld [vmem:[#allocation2 + $0x510] sm:$0xf0]  ;;  %v3292_v47 = vld [vmem:[#allocation2 + $0x288] sm:$0xf]  ;;  %v4441_v56 = vld [vmem:[#allocation2 + $0x194] sm:$0xf0] }
  0x5d   :  { %1435 = vmatpush.bf16.msrb.mxu2 %v3689_v6  ;;  %1423 = vmatpush.bf16.msra.mxu3 %v3545_v13  ;;  %v4550_v6 = vld [vmem:[#allocation2 + $0x504] sm:$0xf]  ;;  %v3737_v13 = vor.u32 %v4582_v63, %v3734_v1  ;;  %v3420_v51 = vld [vmem:[#allocation2 + $0x388] sm:$0xf]  ;;  %v4405_v61 = vld [vmem:[#allocation2 + $0x74] sm:$0xf0] }
  0x5e   :  { %v3609_v17 = vor.u32 %v4550_v6, %v3606_v7  ;;  %v3020_v59 = vld [vmem:[#allocation2 + $0x68] sm:$0xf]  ;;  %v3421_v62 = vor.u32 %v4505_v52, %v3420_v51  ;;  %v4501_v3 = vld [vmem:[#allocation2 + $0x374] sm:$0xf0]  ;;  %v4419_v51 = vld [vmem:[#allocation2 + $0xec] sm:$0xf] }
  0x5f   :  { %1398 = vmatpush.bf16.msra.mxu0 %v3273_v20  ;;  %1411 = vmatpush.bf16.msra.mxu1 %v3401_v21  ;;  %v3469_v20 = vor.u32 %v4517_v12, %v3468_v11  ;;  %v3324_v21 = vld [vmem:[#allocation2 + $0x2c8] sm:$0xf]  ;;  %v4437_v6 = vld [vmem:[#allocation2 + $0x174] sm:$0xf0]  ;;  %v3086_v52 = vld [vmem:[#allocation2 + $0xf8] sm:$0xf0] }
  0x60   :  { %v3325_v29 = vor.u32 %v4481_v22, %v3324_v21  ;;  %v3276_v63 = vld [vmem:[#allocation2 + $0x268] sm:$0xf]  ;;  %v4397_v22 = vld [vmem:[#allocation2 + $0x34] sm:$0xf0] }
  0x61   :  { %1436 = vmatpush.bf16.msrb.mxu2 %v3673_v19  ;;  %1424 = vmatpush.bf16.msra.mxu3 %v3529_v25  ;;  %v4417_v19 = vld [vmem:[#allocation2 + $0xd4] sm:$0xf0]  ;;  %v3404_v2 = vld [vmem:[#allocation2 + $0x368] sm:$0xf] }
  0x62   :  { %v4513_v25 = vld [vmem:[#allocation2 + $0x3d4] sm:$0xf0]  ;;  %v3069_v26 = vor.u32 %v4417_v19, %v3068_v18  ;;  %v3405_v11 = vor.u32 %v4501_v3, %v3404_v2  ;;  %v3260_v12 = vld [vmem:[#allocation2 + $0x248] sm:$0xf]  ;;  %v3089_v3 = vor.u32 %v4419_v51, %v3086_v52 }
  0x63   :  { %1399 = vmatpush.bf16.msra.mxu0 %v3257_v33  ;;  %1412 = vmatpush.bf16.msra.mxu1 %v3385_v35  ;;  %v3453_v32 = vor.u32 %v4513_v25, %v3452_v24  ;;  %v3308_v33 = vld [vmem:[#allocation2 + $0x2a8] sm:$0xf]  ;;  %v4477_v35 = vld [vmem:[#allocation2 + $0x2b4] sm:$0xf0] }
  0x64   :  { %v3309_v43 = vor.u32 %v4477_v35, %v3308_v33  ;;  %v3388_v15 = vld [vmem:[#allocation2 + $0x348] sm:$0xf]  ;;  %v4433_v19 = vld [vmem:[#allocation2 + $0x154] sm:$0xf0] }
  0x65   :  { %1437 = vmatpush.bf16.msrb.mxu2 %v3657_v31  ;;  %1425 = vmatpush.bf16.msra.mxu3 %v3513_v40  ;;  %v4413_v31 = vld [vmem:[#allocation2 + $0xb4] sm:$0xf0]  ;;  %v3132_v18 = vld [vmem:[#allocation2 + $0x148] sm:$0xf] }
  0x66   :  { %v3053_v40 = vor.u32 %v4413_v31, %v3052_v30  ;;  %v2988_v21 = vld [vmem:[#allocation2 + $0x28] sm:$0xf]  ;;  %v4461_v25 = vld [vmem:[#allocation2 + $0x234] sm:$0xf0] }
  0x67   :  { %1400 = vmatpush.bf16.msra.mxu0 %v3241_v49  ;;  %1413 = vmatpush.bf16.msra.mxu1 %v3369_v50  ;;  %v4473_v49 = vld [vmem:[#allocation2 + $0x294] sm:$0xf0]  ;;  %v3181_v50 = vor.u32 %v4445_v42, %v3180_v41  ;;  %v3244_v24 = vld [vmem:[#allocation2 + $0x228] sm:$0xf] }
  0x68   :  { %v3293_v58 = vor.u32 %v4473_v49, %v3292_v47  ;;  %v3372_v27 = vld [vmem:[#allocation2 + $0x328] sm:$0xf]  ;;  %v4493_v28 = vld [vmem:[#allocation2 + $0x334] sm:$0xf0]  ;;  %v3245_v33 = vor.u32 %v4461_v25, %v3244_v24 }
  0x69   :  { %1438 = vmatpush.bf16.msrb.mxu2 %v3641_v45  ;;  %1426 = vmatpush.bf16.msra.mxu3 %v3497_v55  ;;  %v4409_v45 = vld [vmem:[#allocation2 + $0x94] sm:$0xf0]  ;;  %v3164_v55 = vld [vmem:[#allocation2 + $0x188] sm:$0xf]  ;;  %v3373_v38 = vor.u32 %v4493_v28, %v3372_v27  ;;  %v3182_v27 = vld [vmem:[#allocation2 + $0x1b8] sm:$0xf0] }
  0x6a   :  { %v3037_v54 = vor.u32 %v4409_v45, %v3036_v44  ;;  %v3165_v1 = vor.u32 %v4441_v56, %v3164_v55  ;;  %v3116_v30 = vld [vmem:[#allocation2 + $0x128] sm:$0xf]  ;;  %v4429_v31 = vld [vmem:[#allocation2 + $0x134] sm:$0xf0] }
  0x6b   :  { %1401 = vmatpush.bf16.msra.mxu0 %v3225_v4  ;;  %1414 = vmatpush.bf16.msra.mxu1 %v3353_v5  ;;  %v3021_v4 = vor.u32 %v4405_v61, %v3020_v59  ;;  %v3148_v5 = vld [vmem:[#allocation2 + $0x168] sm:$0xf]  ;;  %v4393_v35 = vld [vmem:[#allocation2 + $0x14] sm:$0xf0]  ;;  %v3117_v44 = vor.u32 %v4429_v31, %v3116_v30  ;;  %v4407_v30 = vld [vmem:[#allocation2 + $0x8c] sm:$0xf] }
  0x6c   :  { %v3149_v14 = vor.u32 %v4437_v6, %v3148_v5  ;;  %v4549_v37 = vld [vmem:[#allocation2 + $0x4f4] sm:$0xf0]  ;;  %v3228_v41 = vld [vmem:[#allocation2 + $0x208] sm:$0xf]  ;;  %v4415_v5 = vld [vmem:[#allocation2 + $0xcc] sm:$0xf] }
  0x6d   :  { %1439 = vmatpush.bf16.msrb.mxu2 %v3625_v0  ;;  %1427 = vmatpush.bf16.msra.mxu3 %v3481_v8  ;;  %v4469_v0 = vld [vmem:[#allocation2 + $0x274] sm:$0xf0]  ;;  %v3004_v8 = vld [vmem:[#allocation2 + $0x48] sm:$0xf]  ;;  %v3070_v6 = vld [vmem:[#allocation2 + $0xd8] sm:$0xf0] }
  0x6e   :  { %1402 = vmatmul.bf16.vlgmr.msra.gmra.mxu0 %v4859_v53  ;;  %1415 = vmatmul.bf16.vlgmr.msra.gmra.mxu1 %v4863_v60  ;;  %v3277_v7 = vor.u32 %v4469_v0, %v3276_v63  ;;  %v4457_v42 = vld [vmem:[#allocation2 + $0x214] sm:$0xf0]  ;;  %v3724_v56 = vld [vmem:[#allocation2 + $0x5e8] sm:$0xf]  ;;  %v4451_v0 = vld [vmem:[#allocation2 + $0x1ec] sm:$0xf] }
  0x6f   :  { %1459 = vmatpush.bf16.msrb.mxu1 %v3085_v10  ;;  %1485 = vmatpush.bf16.msrb.mxu0 %v3341_v16  ;;  %v4401_v10 = vld [vmem:[#allocation2 + $0x54] sm:$0xf0]  ;;  %v3229_v55 = vor.u32 %v4457_v42, %v3228_v41  ;;  %v3580_v59 = vld [vmem:[#allocation2 + $0x4c8] sm:$0xf]  ;;  %v3038_v31 = vld [vmem:[#allocation2 + $0x98] sm:$0xf0] }
  0x70   :  { %1428 = vmatmul.bf16.vlgmr.msra.gmra.mxu3 %v4881_v34  ;;  %v4497_v16 = vld [vmem:[#allocation2 + $0x354] sm:$0xf0]  ;;  %v3548_v24 = vld [vmem:[#allocation2 + $0x488] sm:$0xf]  ;;  %v3166_v41 = vld [vmem:[#allocation2 + $0x198] sm:$0xf0]  ;;  %v3041_v42 = vor.u32 %v4407_v30, %v3038_v31 }
  0x71   :  { %1453 = vmatpush.bf16.msrb.mxu3 %v3737_v13  ;;  %1440 = vmatpush.bf16.msrb.mxu2 %v3609_v17  ;;  %v4465_v13 = vld [vmem:[#allocation2 + $0x254] sm:$0xf0]  ;;  %v3005_v17 = vor.u32 %v4401_v10, %v3004_v8  ;;  %v3708_v10 = vld [vmem:[#allocation2 + $0x5c8] sm:$0xf]  ;;  %v3470_v30 = vld [vmem:[#allocation2 + $0x3f8] sm:$0xf0] }
  0x72   :  { %v4489_v45 = vld [vmem:[#allocation2 + $0x314] sm:$0xf0]  ;;  %v3516_v51 = vld [vmem:[#allocation2 + $0x448] sm:$0xf] }
  0x73   :  { %1460 = vmatpush.bf16.msrb.mxu1 %v3069_v26  ;;  %1486 = vmatpush.bf16.msrb.mxu0 %v3325_v29  ;;  %v3133_v26 = vor.u32 %v4433_v19, %v3132_v18  ;;  %v2989_v29 = vor.u32 %v4397_v22, %v2988_v21  ;;  %v4585_v47 = vld [vmem:[#allocation2 + $0x614] sm:$0xf0]  ;;  %v4411_v18 = vld [vmem:[#allocation2 + $0xac] sm:$0xf]  ;;  %v3054_v19 = vld [vmem:[#allocation2 + $0xb8] sm:$0xf0] }
  0x74   :  { %1441 = vmatmul.bf16.vlgmr.msrb.gmra.mxu2 %v4883_v39  ;;  %v3692_v22 = vld [vmem:[#allocation2 + $0x5a8] sm:$0xf]  ;;  %v4537_v25 = vld [vmem:[#allocation2 + $0x494] sm:$0xf0]  ;;  %v3057_v28 = vor.u32 %v4411_v18, %v3054_v19  ;;  %v3118_v18 = vld [vmem:[#allocation2 + $0x138] sm:$0xf0] }
  0x75   :  { %1498 = vmatpush.bf16.msra.mxu2 %v3469_v20  ;;  %1472 = vmatpush.bf16.msra.mxu3 %v3213_v23  ;;  %v3261_v20 = vor.u32 %v4465_v13, %v3260_v12  ;;  %v3389_v23 = vor.u32 %v4497_v16, %v3388_v15  ;;  %v3564_v12 = vld [vmem:[#allocation2 + $0x4a8] sm:$0xf]  ;;  %v4541_v13 = vld [vmem:[#allocation2 + $0x4b4] sm:$0xf0]  ;;  %v3198_v15 = vld [vmem:[#allocation2 + $0x1d8] sm:$0xf0]  ;;  %v3073_v16 = vor.u32 %v4415_v5, %v3070_v6 }
  0x76   :  { %v4529_v52 = vld [vmem:[#allocation2 + $0x454] sm:$0xf0]  ;;  %v3134_v5 = vld [vmem:[#allocation2 + $0x158] sm:$0xf0] }
  0x77   :  { %1461 = vmatpush.bf16.msrb.mxu1 %v3053_v40  ;;  %1487 = vmatpush.bf16.msrb.mxu0 %v3309_v43  ;;  %v3100_v40 = vld [vmem:[#allocation2 + $0x108] sm:$0xf] }
  0x78   :  { %v3356_v43 = vld [vmem:[#allocation2 + $0x308] sm:$0xf] }
  0x79   :  { %1499 = vmatpush.bf16.msra.mxu2 %v3453_v32  ;;  %1473 = vmatpush.bf16.msra.mxu3 %v3197_v36  ;;  %v2972_v32 = vld [vmem:[#allocation2 + $0x8] sm:$0xf]  ;;  %v3357_v61 = vor.u32 %v4489_v45, %v3356_v43  ;;  %v3022_v45 = vld [vmem:[#allocation2 + $0x78] sm:$0xf0] }
  0x7a   :  { %v3596_v36 = vld [vmem:[#allocation2 + $0x4e8] sm:$0xf]  ;;  %v2973_v49 = vor.u32 %v4393_v35, %v2972_v32  ;;  %v3549_v32 = vor.u32 %v4537_v25, %v3548_v24  ;;  %v4391_v24 = vld [vmem:[#allocation2 + $0xc] sm:$0xf]  ;;  %v2974_v25 = vld [vmem:[#allocation2 + $0x18] sm:$0xf0] }
  0x7b   :  { %1462 = vmatpush.bf16.msrb.mxu1 %v3037_v54  ;;  %1488 = vmatpush.bf16.msrb.mxu0 %v3293_v58  ;;  %v3597_v54 = vor.u32 %v4549_v37, %v3596_v36  ;;  %v4581_v58 = vld [vmem:[#allocation2 + $0x5f4] sm:$0xf0]  ;;  %v3676_v35 = vld [vmem:[#allocation2 + $0x588] sm:$0xf] }
  0x7c   :  { %v4569_v36 = vld [vmem:[#allocation2 + $0x594] sm:$0xf0]  ;;  %v3532_v37 = vld [vmem:[#allocation2 + $0x468] sm:$0xf] }
  0x7d   :  { %1500 = vmatpush.bf16.msra.mxu2 %v3437_v46  ;;  %1474 = vmatpush.bf16.msra.mxu3 %v3181_v50  ;;  %v3740_v46 = vld [vmem:[#allocation2 + $0x608] sm:$0xf]  ;;  %v4425_v50 = vld [vmem:[#allocation2 + $0x114] sm:$0xf0]  ;;  %v3677_v43 = vor.u32 %v4569_v36, %v3676_v35  ;;  %v4479_v35 = vld [vmem:[#allocation2 + $0x2cc] sm:$0xf]  ;;  %v2977_v36 = vor.u32 %v4391_v24, %v2974_v25 }
  0x7e   :  { %v3741_v63 = vor.u32 %v4585_v47, %v3740_v46  ;;  %v3101_v2 = vor.u32 %v4425_v50, %v3100_v40  ;;  %v4439_v40 = vld [vmem:[#allocation2 + $0x18c] sm:$0xf]  ;;  %v4565_v50 = vld [vmem:[#allocation2 + $0x574] sm:$0xf0] }
  0x7f   :  { %1463 = vmatpush.bf16.msrb.mxu1 %v3021_v4  ;;  %1489 = vmatpush.bf16.msrb.mxu0 %v3277_v7  ;;  %v3725_v4 = vor.u32 %v4581_v58, %v3724_v56  ;;  %v3169_v47 = vor.u32 %v4439_v40, %v3166_v41  ;;  %v3102_v40 = vld [vmem:[#allocation2 + $0x118] sm:$0xf0]  ;;  %v4499_v24 = vld [vmem:[#allocation2 + $0x36c] sm:$0xf] }
  0x80   :  { %3747 = vmatmul.msk.bf16.vlgmr.msrb.gmra.mxu3 %vm1273_vm0, %v4874_v48 }
  0x81   :  { %1501 = vmatpush.bf16.msra.mxu2 %v3421_v62  ;;  %1475 = vmatpush.bf16.msra.mxu3 %v3165_v1  ;;  %v4545_v62 = vld [vmem:[#allocation2 + $0x4d4] sm:$0xf0]  ;;  %v3214_v1 = vld [vmem:[#allocation2 + $0x1f8] sm:$0xf0] }
  0x82   :  { %v3581_v7 = vor.u32 %v4545_v62, %v3580_v59  ;;  %v3217_v8 = vor.u32 %v4451_v0, %v3214_v1  ;;  %v4399_v59 = vld [vmem:[#allocation2 + $0x4c] sm:$0xf]  ;;  %v3517_v62 = vor.u32 %v4529_v52, %v3516_v51  ;;  %v3644_v0 = vld [vmem:[#allocation2 + $0x548] sm:$0xf]  ;;  %v4561_v1 = vld [vmem:[#allocation2 + $0x554] sm:$0xf0] }
  0x83   :  { %1464 = vmatpush.bf16.msrb.mxu1 %v3005_v17  ;;  %1490 = vmatpush.bf16.msrb.mxu0 %v3261_v20  ;;  %v3565_v20 = vor.u32 %v4541_v13, %v3564_v12  ;;  %v3628_v13 = vld [vmem:[#allocation2 + $0x528] sm:$0xf]  ;;  %v4543_v51 = vld [vmem:[#allocation2 + $0x4cc] sm:$0xf]  ;;  %v3582_v52 = vld [vmem:[#allocation2 + $0x4d8] sm:$0xf0] }
  0x85   :  { %1502 = vmatpush.bf16.msra.mxu2 %v3405_v11  ;;  %1476 = vmatpush.bf16.msra.mxu3 %v3149_v14  ;;  %v4577_v11 = vld [vmem:[#allocation2 + $0x5d4] sm:$0xf0]  ;;  %v4447_v14 = vld [vmem:[#allocation2 + $0x1cc] sm:$0xf] }
  0x86   :  { %v3709_v17 = vor.u32 %v4577_v11, %v3708_v10  ;;  %v3201_v21 = vor.u32 %v4447_v14, %v3198_v15  ;;  %v2990_v10 = vld [vmem:[#allocation2 + $0x38] sm:$0xf0]  ;;  %v4557_v14 = vld [vmem:[#allocation2 + $0x534] sm:$0xf0]  ;;  %v3484_v15 = vld [vmem:[#allocation2 + $0x408] sm:$0xf] }
  0x87   :  { %1465 = vmatpush.bf16.msrb.mxu1 %v2989_v29  ;;  %1491 = vmatpush.bf16.msrb.mxu0 %v3245_v33 }
  0x89   :  { %1503 = vmatpush.bf16.msra.mxu2 %v3389_v23  ;;  %1477 = vmatpush.bf16.msra.mxu3 %v3133_v26  ;;  %v4573_v23 = vld [vmem:[#allocation2 + $0x5b4] sm:$0xf0]  ;;  %v4443_v26 = vld [vmem:[#allocation2 + $0x1ac] sm:$0xf] }
  0x8a   :  { %v3693_v29 = vor.u32 %v4573_v23, %v3692_v22  ;;  %v3185_v33 = vor.u32 %v4443_v26, %v3182_v27  ;;  %v3629_v22 = vor.u32 %v4557_v14, %v3628_v13  ;;  %v3612_v23 = vld [vmem:[#allocation2 + $0x508] sm:$0xf]  ;;  %v3422_v14 = vld [vmem:[#allocation2 + $0x398] sm:$0xf0] }
  0x8b   :  { %1466 = vmatpush.bf16.msrb.mxu1 %v2973_v49  ;;  %1492 = vmatpush.bf16.msrb.mxu0 %v3229_v55  ;;  %v3660_v49 = vld [vmem:[#allocation2 + $0x568] sm:$0xf]  ;;  %v3150_v55 = vld [vmem:[#allocation2 + $0x178] sm:$0xf0] }
  0x8c   :  { %v3661_v58 = vor.u32 %v4565_v50, %v3660_v49  ;;  %v3454_v50 = vld [vmem:[#allocation2 + $0x3d8] sm:$0xf0] }
  0x8d   :  { %1504 = vmatpush.bf16.msra.mxu2 %v3373_v38  ;;  %1478 = vmatpush.bf16.msra.mxu3 %v3117_v44  ;;  %v4533_v38 = vld [vmem:[#allocation2 + $0x474] sm:$0xf0]  ;;  %v4403_v44 = vld [vmem:[#allocation2 + $0x6c] sm:$0xf] }
  0x8e   :  { %1493 = vmatmul.bf16.vlgmr.msrb.gmra.mxu0 %v4859_v53  ;;  %1467 = vmatmul.bf16.vlgmr.msrb.gmra.mxu1 %v4861_v57  ;;  %v3533_v46 = vor.u32 %v4533_v38, %v3532_v37  ;;  %v3025_v56 = vor.u32 %v4403_v44, %v3022_v45  ;;  %v3326_v37 = vld [vmem:[#allocation2 + $0x2d8] sm:$0xf0]  ;;  %v4423_v38 = vld [vmem:[#allocation2 + $0x10c] sm:$0xf] }
  0x8f   :  { %1511 = vmatpush.bf16.msra.mxu1 %v3597_v54  ;;  %1544 = vmatpush.bf16.msra.mxu0 %v3741_v63  ;;  %v4435_v54 = vld [vmem:[#allocation2 + $0x16c] sm:$0xf]  ;;  %v3105_v49 = vor.u32 %v4423_v38, %v3102_v40 }
  0x90   :  { %v3153_v63 = vor.u32 %v4435_v54, %v3150_v55  ;;  %v4475_v55 = vld [vmem:[#allocation2 + $0x2ac] sm:$0xf] }
  0x91   :  { %1505 = vmatpush.bf16.msra.mxu2 %v3357_v61  ;;  %1479 = vmatpush.bf16.msra.mxu3 %v3101_v2  ;;  %v3006_v61 = vld [vmem:[#allocation2 + $0x58] sm:$0xf0]  ;;  %v3500_v2 = vld [vmem:[#allocation2 + $0x428] sm:$0xf]  ;;  %v4495_v38 = vld [vmem:[#allocation2 + $0x34c] sm:$0xf] }
  0x92   :  { %v3009_v6 = vor.u32 %v4399_v59, %v3006_v61  ;;  %v3710_v59 = vld [vmem:[#allocation2 + $0x5d8] sm:$0xf0] }
  0x93   :  { %1512 = vmatpush.bf16.msra.mxu1 %v3581_v7  ;;  %1563 = vmatpush.bf16.msrb.mxu0 %v3217_v8  ;;  %v3645_v7 = vor.u32 %v4561_v1, %v3644_v0  ;;  %v4395_v8 = vld [vmem:[#allocation2 + $0x2c] sm:$0xf]  ;;  %v3438_v1 = vld [vmem:[#allocation2 + $0x3b8] sm:$0xf0] }
  0x94   :  { %1480 = vmatmul.bf16.vlgmr.msra.gmra.mxu3 %v4867_v9  ;;  %1506 = vmatmul.bf16.vlgmr.msra.gmra.mxu2 %v4863_v60  ;;  %v2993_v19 = vor.u32 %v4395_v8, %v2990_v10  ;;  %v3694_v8 = vld [vmem:[#allocation2 + $0x5b8] sm:$0xf0] }
  0x95   :  { %1550 = vmatpush.bf16.msrb.mxu2 %v3089_v3  ;;  %1524 = vmatpush.bf16.msrb.mxu3 %v3725_v4  ;;  %v4525_v3 = vld [vmem:[#allocation2 + $0x434] sm:$0xf0]  ;;  %v4431_v4 = vld [vmem:[#allocation2 + $0x14c] sm:$0xf] }
  0x96   :  { %v3501_v11 = vor.u32 %v4525_v3, %v3500_v2  ;;  %v3137_v12 = vor.u32 %v4431_v4, %v3134_v5  ;;  %v4539_v2 = vld [vmem:[#allocation2 + $0x4ac] sm:$0xf]  ;;  %v3566_v3 = vld [vmem:[#allocation2 + $0x4b8] sm:$0xf0] }
  0x97   :  { %1513 = vmatpush.bf16.msra.mxu1 %v3565_v20  ;;  %1564 = vmatpush.bf16.msrb.mxu0 %v3201_v21  ;;  %v4483_v20 = vld [vmem:[#allocation2 + $0x2ec] sm:$0xf]  ;;  %v3342_v21 = vld [vmem:[#allocation2 + $0x2f8] sm:$0xf0] }
  0x98   :  { %v3345_v31 = vor.u32 %v4483_v20, %v3342_v21  ;;  %v4471_v5 = vld [vmem:[#allocation2 + $0x28c] sm:$0xf]  ;;  %v3678_v21 = vld [vmem:[#allocation2 + $0x598] sm:$0xf0] }
  0x99   :  { %1551 = vmatpush.bf16.msrb.mxu2 %v3073_v16  ;;  %1525 = vmatpush.bf16.msrb.mxu3 %v3709_v17  ;;  %v4521_v16 = vld [vmem:[#allocation2 + $0x414] sm:$0xf0]  ;;  %v4427_v17 = vld [vmem:[#allocation2 + $0x12c] sm:$0xf] }
  0x9a   :  { %v3485_v26 = vor.u32 %v4521_v16, %v3484_v15  ;;  %v3121_v27 = vor.u32 %v4427_v17, %v3118_v18  ;;  %v4535_v15 = vld [vmem:[#allocation2 + $0x48c] sm:$0xf]  ;;  %v3550_v16 = vld [vmem:[#allocation2 + $0x498] sm:$0xf0] }
  0x9b   :  { %1514 = vmatpush.bf16.msra.mxu1 %v3549_v32  ;;  %1565 = vmatpush.bf16.msrb.mxu0 %v3185_v33  ;;  %v4547_v32 = vld [vmem:[#allocation2 + $0x4ec] sm:$0xf]  ;;  %v3598_v33 = vld [vmem:[#allocation2 + $0x4f8] sm:$0xf0] }
  0x9c   :  { %v3601_v45 = vor.u32 %v4547_v32, %v3598_v33  ;;  %v4467_v18 = vld [vmem:[#allocation2 + $0x26c] sm:$0xf]  ;;  %v3662_v33 = vld [vmem:[#allocation2 + $0x578] sm:$0xf0] }
  0x9d   :  { %1552 = vmatpush.bf16.msrb.mxu2 %v3057_v28  ;;  %1526 = vmatpush.bf16.msrb.mxu3 %v3693_v29  ;;  %v4553_v28 = vld [vmem:[#allocation2 + $0x514] sm:$0xf0]  ;;  %v4515_v29 = vld [vmem:[#allocation2 + $0x3ec] sm:$0xf] }
  0x9e   :  { %3748 = vmatmul.msk.bf16.vlgmr.msra.gmra.mxu0 %vm1273_vm0, %v4874_v48  ;;  %v3613_v41 = vor.u32 %v4553_v28, %v3612_v23  ;;  %v3473_v44 = vor.u32 %v4515_v29, %v3470_v30  ;;  %v3553_v23 = vor.u32 %v4535_v15, %v3550_v16  ;;  %v3534_v28 = vld [vmem:[#allocation2 + $0x478] sm:$0xf0]  ;;  %v4463_v30 = vld [vmem:[#allocation2 + $0x24c] sm:$0xf] }
  0x9f   :  { %1515 = vmatpush.bf16.msra.mxu1 %v3533_v46  ;;  %1566 = vmatpush.bf16.msrb.mxu0 %v3169_v47  ;;  %v4511_v46 = vld [vmem:[#allocation2 + $0x3cc] sm:$0xf]  ;;  %v3329_v47 = vor.u32 %v4479_v35, %v3326_v37  ;;  %v3486_v15 = vld [vmem:[#allocation2 + $0x418] sm:$0xf0] }
  0xa0   :  { %v3457_v61 = vor.u32 %v4511_v46, %v3454_v50  ;;  %v4563_v32 = vld [vmem:[#allocation2 + $0x56c] sm:$0xf] }
  0xa1   :  { %1553 = vmatpush.bf16.msrb.mxu2 %v3041_v42  ;;  %1527 = vmatpush.bf16.msrb.mxu3 %v3677_v43  ;;  %v4579_v42 = vld [vmem:[#allocation2 + $0x5ec] sm:$0xf]  ;;  %v3726_v43 = vld [vmem:[#allocation2 + $0x5f8] sm:$0xf0] }
  0xa2   :  { %v3729_v54 = vor.u32 %v4579_v42, %v3726_v43  ;;  %v3390_v42 = vld [vmem:[#allocation2 + $0x358] sm:$0xf0]  ;;  %v4527_v43 = vld [vmem:[#allocation2 + $0x44c] sm:$0xf] }
  0xa3   :  { %1516 = vmatpush.bf16.msra.mxu1 %v3517_v62  ;;  %1567 = vmatpush.bf16.msrb.mxu0 %v3153_v63  ;;  %v3585_v62 = vor.u32 %v4543_v51, %v3582_v52  ;;  %v4507_v63 = vld [vmem:[#allocation2 + $0x3ac] sm:$0xf]  ;;  %v3646_v51 = vld [vmem:[#allocation2 + $0x558] sm:$0xf0]  ;;  %v3393_v52 = vor.u32 %v4495_v38, %v3390_v42  ;;  %v3832_v42 = vld [vmem:[#allocation4 + $0xa0] sm:$0xf] }
  0xa4   :  { %v3441_v10 = vor.u32 %v4507_v63, %v3438_v1  ;;  %v4459_v46 = vld [vmem:[#allocation2 + $0x22c] sm:$0xf] }
  0xa5   :  { %1554 = vmatpush.bf16.msrb.mxu2 %v3025_v56  ;;  %1528 = vmatpush.bf16.msrb.mxu3 %v3661_v58  ;;  %v3310_v56 = vld [vmem:[#allocation2 + $0x2b8] sm:$0xf0]  ;;  %v4575_v58 = vld [vmem:[#allocation2 + $0x5cc] sm:$0xf] }
  0xa6   :  { %v3313_v0 = vor.u32 %v4475_v55, %v3310_v56  ;;  %v3713_v4 = vor.u32 %v4575_v58, %v3710_v59  ;;  %v4559_v50 = vld [vmem:[#allocation2 + $0x54c] sm:$0xf]  ;;  %v3374_v58 = vld [vmem:[#allocation2 + $0x338] sm:$0xf0] }
  0xa7   :  { %1517 = vmatpush.bf16.msra.mxu1 %v3501_v11  ;;  %1568 = vmatpush.bf16.msrb.mxu0 %v3137_v12  ;;  %v3569_v11 = vor.u32 %v4539_v2, %v3566_v3  ;;  %v4503_v12 = vld [vmem:[#allocation2 + $0x38c] sm:$0xf]  ;;  %v3630_v3 = vld [vmem:[#allocation2 + $0x538] sm:$0xf0] }
  0xa8   :  { %v4491_v55 = vld [vmem:[#allocation2 + $0x32c] sm:$0xf] }
  0xa9   :  { %1555 = vmatpush.bf16.msrb.mxu2 %v3009_v6  ;;  %1529 = vmatpush.bf16.msrb.mxu3 %v3645_v7  ;;  %v3294_v6 = vld [vmem:[#allocation2 + $0x298] sm:$0xf0]  ;;  %v4571_v7 = vld [vmem:[#allocation2 + $0x5ac] sm:$0xf] }
  0xaa   :  { %v3297_v13 = vor.u32 %v4471_v5, %v3294_v6  ;;  %v3697_v17 = vor.u32 %v4571_v7, %v3694_v8  ;;  %v4523_v59 = vld [vmem:[#allocation2 + $0x42c] sm:$0xf]  ;;  %v3742_v5 = vld [vmem:[#allocation2 + $0x618] sm:$0xf0]  ;;  %v4916_v6 = vld [vmem:[%s5108_s2] sm:$0xf]  ;;  %v3377_v8 = vor.u32 %v4491_v55, %v3374_v58 }
  0xab   :  { %1518 = vmatpush.bf16.msra.mxu1 %v3485_v26  ;;  %1569 = vmatpush.bf16.msrb.mxu0 %v3121_v27  ;;  %v3406_v26 = vld [vmem:[#allocation2 + $0x378] sm:$0xf0]  ;;  %v4531_v27 = vld [vmem:[#allocation2 + $0x46c] sm:$0xf] }
  0xac   :  { %v3537_v37 = vor.u32 %v4531_v27, %v3534_v28  ;;  %v4455_v63 = vld [vmem:[#allocation2 + $0x20c] sm:$0xf] }
  0xad   :  { %1556 = vmatpush.bf16.msrb.mxu2 %v2993_v19  ;;  %1530 = vmatpush.bf16.msrb.mxu3 %v3629_v22  ;;  %v3278_v19 = vld [vmem:[#allocation2 + $0x278] sm:$0xf0]  ;;  %v3425_v22 = vor.u32 %v4503_v12, %v3422_v14  ;;  %v4555_v1 = vld [vmem:[#allocation2 + $0x52c] sm:$0xf] }
  0xae   :  { %1519 = vmatmul.bf16.vlgmr.msra.gmra.mxu1 %v4881_v34  ;;  %v3281_v25 = vor.u32 %v4467_v18, %v3278_v19  ;;  %v4519_v14 = vld [vmem:[#allocation2 + $0x40c] sm:$0xf]  ;;  %v3864_v18 = vld [vmem:[#allocation4 + $0xe0] sm:$0xf]  ;;  %v4616_v19 = vld [vmem:[#allocation4 + $0xec] sm:$0xf0] }
  0xaf   :  { %1576 = vmatpush.bf16.msrb.mxu1 %v3345_v31  ;;  %1570 = vmatpush.bf16.msrb.mxu0 %v3105_v49  ;;  %v4905_v20 = vpop.f32.mrf.mxu0  ;;  %v4907_v29 = vpop.f32.mrf.mxu1  ;;  %v3262_v31 = vld [vmem:[#allocation2 + $0x258] sm:$0xf0]  ;;  %v3489_v27 = vor.u32 %v4519_v14, %v3486_v15  ;;  %v3865_v28 = vor.u32 %v4616_v19, %v3864_v18  ;;  %v3896_v15 = vld [vmem:[#allocation4 + $0x120] sm:$0xf]  ;;  %v4588_v19 = vld [vmem:[#allocation4 + $0xc] sm:$0xf0] }
  0xb0   :  { %v3265_v40 = vor.u32 %v4463_v30, %v3262_v31  ;;  %v3848_v30 = vld [vmem:[#allocation4 + $0xc0] sm:$0xf]  ;;  %v4612_v31 = vld [vmem:[#allocation4 + $0xcc] sm:$0xf0] }
  0xb1   :  { %1557 = vmatpush.bf16.msrb.mxu2 %v2977_v36  ;;  %1531 = vmatpush.bf16.msrb.mxu3 %v3613_v41  ;;  %v3409_v36 = vor.u32 %v4499_v24, %v3406_v26  ;;  %v4648_v24 = vld [vmem:[#allocation4 + $0x1ec] sm:$0xf0]  ;;  %v3752_v18 = vld [vmem:[#allocation4] sm:$0xf] }
  0xb2   :  { %1571 = vmatmul.bf16.vlgmr.msrb.gmra.mxu0 %v4867_v9  ;;  %v4909_v35 = vpop.f32.mrf.mxu2 }
  0xb3   :  { %1577 = vmatpush.bf16.msrb.mxu1 %v3329_v47  ;;  %1615 = vmatpush.bf16.msra.mxu0 %v3729_v54  ;;  %v4911_v41 = vpop.f32.mrf.mxu3  ;;  %v3246_v47 = vld [vmem:[#allocation2 + $0x238] sm:$0xf0] }
  0xb4   :  { %1532 = vmatmul.bf16.vlgmr.msrb.gmra.mxu3 %v4883_v39  ;;  %1558 = vmatmul.bf16.vlgmr.msrb.gmra.mxu2 %v4861_v57  ;;  %v4567_v57 = vld [vmem:[#allocation2 + $0x58c] sm:$0xf]  ;;  %v3249_v56 = vor.u32 %v4459_v46, %v3246_v47  ;;  %v4640_v46 = vld [vmem:[#allocation4 + $0x1ac] sm:$0xf0] }
  0xb5   :  { %1589 = vmatpush.bf16.msra.mxu3 %v3473_v44  ;;  %1602 = vmatpush.bf16.msra.mxu2 %v3601_v45  ;;  %v3681_v9 = vor.u32 %v4567_v57, %v3678_v21  ;;  %v3518_v44 = vld [vmem:[#allocation2 + $0x458] sm:$0xf0]  ;;  %v3665_v45 = vor.u32 %v4563_v32, %v3662_v33  ;;  %v4551_v57 = vld [vmem:[#allocation2 + $0x50c] sm:$0xf]  ;;  %v3976_v33 = vld [vmem:[#allocation4 + $0x1c0] sm:$0xf] }
  0xb6   :  { %v3521_v54 = vor.u32 %v4527_v43, %v3518_v44  ;;  %v4608_v43 = vld [vmem:[#allocation4 + $0xac] sm:$0xf0] }
  0xb7   :  { %1578 = vmatpush.bf16.msrb.mxu1 %v3313_v0  ;;  %1616 = vmatpush.bf16.msra.mxu0 %v3713_v4  ;;  %v1288_v49 = vpop.f32.mrf.mxu0  ;;  %v3230_v0 = vld [vmem:[#allocation2 + $0x218] sm:$0xf0]  ;;  %v1301_v2 = vpop.f32.mrf.mxu1  ;;  %v4583_v4 = vld [vmem:[#allocation2 + $0x60c] sm:$0xf] }
  0xb8   :  { %v3233_v12 = vor.u32 %v4455_v63, %v3230_v0  ;;  %v3745_v21 = vor.u32 %v4583_v4, %v3742_v5  ;;  %v4604_v49 = vld [vmem:[#allocation4 + $0x8c] sm:$0xf0]  ;;  %v3912_v4 = vld [vmem:[#allocation4 + $0x140] sm:$0xf] }
  0xb9   :  { %1590 = vmatpush.bf16.msra.mxu3 %v3457_v61  ;;  %1603 = vmatpush.bf16.msra.mxu2 %v3585_v62  ;;  %v3502_v61 = vld [vmem:[#allocation2 + $0x438] sm:$0xf0]  ;;  %v3649_v62 = vor.u32 %v4559_v50, %v3646_v51  ;;  %v4596_v2 = vld [vmem:[#allocation4 + $0x4c] sm:$0xf0] }
  0xba   :  { %v1314_v7 = vpop.f32.mrf.mxu2  ;;  %v4628_v5 = vld [vmem:[#allocation4 + $0x14c] sm:$0xf0] }
  0xbb   :  { %1579 = vmatpush.bf16.msrb.mxu1 %v3297_v13  ;;  %1617 = vmatpush.bf16.msra.mxu0 %v3697_v17  ;;  %v3358_v13 = vld [vmem:[#allocation2 + $0x318] sm:$0xf0]  ;;  %v1327_v16 = vpop.f32.mrf.mxu3  ;;  %v3633_v17 = vor.u32 %v4555_v1, %v3630_v3  ;;  %v3784_v1 = vld [vmem:[#allocation4 + $0x40] sm:$0xf]  ;;  %v3913_v14 = vor.u32 %v4628_v5, %v3912_v4  ;;  %v4664_v4 = vld [vmem:[#allocation4 + $0x26c] sm:$0xf0] }
  0xbc   :  { %v4624_v16 = vld [vmem:[#allocation4 + $0x12c] sm:$0xf0]  ;;  %v262_v5 = vperm.slane %v4916_v6, 1 }
  0xbd   :  { %1591 = vmatpush.bf16.msra.mxu3 %v3441_v10  ;;  %1604 = vmatpush.bf16.msra.mxu2 %v3569_v11  ;;  %v3505_v10 = vor.u32 %v4523_v59, %v3502_v61  ;;  %v4487_v11 = vld [vmem:[#allocation2 + $0x30c] sm:$0xf]  ;;  %v4600_v59 = vld [vmem:[#allocation4 + $0x6c] sm:$0xf0]  ;;  %v3928_v61 = vld [vmem:[#allocation4 + $0x160] sm:$0xf] }
  0xbe   :  { %v3361_v26 = vor.u32 %v4487_v11, %v3358_v13  ;;  %v4592_v13 = vld [vmem:[#allocation4 + $0x2c] sm:$0xf0] }
  0xbf   :  { %1580 = vmatpush.bf16.msrb.mxu1 %v3281_v25  ;;  %1618 = vmatpush.bf16.msra.mxu0 %v3681_v9  ;;  %v261_v25 = vperm.slane %v4916_v6, 0 }
  0xc1   :  { %1592 = vmatpush.bf16.msra.mxu3 %v3425_v22  ;;  %1605 = vmatpush.bf16.msra.mxu2 %v3553_v23  ;;  %v3614_v22 = vld [vmem:[#allocation2 + $0x518] sm:$0xf0]  ;;  %v3992_v23 = vld [vmem:[#allocation4 + $0x1e0] sm:$0xf] }
  0xc2   :  { %v3617_v9 = vor.u32 %v4551_v57, %v3614_v22  ;;  %v3993_v32 = vor.u32 %v4648_v24, %v3992_v23  ;;  %v4120_v22 = vld [vmem:[#allocation4 + $0x2e0] sm:$0xf]  ;;  %v4680_v23 = vld [vmem:[#allocation4 + $0x2ec] sm:$0xf0] }
  0xc3   :  { %1581 = vmatpush.bf16.msrb.mxu1 %v3265_v40  ;;  %1619 = vmatpush.bf16.msra.mxu0 %v3665_v45  ;;  %v4921_v38 = vpop.f32.mrf.mxu2  ;;  %v3849_v40 = vor.u32 %v4612_v31, %v3848_v30  ;;  %v3960_v45 = vld [vmem:[#allocation4 + $0x1a0] sm:$0xf]  ;;  %v3994_v30 = vld [vmem:[#allocation4 + $0x1f0] sm:$0xf0]  ;;  %v3753_v31 = vor.u32 %v4588_v19, %v3752_v18  ;;  %v4594_v19 = vld [vmem:[#allocation4 + $0x44] sm:$0xf] }
  0xc4   :  { %v3961_v50 = vor.u32 %v4640_v46, %v3960_v45  ;;  %v4642_v46 = vld [vmem:[#allocation4 + $0x1c4] sm:$0xf] }
  0xc5   :  { %1593 = vmatpush.bf16.msra.mxu3 %v3409_v36  ;;  %1606 = vmatpush.bf16.msra.mxu2 %v3537_v37  ;;  %v4644_v36 = vld [vmem:[#allocation4 + $0x1cc] sm:$0xf0]  ;;  %v1287_v37 = vadd.f32 %v4905_v20, %v261_v25  ;;  %v3816_v20 = vld [vmem:[#allocation4 + $0x80] sm:$0xf]  ;;  %v3866_v25 = vld [vmem:[#allocation4 + $0xf0] sm:$0xf0] }
  0xc6   :  { %v3977_v44 = vor.u32 %v4644_v36, %v3976_v33  ;;  %v3817_v58 = vor.u32 %v4604_v49, %v3816_v20  ;;  %v4088_v49 = vld [vmem:[#allocation4 + $0x2a0] sm:$0xf] }
  0xc7   :  { %1582 = vmatpush.bf16.msrb.mxu1 %v3249_v56  ;;  %1620 = vmatpush.bf16.msra.mxu0 %v3649_v62  ;;  %v1300_v47 = vadd.f32 %v4907_v29, %v1287_v37  ;;  %v3800_v29 = vld [vmem:[#allocation4 + $0x60] sm:$0xf] }
  0xc8   :  { %v3801_v63 = vor.u32 %v4600_v59, %v3800_v29  ;;  %v4072_v29 = vld [vmem:[#allocation4 + $0x280] sm:$0xf]  ;;  %v4668_v59 = vld [vmem:[#allocation4 + $0x28c] sm:$0xf0] }
  0xc9   :  { %1594 = vmatpush.bf16.msra.mxu3 %v3393_v52  ;;  %1607 = vmatpush.bf16.msra.mxu2 %v3521_v54  ;;  %v3944_v52 = vld [vmem:[#allocation4 + $0x180] sm:$0xf]  ;;  %v4636_v54 = vld [vmem:[#allocation4 + $0x18c] sm:$0xf0]  ;;  %v1313_v55 = vadd.f32 %v4909_v35, %v1300_v47  ;;  %v3978_v47 = vld [vmem:[#allocation4 + $0x1d0] sm:$0xf0] }
  0xcb   :  { %1583 = vmatpush.bf16.msrb.mxu1 %v3233_v12  ;;  %1621 = vmatpush.bf16.msra.mxu0 %v3633_v17  ;;  %v1338_v51 = vpop.f32.mrf.mxu0  ;;  %v1366_v56 = vpop.f32.mrf.mxu2  ;;  %v1326_v62 = vadd.f32 %v4911_v41, %v1313_v55  ;;  %v3768_v12 = vld [vmem:[#allocation4 + $0x20] sm:$0xf] }
  0xcc   :  { %v3769_v17 = vor.u32 %v4592_v13, %v3768_v12  ;;  %v3962_v56 = vld [vmem:[#allocation4 + $0x1b0] sm:$0xf0]  ;;  %v4630_v13 = vld [vmem:[#allocation4 + $0x164] sm:$0xf] }
  0xcd   :  { %1595 = vmatpush.bf16.msra.mxu3 %v3377_v8  ;;  %1608 = vmatpush.bf16.msra.mxu2 %v3505_v10  ;;  %v1339_v0 = vadd.f32 %v1338_v51, %v1326_v62  ;;  %v3785_v10 = vor.u32 %v4596_v2, %v3784_v1  ;;  %v4606_v51 = vld [vmem:[#allocation4 + $0xa4] sm:$0xf]  ;;  %v4073_v62 = vor.u32 %v4668_v59, %v4072_v29 }
  0xce   :  { %1584 = vmatmul.bf16.vlgmr.msrb.gmra.mxu1 %v4859_v53  ;;  %v3833_v53 = vor.u32 %v4608_v43, %v3832_v42  ;;  %v4610_v42 = vld [vmem:[#allocation4 + $0xc4] sm:$0xf]  ;;  %v3850_v43 = vld [vmem:[#allocation4 + $0xd0] sm:$0xf0] }
  0xcf   :  { %1635 = vmatpush.bf16.msra.mxu1 %v3745_v21  ;;  %1622 = vmatpush.bf16.msra.mxu0 %v3617_v9  ;;  %v3897_v21 = vor.u32 %v4624_v16, %v3896_v15  ;;  %v4646_v9 = vld [vmem:[#allocation4 + $0x1e4] sm:$0xf]  ;;  %v3853_v20 = vor.u32 %v4610_v42, %v3850_v43  ;;  %v4040_v16 = vld [vmem:[#allocation4 + $0x240] sm:$0xf] }
  0xd0   :  { %v4586_v42 = vld [vmem:[#allocation4 + $0x4] sm:$0xf] }
  0xd1   :  { %1596 = vmatpush.bf16.msra.mxu3 %v3361_v26  ;;  %1609 = vmatpush.bf16.msra.mxu2 %v3489_v27  ;;  %v3880_v26 = vld [vmem:[#allocation4 + $0x100] sm:$0xf]  ;;  %v4620_v27 = vld [vmem:[#allocation4 + $0x10c] sm:$0xf0] }
  0xd2   :  { %1623 = vmatmul.bf16.vlgmr.msra.gmra.mxu0 %v4883_v39  ;;  %v4632_v39 = vld [vmem:[#allocation4 + $0x16c] sm:$0xf0]  ;;  %v3881_v37 = vor.u32 %v4620_v27, %v3880_v26 }
  0xd3   :  { %2440 = vmatpush.bf16.msrb.mxu1 %v3993_v32  ;;  %v3929_v3 = vor.u32 %v4632_v39, %v3928_v61  ;;  %v4929_v35 = vpop.f32.mrf.mxu3  ;;  %v1340_v7 = vpop.f32.mrf.mxu0  ;;  %v3818_v61 = vld [vmem:[#allocation4 + $0x90] sm:$0xf0] }
  0xd4   :  { %1597 = vmatmul.bf16.vlgmr.msra.gmra.mxu3 %v4863_v60  ;;  %1610 = vmatmul.bf16.vlgmr.msra.gmra.mxu2 %v4881_v34  ;;  %v1351_v60 = vpop.f32.mrf.mxu1  ;;  %v3945_v34 = vor.u32 %v4636_v54, %v3944_v52  ;;  %v3834_v52 = vld [vmem:[#allocation4 + $0xb0] sm:$0xf0]  ;;  %v3981_v54 = vor.u32 %v4642_v46, %v3978_v47  ;;  %v1378_v18 = vadd.f32 %v4929_v35, %v262_v5  ;;  %v4652_v46 = vld [vmem:[#allocation4 + $0x20c] sm:$0xf0]  ;;  %v3872_v47 = vld [vmem:[#allocation4 + $0xe8] sm:$0xf] }
  0xd5   :  { %2427 = vmatpush.bf16.msrb.mxu3 %v3865_v28  ;;  %v1352_v41 = vadd.f32 %v1351_v60, %v1339_v0  ;;  %v4121_v28 = vor.u32 %v4680_v23, %v4120_v22  ;;  %v4638_v60 = vld [vmem:[#allocation4 + $0x1a4] sm:$0xf]  ;;  %v3946_v0 = vld [vmem:[#allocation4 + $0x190] sm:$0xf0] }
  0xd6   :  { %v3965_v39 = vor.u32 %v4638_v60, %v3962_v56  ;;  %v4626_v23 = vld [vmem:[#allocation4 + $0x144] sm:$0xf] }
  0xd7   :  { %2441 = vmatpush.bf16.msrb.mxu1 %v3977_v44  ;;  %v4933_v11 = vpop.f32.mrf.mxu2  ;;  %v1365_v57 = vadd.f32 %v4921_v38, %v1352_v41  ;;  %2453 = vmatpush.bf16.msrb.mxu2 %v4121_v28  ;;  %v4104_v38 = vld [vmem:[#allocation4 + $0x2c0] sm:$0xf]  ;;  %v3997_v44 = vor.u32 %v4646_v9, %v3994_v30  ;;  %v4656_v9 = vld [vmem:[#allocation4 + $0x22c] sm:$0xf0] }
  0xd8   :  { %v4024_v28 = vld [vmem:[#allocation4 + $0x220] sm:$0xf]  ;;  %v1391_v30 = vadd.f32 %v4933_v11, %v1378_v18  ;;  %v4000_v18 = vld [vmem:[#allocation4 + $0x1e8] sm:$0xf] }
  0xd9   :  { %2428 = vmatpush.bf16.msrb.mxu3 %v3849_v40  ;;  %v1641_v33 = vmax.f32 %v1365_v57, 0.0  ;;  %v4676_v40 = vld [vmem:[#allocation4 + $0x2cc] sm:$0xf0]  ;;  %v3786_v57 = vld [vmem:[#allocation4 + $0x50] sm:$0xf0] }
  0xda   :  { %v4105_v45 = vor.u32 %v4676_v40, %v4104_v38  ;;  %v3789_v27 = vor.u32 %v4594_v19, %v3786_v57  ;;  %v3898_v38 = vld [vmem:[#allocation4 + $0x130] sm:$0xf0]  ;;  %v4649_v19 = vld [vmem:[#allocation4 + $0x1f4] sm:$0xf0] }
  0xdb   :  { %2442 = vmatpush.bf16.msrb.mxu1 %v3961_v50  ;;  %v1379_v24 = vpop.f32.mrf.mxu3  ;;  %v4672_v50 = vld [vmem:[#allocation4 + $0x2ac] sm:$0xf0] }
  0xdc   :  { %v1353_v8 = vpop.f32.mrf.mxu1  ;;  %2454 = vmatpush.bf16.msrb.mxu2 %v4105_v45  ;;  %v4089_v55 = vor.u32 %v4672_v50, %v4088_v49  ;;  %v3914_v24 = vld [vmem:[#allocation4 + $0x150] sm:$0xf0]  ;;  %v4008_v45 = vld [vmem:[#allocation4 + $0x200] sm:$0xf]  ;;  %v4678_v49 = vld [vmem:[#allocation4 + $0x2e4] sm:$0xf] }
  0xdd   :  { %2429 = vmatpush.bf16.msrb.mxu3 %v3833_v53  ;;  %v4936_v53 = vpack.c.bf16 %v1641_v33, %v1641_v33  ;;  %v4598_v8 = vld [vmem:[#allocation4 + $0x64] sm:$0xf]  ;;  %v3917_v35 = vor.u32 %v4626_v23, %v3914_v24  ;;  %v4009_v11 = vor.u32 %v4652_v46, %v4008_v45  ;;  %v4122_v50 = vld [vmem:[#allocation4 + $0x2f0] sm:$0xf0]  ;;  %v4605_v23 = vld [vmem:[#allocation4 + $0x94] sm:$0xf0] }
  0xde   :  { %3749 = vmatmul.msk.bf16.vlgmr.msra.gmra.mxu1 %vm1273_vm0, %v4874_v48  ;;  %v4614_v48 = vld [vmem:[#allocation4 + $0xe4] sm:$0xf]  ;;  %v4125_v60 = vor.u32 %v4678_v49, %v4122_v50  ;;  %v4200_v46 = vld [vmem:[#allocation4 + $0x380] sm:$0xf] }
  0xdf   :  { %2443 = vmatpush.bf16.msrb.mxu1 %v3945_v34  ;;  %v1392_v32 = vpop.f32.mrf.mxu2  ;;  %v3869_v36 = vor.u32 %v4614_v48, %v3866_v25  ;;  %v4602_v34 = vld [vmem:[#allocation4 + $0x84] sm:$0xf] }
  0xe0   :  { %2455 = vmatpush.bf16.msrb.mxu2 %v4089_v55  ;;  %v3821_v2 = vor.u32 %v4602_v34, %v3818_v61  ;;  %v3770_v32 = vld [vmem:[#allocation4 + $0x30] sm:$0xf0]  ;;  %v3856_v61 = vld [vmem:[#allocation4 + $0xc8] sm:$0xf]  ;;  %v4666_v24 = vld [vmem:[#allocation4 + $0x284] sm:$0xf] }
  0xe1   :  { %2430 = vmatpush.bf16.msrb.mxu3 %v3817_v58  ;;  %v3837_v58 = vor.u32 %v4606_v51, %v3834_v52  ;;  %v4617_v52 = vld [vmem:[#allocation4 + $0xf4] sm:$0xf0]  ;;  %v3882_v55 = vld [vmem:[#allocation4 + $0x110] sm:$0xf0] }
  0xe2   :  { %v3873_v34 = vor.u32 %v4617_v52, %v3872_v47  ;;  %v4700_v47 = vld [vmem:[#allocation4 + $0x38c] sm:$0xf0]  ;;  %v3792_v52 = vld [vmem:[#allocation4 + $0x48] sm:$0xf] }
  0xe3   :  { %2444 = vmatpush.bf16.msrb.mxu1 %v3929_v3  ;;  %v4056_v3 = vld [vmem:[#allocation4 + $0x260] sm:$0xf]  ;;  %v4201_v49 = vor.u32 %v4700_v47, %v4200_v46  ;;  %v4710_v46 = vld [vmem:[#allocation4 + $0x3e4] sm:$0xf]  ;;  %v4250_v47 = vld [vmem:[#allocation4 + $0x3f0] sm:$0xf0] }
  0xe4   :  { %2456 = vmatpush.bf16.msrb.mxu2 %v4073_v62  ;;  %v4057_v12 = vor.u32 %v4664_v4, %v4056_v3  ;;  %v4674_v62 = vld [vmem:[#allocation4 + $0x2c4] sm:$0xf]  ;;  %v4712_v3 = vld [vmem:[#allocation4 + $0x3ec] sm:$0xf0] }
  0xe5   :  { %2431 = vmatpush.bf16.msrb.mxu3 %v3801_v63  ;;  %v4634_v63 = vld [vmem:[#allocation4 + $0x184] sm:$0xf] }
  0xe6   :  { %v3949_v41 = vor.u32 %v4634_v63, %v3946_v0  ;;  %v4106_v63 = vld [vmem:[#allocation4 + $0x2d0] sm:$0xf0]  ;;  %v4613_v0 = vld [vmem:[#allocation4 + $0xd4] sm:$0xf0] }
  0xe7   :  { %2445 = vmatpush.bf16.msrb.mxu1 %v3913_v14  ;;  %v3930_v14 = vld [vmem:[#allocation4 + $0x170] sm:$0xf0] }
  0xe8   :  { %2457 = vmatpush.bf16.msrb.mxu2 %v4057_v12  ;;  %v3933_v48 = vor.u32 %v4630_v13, %v3930_v14  ;;  %v4609_v13 = vld [vmem:[#allocation4 + $0xb4] sm:$0xf0] }
  0xe9   :  { %2432 = vmatpush.bf16.msrb.mxu3 %v3785_v10  ;;  %v3802_v10 = vld [vmem:[#allocation4 + $0x70] sm:$0xf0] }
  0xea   :  { %v3805_v15 = vor.u32 %v4598_v8, %v3802_v10  ;;  %v3840_v8 = vld [vmem:[#allocation4 + $0xa8] sm:$0xf]  ;;  %v4670_v10 = vld [vmem:[#allocation4 + $0x2a4] sm:$0xf] }
  0xeb   :  { %2446 = vmatpush.bf16.msrb.mxu1 %v3897_v21  ;;  %v1403_v1 = vpop.f32.mrf.mxu0  ;;  %v1416_v7 = vpop.f32.mrf.mxu1 }
  0xec   :  { %v1404_v40 = vadd.f32 %v1403_v1, %v1391_v30  ;;  %v4109_v1 = vor.u32 %v4674_v62, %v4106_v63  ;;  %v3984_v30 = vld [vmem:[#allocation4 + $0x1c8] sm:$0xf] }
  0xed   :  { %2433 = vmatpush.bf16.msrb.mxu3 %v3769_v17  ;;  %v4660_v17 = vld [vmem:[#allocation4 + $0x24c] sm:$0xf0]  ;;  %v3776_v63 = vld [vmem:[#allocation4 + $0x28] sm:$0xf] }
  0xee   :  { %v4041_v21 = vor.u32 %v4660_v17, %v4040_v16  ;;  %v1417_v56 = vadd.f32 %v1416_v7, %v1404_v40  ;;  %v3857_v7 = vor.u32 %v4613_v0, %v3856_v61  ;;  %v4708_v16 = vld [vmem:[#allocation4 + $0x3cc] sm:$0xf0]  ;;  %v4637_v61 = vld [vmem:[#allocation4 + $0x194] sm:$0xf0]  ;;  %v4654_v0 = vld [vmem:[#allocation4 + $0x224] sm:$0xf] }
  0xef   :  { %2447 = vmatpush.bf16.msrb.mxu1 %v3881_v37  ;;  %v4622_v37 = vld [vmem:[#allocation4 + $0x124] sm:$0xf] }
  0xf0   :  { %2458 = vmatpush.bf16.msrb.mxu2 %v4041_v21 }
  0xf1   :  { %2434 = vmatpush.bf16.msrb.mxu3 %v3753_v31  ;;  %v4590_v31 = vld [vmem:[#allocation4 + $0x24] sm:$0xf] }
  0xf2   :  { %v3773_v43 = vor.u32 %v4590_v31, %v3770_v32  ;;  %v4645_v31 = vld [vmem:[#allocation4 + $0x1d4] sm:$0xf0] }
  0xf3   :  { %2492 = vmatpush.bf16.msra.mxu1 %v3997_v44  ;;  %v1429_v22 = vpop.f32.mrf.mxu3  ;;  %v1405_v25 = vpop.f32.mrf.mxu0  ;;  %v3754_v44 = vld [vmem:[#allocation4 + $0x10] sm:$0xf0] }
  0xf4   :  { %2435 = vmatmul.bf16.vlgmr.msrb.gmra.mxu3 %v4936_v53  ;;  %v1418_v33 = vpop.f32.mrf.mxu1  ;;  %v1430_v59 = vadd.f32 %v1429_v22, %v1417_v56  ;;  %v3841_v22 = vor.u32 %v4609_v13, %v3840_v8  ;;  %v4001_v25 = vor.u32 %v4649_v19, %v4000_v18  ;;  %v4597_v56 = vld [vmem:[#allocation4 + $0x54] sm:$0xf0]  ;;  %v4168_v8 = vld [vmem:[#allocation4 + $0x340] sm:$0xf]  ;;  %v4650_v19 = vld [vmem:[#allocation4 + $0x204] sm:$0xf] }
  0xf5   :  { %2479 = vmatpush.bf16.msra.mxu3 %v3869_v36  ;;  %v4025_v36 = vor.u32 %v4656_v9, %v4024_v28  ;;  %v4704_v28 = vld [vmem:[#allocation4 + $0x3ac] sm:$0xf0]  ;;  %v3793_v62 = vor.u32 %v4597_v56, %v3792_v52  ;;  %v4589_v18 = vld [vmem:[#allocation4 + $0x14] sm:$0xf0]  ;;  %v3842_v56 = vld [vmem:[#allocation4 + $0xb8] sm:$0xf0] }
  0xf7   :  { %2493 = vmatpush.bf16.msra.mxu1 %v3981_v54  ;;  %v1442_v26 = vpop.f32.mrf.mxu2  ;;  %2459 = vmatpush.bf16.msrb.mxu2 %v4025_v36  ;;  %v4618_v54 = vld [vmem:[#allocation4 + $0x104] sm:$0xf]  ;;  %v3808_v36 = vld [vmem:[#allocation4 + $0x68] sm:$0xf] }
  0xf8   :  { %v1443_v5 = vadd.f32 %v1442_v26, %v1430_v59  ;;  %v4074_v26 = vld [vmem:[#allocation4 + $0x290] sm:$0xf0]  ;;  %v4696_v59 = vld [vmem:[#allocation4 + $0x36c] sm:$0xf0] }
  0xf9   :  { %2480 = vmatpush.bf16.msra.mxu3 %v3853_v20  ;;  %v3901_v20 = vor.u32 %v4622_v37, %v3898_v38  ;;  %v4077_v32 = vor.u32 %v4666_v24, %v4074_v26  ;;  %v4662_v37 = vld [vmem:[#allocation4 + $0x264] sm:$0xf]  ;;  %v4058_v38 = vld [vmem:[#allocation4 + $0x270] sm:$0xf0]  ;;  %v4688_v24 = vld [vmem:[#allocation4 + $0x32c] sm:$0xf0] }
  0xfa   :  { %v4061_v45 = vor.u32 %v4662_v37, %v4058_v38  ;;  %v4615_v26 = vld [vmem:[#allocation4 + $0xec] sm:$0xf] }
  0xfb   :  { %2494 = vmatpush.bf16.msra.mxu1 %v3965_v39  ;;  %v1431_v51 = vpop.f32.mrf.mxu3  ;;  %2460 = vmatpush.bf16.msrb.mxu2 %v4009_v11  ;;  %v3885_v39 = vor.u32 %v4618_v54, %v3882_v55  ;;  %v4641_v11 = vld [vmem:[#allocation4 + $0x1b4] sm:$0xf0]  ;;  %v4658_v54 = vld [vmem:[#allocation4 + $0x244] sm:$0xf]  ;;  %v4042_v55 = vld [vmem:[#allocation4 + $0x250] sm:$0xf0] }
  0xfd   :  { %2481 = vmatpush.bf16.msra.mxu3 %v3837_v58  ;;  %v3757_v58 = vor.u32 %v4586_v42, %v3754_v44  ;;  %v4601_v44 = vld [vmem:[#allocation4 + $0x74] sm:$0xf0] }
  0xfe   :  { %v3809_v51 = vor.u32 %v4601_v44, %v3808_v36  ;;  %v4611_v36 = vld [vmem:[#allocation4 + $0xcc] sm:$0xf]  ;;  %v3858_v44 = vld [vmem:[#allocation4 + $0xd8] sm:$0xf0] }
  0xff   :  { %2495 = vmatpush.bf16.msra.mxu1 %v3949_v41  ;;  %v1444_v29 = vpop.f32.mrf.mxu2  ;;  %2505 = vmatpush.bf16.msra.mxu2 %v4125_v60  ;;  %v4090_v41 = vld [vmem:[#allocation4 + $0x2b0] sm:$0xf0]  ;;  %v3861_v52 = vor.u32 %v4611_v36, %v3858_v44  ;;  %v3778_v44 = vld [vmem:[#allocation4 + $0x38] sm:$0xf0] }
 0x100   :  { %v4093_v14 = vor.u32 %v4670_v10, %v4090_v41  ;;  %v4184_v29 = vld [vmem:[#allocation4 + $0x360] sm:$0xf]  ;;  %v4692_v10 = vld [vmem:[#allocation4 + $0x34c] sm:$0xf0]  ;;  %v3936_v41 = vld [vmem:[#allocation4 + $0x168] sm:$0xf] }
 0x101   :  { %2482 = vmatpush.bf16.msra.mxu3 %v3821_v2  ;;  %v4248_v2 = vld [vmem:[#allocation4 + $0x3e0] sm:$0xf]  ;;  %v4169_v13 = vor.u32 %v4692_v10, %v4168_v8  ;;  %v4643_v10 = vld [vmem:[#allocation4 + $0x1cc] sm:$0xf] }
 0x102   :  { %v4249_v4 = vor.u32 %v4712_v3, %v4248_v2 }
 0x103   :  { %2496 = vmatpush.bf16.msra.mxu1 %v3933_v48  ;;  %2506 = vmatpush.bf16.msra.mxu2 %v4109_v1  ;;  %v1455_v12 = vpop.f32.mrf.mxu3  ;;  %v3824_v48 = vld [vmem:[#allocation4 + $0x88] sm:$0xf]  ;;  %v4026_v1 = vld [vmem:[#allocation4 + $0x230] sm:$0xf0] }
 0x104   :  { %2466 = vmatpush.bf16.msrb.mxu0 %v4249_v4  ;;  %v1456_v17 = vadd.f32 %v1455_v12, %v1443_v5  ;;  %v3825_v33 = vor.u32 %v4605_v23, %v3824_v48  ;;  %v4593_v5 = vld [vmem:[#allocation4 + $0x34] sm:$0xf0]  ;;  %v4152_v23 = vld [vmem:[#allocation4 + $0x320] sm:$0xf] }
 0x105   :  { %2483 = vmatpush.bf16.msra.mxu3 %v3805_v15  ;;  %v4232_v15 = vld [vmem:[#allocation4 + $0x3c0] sm:$0xf]  ;;  %v4633_v12 = vld [vmem:[#allocation4 + $0x174] sm:$0xf0] }
 0x106   :  { %v4233_v57 = vor.u32 %v4708_v16, %v4232_v15  ;;  %v1642_v21 = vmax.f32 %v1456_v17, 0.0  ;;  %v3760_v15 = vld [vmem:[#allocation4 + $0x8] sm:$0xf]  ;;  %v3777_v17 = vor.u32 %v4593_v5, %v3776_v63  ;;  %v3937_v48 = vor.u32 %v4633_v12, %v3936_v41  ;;  %v4702_v5 = vld [vmem:[#allocation4 + $0x3a4] sm:$0xf] }
 0x107   :  { %2497 = vmatpush.bf16.msra.mxu1 %v3917_v35  ;;  %2507 = vmatpush.bf16.msra.mxu2 %v4093_v14 }
 0x108   :  { %2467 = vmatpush.bf16.msrb.mxu0 %v4233_v57  ;;  %v4943_v9 = vpack.c.bf16 %v1642_v21, %v1642_v21  ;;  %v4010_v57 = vld [vmem:[#allocation4 + $0x210] sm:$0xf0]  ;;  %v3920_v21 = vld [vmem:[#allocation4 + $0x148] sm:$0xf] }
 0x109   :  { %2484 = vmatpush.bf16.msra.mxu3 %v3789_v27  ;;  %v4216_v27 = vld [vmem:[#allocation4 + $0x3a0] sm:$0xf] }
 0x10a   :  { %v4217_v35 = vor.u32 %v4704_v28, %v4216_v27  ;;  %2448 = vmatmul.bf16.vlgmr.msrb.gmra.mxu1 %v4943_v9  ;;  %v3874_v27 = vld [vmem:[#allocation4 + $0xf8] sm:$0xf0]  ;;  %v4153_v28 = vor.u32 %v4688_v24, %v4152_v23  ;;  %v4595_v23 = vld [vmem:[#allocation4 + $0x4c] sm:$0xf] }
 0x10b   :  { %2498 = vmatpush.bf16.msra.mxu1 %v3901_v20  ;;  %v1457_v40 = vpop.f32.mrf.mxu3  ;;  %v4946_v42 = vpop.f32.mrf.mxu0  ;;  %2508 = vmatpush.bf16.msra.mxu2 %v4077_v32  ;;  %v3968_v20 = vld [vmem:[#allocation4 + $0x1a8] sm:$0xf]  ;;  %v4625_v32 = vld [vmem:[#allocation4 + $0x134] sm:$0xf0] }
 0x10c   :  { %2468 = vmatpush.bf16.msrb.mxu0 %v4217_v35  ;;  %v4948_v50 = vpop.f32.mrf.mxu1  ;;  %v3969_v60 = vor.u32 %v4641_v11, %v3968_v20  ;;  %v4136_v40 = vld [vmem:[#allocation4 + $0x300] sm:$0xf]  ;;  %v263_v20 = vperm.slane %v4916_v6, 2 }
 0x10d   :  { %2485 = vmatpush.bf16.msra.mxu3 %v3773_v43  ;;  %v3985_v43 = vor.u32 %v4645_v31, %v3984_v30  ;;  %v3761_v30 = vor.u32 %v4589_v18, %v3760_v15  ;;  %v3904_v31 = vld [vmem:[#allocation4 + $0x128] sm:$0xf]  ;;  %v4599_v15 = vld [vmem:[#allocation4 + $0x6c] sm:$0xf]  ;;  %v4698_v18 = vld [vmem:[#allocation4 + $0x384] sm:$0xf] }
 0x10f   :  { %2499 = vmatpush.bf16.msra.mxu1 %v3885_v39  ;;  %2509 = vmatpush.bf16.msra.mxu2 %v4061_v45  ;;  %v4185_v39 = vor.u32 %v4696_v59, %v4184_v29  ;;  %v4234_v29 = vld [vmem:[#allocation4 + $0x3d0] sm:$0xf0]  ;;  %v1469_v59 = vadd.f32 %v4948_v50, %v263_v20  ;;  %v3986_v50 = vld [vmem:[#allocation4 + $0x1d8] sm:$0xf0]  ;;  %v4631_v20 = vld [vmem:[#allocation4 + $0x16c] sm:$0xf] }
 0x110   :  { %2469 = vmatpush.bf16.msrb.mxu0 %v4201_v49  ;;  %v4253_v49 = vor.u32 %v4710_v46, %v4250_v47  ;;  %v4170_v46 = vld [vmem:[#allocation4 + $0x350] sm:$0xf0] }
 0x111   :  { %2486 = vmatpush.bf16.msra.mxu3 %v3757_v58  ;;  %v4045_v58 = vor.u32 %v4658_v54, %v4042_v55  ;;  %v3888_v54 = vld [vmem:[#allocation4 + $0x108] sm:$0xf]  ;;  %v4621_v55 = vld [vmem:[#allocation4 + $0x114] sm:$0xf0] }
 0x113   :  { %2544 = vmatpush.bf16.msrb.mxu1 %v4001_v25  ;;  %v1496_v3 = vpop.f32.mrf.mxu0  ;;  %2510 = vmatpush.bf16.msra.mxu2 %v4045_v58  ;;  %v4629_v25 = vld [vmem:[#allocation4 + $0x154] sm:$0xf0]  ;;  %v4706_v58 = vld [vmem:[#allocation4 + $0x3c4] sm:$0xf] }
 0x114   :  { %2487 = vmatmul.bf16.vlgmr.msra.gmra.mxu3 %v4936_v53  ;;  %2470 = vmatpush.bf16.msrb.mxu0 %v4185_v39  ;;  %v1470_v16 = vpop.f32.mrf.mxu1  ;;  %v3921_v35 = vor.u32 %v4629_v25, %v3920_v21  ;;  %v4237_v39 = vor.u32 %v4706_v58, %v4234_v29  ;;  %v3970_v21 = vld [vmem:[#allocation4 + $0x1b8] sm:$0xf0]  ;;  %v4686_v29 = vld [vmem:[#allocation4 + $0x324] sm:$0xf] }
 0x115   :  { %2531 = vmatpush.bf16.msrb.mxu3 %v3873_v34  ;;  %v3952_v34 = vld [vmem:[#allocation4 + $0x188] sm:$0xf]  ;;  %v3989_v16 = vor.u32 %v4643_v10, %v3986_v50  ;;  %v3794_v25 = vld [vmem:[#allocation4 + $0x58] sm:$0xf0]  ;;  %v4138_v10 = vld [vmem:[#allocation4 + $0x310] sm:$0xf0] }
 0x116   :  { %v3953_v4 = vor.u32 %v4637_v61, %v3952_v34  ;;  %v4647_v34 = vld [vmem:[#allocation4 + $0x1ec] sm:$0xf]  ;;  %v4002_v61 = vld [vmem:[#allocation4 + $0x1f8] sm:$0xf0] }
 0x117   :  { %2545 = vmatpush.bf16.msrb.mxu1 %v3985_v43  ;;  %v4950_v2 = vpop.f32.mrf.mxu3  ;;  %v4952_v14 = vpop.f32.mrf.mxu2  ;;  %v4684_v43 = vld [vmem:[#allocation4 + $0x30c] sm:$0xf0]  ;;  %v4005_v3 = vor.u32 %v4647_v34, %v4002_v61  ;;  %v3762_v58 = vld [vmem:[#allocation4 + $0x18] sm:$0xf0]  ;;  %v4627_v61 = vld [vmem:[#allocation4 + $0x14c] sm:$0xf] }
 0x118   :  { %2471 = vmatpush.bf16.msrb.mxu0 %v4169_v13  ;;  %v4137_v45 = vor.u32 %v4684_v43, %v4136_v40  ;;  %v1482_v8 = vadd.f32 %v4950_v2, %v1469_v59  ;;  %v4154_v59 = vld [vmem:[#allocation4 + $0x330] sm:$0xf0]  ;;  %v4623_v50 = vld [vmem:[#allocation4 + $0x12c] sm:$0xf] }
 0x119   :  { %2532 = vmatpush.bf16.msrb.mxu3 %v3857_v7  ;;  %v4029_v7 = vor.u32 %v4654_v0, %v4026_v1  ;;  %v4603_v0 = vld [vmem:[#allocation4 + $0x8c] sm:$0xf] }
 0x11a   :  { %2500 = vmatmul.bf16.vlgmr.msra.gmra.mxu1 %v4943_v9 }
 0x11b   :  { %2546 = vmatpush.bf16.msrb.mxu1 %v3969_v60  ;;  %2511 = vmatpush.bf16.msra.mxu2 %v4029_v7  ;;  %v4955_v38 = vpop.f32.mrf.mxu0  ;;  %v4607_v60 = vld [vmem:[#allocation4 + $0xac] sm:$0xf]  ;;  %v4218_v7 = vld [vmem:[#allocation4 + $0x3b0] sm:$0xf0] }
 0x11c   :  { %2472 = vmatpush.bf16.msrb.mxu0 %v4153_v28  ;;  %v3845_v63 = vor.u32 %v4607_v60, %v3842_v56  ;;  %v4221_v41 = vor.u32 %v4702_v5, %v4218_v7  ;;  %v4587_v60 = vld [vmem:[#allocation4 + $0xc] sm:$0xf] }
 0x11d   :  { %2533 = vmatpush.bf16.msrb.mxu3 %v3841_v22  ;;  %v4013_v22 = vor.u32 %v4650_v19, %v4010_v57  ;;  %v4202_v19 = vld [vmem:[#allocation4 + $0x390] sm:$0xf0]  ;;  %v1495_v57 = vadd.f32 %v4946_v42, %v1482_v8  ;;  %v4682_v8 = vld [vmem:[#allocation4 + $0x304] sm:$0xf] }
 0x11e   :  { %v4205_v2 = vor.u32 %v4698_v18, %v4202_v19  ;;  %v4619_v19 = vld [vmem:[#allocation4 + $0x10c] sm:$0xf] }
 0x11f   :  { %2547 = vmatpush.bf16.msrb.mxu1 %v3953_v4  ;;  %v1483_v37 = vpop.f32.mrf.mxu3  ;;  %2512 = vmatpush.bf16.msra.mxu2 %v4013_v22  ;;  %v1509_v11 = vpop.f32.mrf.mxu2  ;;  %v3826_v4 = vld [vmem:[#allocation4 + $0x98] sm:$0xf0]  ;;  %v1508_v28 = vadd.f32 %v4952_v14, %v1495_v57 }
 0x120   :  { %2473 = vmatpush.bf16.msrb.mxu0 %v4137_v45  ;;  %v3829_v13 = vor.u32 %v4603_v0, %v3826_v4  ;;  %v4591_v37 = vld [vmem:[#allocation4 + $0x2c] sm:$0xf]  ;;  %v4690_v45 = vld [vmem:[#allocation4 + $0x344] sm:$0xf]  ;;  %v3938_v14 = vld [vmem:[#allocation4 + $0x178] sm:$0xf0] }
 0x121   :  { %2534 = vmatpush.bf16.msrb.mxu3 %v3825_v33  ;;  %v3877_v33 = vor.u32 %v4615_v26, %v3874_v27  ;;  %v4694_v26 = vld [vmem:[#allocation4 + $0x364] sm:$0xf]  ;;  %v4186_v27 = vld [vmem:[#allocation4 + $0x370] sm:$0xf0]  ;;  %v3941_v56 = vor.u32 %v4631_v20, %v3938_v14  ;;  %v4677_v4 = vld [vmem:[#allocation4 + $0x2d4] sm:$0xf0] }
 0x122   :  { %v4189_v42 = vor.u32 %v4694_v26, %v4186_v27  ;;  %v3890_v57 = vld [vmem:[#allocation4 + $0x118] sm:$0xf0]  ;;  %v4665_v26 = vld [vmem:[#allocation4 + $0x274] sm:$0xf0]  ;;  %v4679_v14 = vld [vmem:[#allocation4 + $0x2ec] sm:$0xf] }
 0x123   :  { %2548 = vmatpush.bf16.msrb.mxu1 %v3937_v48  ;;  %v1548_v1 = vpop.f32.mrf.mxu0  ;;  %v4639_v48 = vld [vmem:[#allocation4 + $0x1ac] sm:$0xf] }
 0x124   :  { %2518 = vmatpush.bf16.msra.mxu0 %v4253_v49  ;;  %v3973_v24 = vor.u32 %v4639_v48, %v3970_v21  ;;  %v4173_v49 = vor.u32 %v4690_v45, %v4170_v46  ;;  %v4080_v21 = vld [vmem:[#allocation4 + $0x288] sm:$0xf] }
 0x125   :  { %2535 = vmatpush.bf16.msrb.mxu3 %v3809_v51  ;;  %v3905_v51 = vor.u32 %v4625_v32, %v3904_v31  ;;  %v3954_v31 = vld [vmem:[#allocation4 + $0x198] sm:$0xf0] }
 0x127   :  { %2549 = vmatpush.bf16.msrb.mxu1 %v3921_v35 }
 0x128   :  { %2519 = vmatpush.bf16.msra.mxu0 %v4237_v39  ;;  %v3922_v39 = vld [vmem:[#allocation4 + $0x158] sm:$0xf0] }
 0x129   :  { %2536 = vmatpush.bf16.msrb.mxu3 %v3793_v62  ;;  %v3889_v62 = vor.u32 %v4621_v55, %v3888_v54  ;;  %v4128_v54 = vld [vmem:[#allocation4 + $0x2e8] sm:$0xf]  ;;  %v4681_v55 = vld [vmem:[#allocation4 + $0x2f4] sm:$0xf0]  ;;  %v3925_v5 = vor.u32 %v4627_v61, %v3922_v39 }
 0x12a   :  { %v4129_v0 = vor.u32 %v4681_v55, %v4128_v54  ;;  %v4675_v55 = vld [vmem:[#allocation4 + $0x2cc] sm:$0xf] }
 0x12b   :  { %2550 = vmatpush.bf16.msrb.mxu1 %v3905_v51  ;;  %v1520_v12 = vpop.f32.mrf.mxu1 }
 0x12c   :  { %2520 = vmatpush.bf16.msra.mxu0 %v4221_v41  ;;  %v1521_v35 = vadd.f32 %v1520_v12, %v1508_v28  ;;  %v3906_v41 = vld [vmem:[#allocation4 + $0x138] sm:$0xf0] }
 0x12d   :  { %2537 = vmatpush.bf16.msrb.mxu3 %v3777_v17  ;;  %v3810_v17 = vld [vmem:[#allocation4 + $0x78] sm:$0xf0]  ;;  %v3909_v18 = vor.u32 %v4623_v50, %v3906_v41  ;;  %v4224_v41 = vld [vmem:[#allocation4 + $0x3a8] sm:$0xf] }
 0x12e   :  { %v3813_v22 = vor.u32 %v4599_v15, %v3810_v17  ;;  %v4673_v17 = vld [vmem:[#allocation4 + $0x2b4] sm:$0xf0]  ;;  %v4082_v50 = vld [vmem:[#allocation4 + $0x298] sm:$0xf0] }
 0x12f   :  { %2551 = vmatpush.bf16.msrb.mxu1 %v3889_v62  ;;  %v4964_v32 = vpop.f32.mrf.mxu0 }
 0x130   :  { %2521 = vmatpush.bf16.msra.mxu0 %v4205_v2  ;;  %v4669_v2 = vld [vmem:[#allocation4 + $0x294] sm:$0xf0] }
 0x131   :  { %2538 = vmatpush.bf16.msrb.mxu3 %v3761_v30  ;;  %v4635_v30 = vld [vmem:[#allocation4 + $0x18c] sm:$0xf] }
 0x132   :  { %2552 = vmatmul.bf16.vlgmr.msrb.gmra.mxu1 %v4943_v9  ;;  %v3957_v43 = vor.u32 %v4635_v30, %v3954_v31  ;;  %v4048_v31 = vld [vmem:[#allocation4 + $0x248] sm:$0xf] }
 0x133   :  { %2596 = vmatpush.bf16.msra.mxu1 %v4005_v3  ;;  %v1522_v36 = vpop.f32.mrf.mxu1  ;;  %v4112_v3 = vld [vmem:[#allocation4 + $0x2c8] sm:$0xf] }
 0x134   :  { %2539 = vmatmul.bf16.vlgmr.msrb.gmra.mxu3 %v4936_v53  ;;  %2522 = vmatpush.bf16.msra.mxu0 %v4189_v42  ;;  %v4113_v15 = vor.u32 %v4677_v4, %v4112_v3  ;;  %v4657_v36 = vld [vmem:[#allocation4 + $0x234] sm:$0xf0]  ;;  %v4240_v3 = vld [vmem:[#allocation4 + $0x3c8] sm:$0xf] }
 0x135   :  { %2583 = vmatpush.bf16.msra.mxu3 %v3877_v33  ;;  %v3797_v33 = vor.u32 %v4595_v23, %v3794_v25  ;;  %v3893_v23 = vor.u32 %v4619_v19, %v3890_v57  ;;  %v4064_v25 = vld [vmem:[#allocation4 + $0x268] sm:$0xf]  ;;  %v4709_v4 = vld [vmem:[#allocation4 + $0x3d4] sm:$0xf0] }
 0x136   :  { %v4065_v30 = vor.u32 %v4665_v26, %v4064_v25  ;;  %v4701_v19 = vld [vmem:[#allocation4 + $0x394] sm:$0xf0]  ;;  %v4655_v26 = vld [vmem:[#allocation4 + $0x22c] sm:$0xf] }
 0x137   :  { %2597 = vmatpush.bf16.msra.mxu1 %v3989_v16  ;;  %v1533_v40 = vpop.f32.mrf.mxu3  ;;  %v1559_v11 = vpop.f32.mrf.mxu2  ;;  %v4096_v16 = vld [vmem:[#allocation4 + $0x2a8] sm:$0xf] }
 0x138   :  { %v1534_v47 = vadd.f32 %v1533_v40, %v1521_v35  ;;  %v1574_v62 = vpop.f32.mrf.mxu0  ;;  %2523 = vmatpush.bf16.msra.mxu0 %v4173_v49  ;;  %v4097_v48 = vor.u32 %v4673_v17, %v4096_v16  ;;  %v4663_v16 = vld [vmem:[#allocation4 + $0x26c] sm:$0xf]  ;;  %v4066_v17 = vld [vmem:[#allocation4 + $0x278] sm:$0xf0] }
 0x139   :  { %2584 = vmatpush.bf16.msra.mxu3 %v3861_v52  ;;  %v3781_v52 = vor.u32 %v4591_v37, %v3778_v44  ;;  %v4069_v57 = vor.u32 %v4663_v16, %v4066_v17 }
 0x13a   :  { %v1547_v51 = vadd.f32 %v4955_v38, %v1534_v47  ;;  %v3765_v38 = vor.u32 %v4587_v60, %v3762_v58  ;;  %v4016_v47 = vld [vmem:[#allocation4 + $0x208] sm:$0xf]  ;;  %v4114_v60 = vld [vmem:[#allocation4 + $0x2d8] sm:$0xf0] }
 0x13b   :  { %2598 = vmatpush.bf16.msra.mxu1 %v3973_v24  ;;  %v4081_v24 = vor.u32 %v4669_v2, %v4080_v21  ;;  %v4117_v39 = vor.u32 %v4675_v55, %v4114_v60  ;;  %v4659_v21 = vld [vmem:[#allocation4 + $0x24c] sm:$0xf]  ;;  %v4050_v2 = vld [vmem:[#allocation4 + $0x258] sm:$0xf0]  ;;  %v4985_v60 = vld [vmem:[%s5110_s4] sm:$0xf] }
 0x13c   :  { %v1643_v34 = vmax.f32 %v1547_v51, 0.0  ;;  %v4210_v55 = vld [vmem:[#allocation4 + $0x398] sm:$0xf0] }
 0x13d   :  { %2585 = vmatpush.bf16.msra.mxu3 %v3845_v63  ;;  %v4157_v63 = vor.u32 %v4686_v29, %v4154_v59  ;;  %v4256_v29 = vld [vmem:[#allocation4 + $0x3e8] sm:$0xf]  ;;  %v4713_v59 = vld [vmem:[#allocation4 + $0x3f4] sm:$0xf0] }
 0x13e   :  { %v4967_v1 = vpack.c.bf16 %v1643_v34, %v1643_v34  ;;  %v4257_v62 = vor.u32 %v4713_v59, %v4256_v29  ;;  %v4194_v29 = vld [vmem:[#allocation4 + $0x378] sm:$0xf0] }
 0x13f   :  { %2599 = vmatpush.bf16.msra.mxu1 %v3957_v43  ;;  %v1535_v7 = vpop.f32.mrf.mxu3  ;;  %v1561_v12 = vpop.f32.mrf.mxu2  ;;  %2524 = vmatpush.bf16.msra.mxu0 %v4157_v63  ;;  %v4671_v63 = vld [vmem:[#allocation4 + $0x2ac] sm:$0xf] }
 0x140   :  { %2461 = vmatmul.bf16.vlgmr.msrb.gmra.mxu2 %v4967_v1  ;;  %v4705_v12 = vld [vmem:[#allocation4 + $0x3b4] sm:$0xf0] }
 0x141   :  { %2586 = vmatpush.bf16.msra.mxu3 %v3829_v13  ;;  %v4141_v13 = vor.u32 %v4682_v8, %v4138_v10  ;;  %2557 = vmatpush.bf16.msrb.mxu2 %v4129_v0  ;;  %v4098_v0 = vld [vmem:[#allocation4 + $0x2b8] sm:$0xf0]  ;;  %v4241_v8 = vor.u32 %v4709_v4, %v4240_v3  ;;  %v4667_v10 = vld [vmem:[#allocation4 + $0x28c] sm:$0xf] }
 0x142   :  { %v4687_v4 = vld [vmem:[#allocation4 + $0x32c] sm:$0xf] }
 0x143   :  { %2600 = vmatpush.bf16.msra.mxu1 %v3941_v56  ;;  %2525 = vmatpush.bf16.msra.mxu0 %v4141_v13  ;;  %v4085_v13 = vor.u32 %v4667_v10, %v4082_v50  ;;  %v4146_v10 = vld [vmem:[#allocation4 + $0x318] sm:$0xf0] }
 0x145   :  { %2587 = vmatpush.bf16.msra.mxu3 %v3813_v22  ;;  %2558 = vmatpush.bf16.msrb.mxu2 %v4113_v15  ;;  %v264_v22 = vperm.slane %v4916_v6, 3  ;;  %v4225_v15 = vor.u32 %v4705_v12, %v4224_v41 }
 0x147   :  { %2601 = vmatpush.bf16.msra.mxu1 %v3925_v5  ;;  %v1560_v27 = vadd.f32 %v1559_v11, %v264_v22  ;;  %v4130_v11 = vld [vmem:[#allocation4 + $0x2f8] sm:$0xf0]  ;;  %v4101_v5 = vor.u32 %v4671_v63, %v4098_v0  ;;  %v4192_v22 = vld [vmem:[#allocation4 + $0x368] sm:$0xf] }
 0x149   :  { %2588 = vmatpush.bf16.msra.mxu3 %v3797_v33  ;;  %2559 = vmatpush.bf16.msrb.mxu2 %v4097_v48  ;;  %v1573_v42 = vadd.f32 %v4964_v32, %v1560_v27  ;;  %v4032_v33 = vld [vmem:[#allocation4 + $0x228] sm:$0xf]  ;;  %v4034_v27 = vld [vmem:[#allocation4 + $0x238] sm:$0xf0] }
 0x14a   :  { %v4033_v46 = vor.u32 %v4657_v36, %v4032_v33  ;;  %v4160_v33 = vld [vmem:[#allocation4 + $0x328] sm:$0xf]  ;;  %v4689_v36 = vld [vmem:[#allocation4 + $0x334] sm:$0xf0] }
 0x14b   :  { %2602 = vmatpush.bf16.msra.mxu1 %v3909_v18  ;;  %v1585_v28 = vpop.f32.mrf.mxu1  ;;  %v4208_v18 = vld [vmem:[#allocation4 + $0x388] sm:$0xf] }
 0x14c   :  { %v1586_v37 = vadd.f32 %v1585_v28, %v1573_v42  ;;  %v4209_v48 = vor.u32 %v4701_v19, %v4208_v18  ;;  %v4176_v28 = vld [vmem:[#allocation4 + $0x348] sm:$0xf]  ;;  %v4721_v18 = vld [vmem:[%s5111_s5 + $0x38] sm:$0xff] }
 0x14d   :  { %2589 = vmatpush.bf16.msra.mxu3 %v3781_v52  ;;  %2560 = vmatpush.bf16.msrb.mxu2 %v4081_v24  ;;  %v4133_v52 = vor.u32 %v4679_v14, %v4130_v11  ;;  %v4053_v24 = vor.u32 %v4659_v21, %v4050_v2  ;;  %v4707_v14 = vld [vmem:[#allocation4 + $0x3cc] sm:$0xf]  ;;  %v4242_v11 = vld [vmem:[#allocation4 + $0x3d8] sm:$0xf0] }
 0x14f   :  { %2603 = vmatpush.bf16.msra.mxu1 %v3893_v23  ;;  %v1624_v6 = vpop.f32.mrf.mxu0  ;;  %v4697_v23 = vld [vmem:[#allocation4 + $0x374] sm:$0xf0] }
 0x150   :  { %2513 = vmatmul.bf16.vlgmr.msra.gmra.mxu2 %v4967_v1  ;;  %v4193_v25 = vor.u32 %v4697_v23, %v4192_v22  ;;  %v4719_v22 = vld [vmem:[%s5111_s5 + $0x28] sm:$0xff] }
 0x151   :  { %2590 = vmatpush.bf16.msra.mxu3 %v3765_v38  ;;  %2561 = vmatpush.bf16.msrb.mxu2 %v4065_v30  ;;  %v4693_v30 = vld [vmem:[#allocation4 + $0x354] sm:$0xf0] }
 0x152   :  { %2604 = vmatmul.bf16.vlgmr.msra.gmra.mxu1 %v4943_v9  ;;  %v4653_v9 = vld [vmem:[#allocation4 + $0x214] sm:$0xf0]  ;;  %v4177_v42 = vor.u32 %v4693_v30, %v4176_v28  ;;  %v4716_v30 = vld [vmem:[%s5111_s5 + $0x10] sm:$0xff] }
 0x153   :  { %v1587_v40 = vpop.f32.mrf.mxu1  ;;  %v4017_v51 = vor.u32 %v4653_v9, %v4016_v47  ;;  %v4258_v47 = vld [vmem:[#allocation4 + $0x3f8] sm:$0xf0] }
 0x154   :  { %2591 = vmatmul.bf16.vlgmr.msra.gmra.mxu3 %v4936_v53  ;;  %v4661_v53 = vld [vmem:[#allocation4 + $0x254] sm:$0xf0]  ;;  %v4161_v40 = vor.u32 %v4689_v36, %v4160_v33  ;;  %v1782_v36 = vperm.slane %v4985_v60, 3 }
 0x155   :  { %v4049_v35 = vor.u32 %v4661_v53, %v4048_v31  ;;  %v4037_v53 = vor.u32 %v4655_v26, %v4034_v27  ;;  %2903 = vmatpush.bf16.msrb.mxu3 %v4721_v18  ;;  %v4717_v26 = vld [vmem:[%s5111_s5 + $0x18] sm:$0xff] }
 0x156   :  { %v4729_v27 = vld [vmem:[%s5111_s5 + $0x78] sm:$0xff] }
 0x157   :  { %v1598_v43 = vpop.f32.mrf.mxu3  ;;  %v1611_v45 = vpop.f32.mrf.mxu2  ;;  %2562 = vmatpush.bf16.msrb.mxu2 %v4049_v35  ;;  %v4018_v35 = vld [vmem:[#allocation4 + $0x218] sm:$0xf0]  ;;  %2916 = vmatpush.bf16.msrb.mxu1 %v4729_v27 }
 0x158   :  { %v1599_v44 = vadd.f32 %v1598_v43, %v1586_v37  ;;  %v1626_v32 = vpop.f32.mrf.mxu0  ;;  %v4144_v43 = vld [vmem:[#allocation4 + $0x308] sm:$0xf] }
 0x159   :  { %v4245_v32 = vor.u32 %v4707_v14, %v4242_v11  ;;  %v4723_v14 = vld [vmem:[%s5111_s5 + $0x48] sm:$0xff] }
 0x15a   :  { %v1612_v20 = vadd.f32 %v1611_v45, %v1599_v44  ;;  %v4685_v44 = vld [vmem:[#allocation4 + $0x314] sm:$0xf0]  ;;  %v4735_v11 = vld [vmem:[%s5111_s5 + $0xa8] sm:$0xff] }
 0x15b   :  { %2563 = vmatpush.bf16.msrb.mxu2 %v4033_v46  ;;  %v1637_v54 = vpop.f32.mrf.mxu1  ;;  %v4711_v46 = vld [vmem:[#allocation4 + $0x3ec] sm:$0xf]  ;;  %v4145_v9 = vor.u32 %v4685_v44, %v4144_v43 }
 0x15c   :  { %v1625_v49 = vadd.f32 %v1624_v6, %v1612_v20  ;;  %v4651_v6 = vld [vmem:[#allocation4 + $0x20c] sm:$0xf]  ;;  %v4261_v20 = vor.u32 %v4711_v46, %v4258_v47  ;;  %v4736_v46 = vld [vmem:[%s5111_s5 + $0xb0] sm:$0xff] }
 0x15d   :  { %v4021_v37 = vor.u32 %v4651_v6, %v4018_v35  ;;  %v4714_v6 = vld [vmem:[%s5111_s5] sm:$0xff] }
 0x15e   :  { %v1638_v56 = vadd.f32 %v1637_v54, %v1625_v49  ;;  %v4703_v49 = vld [vmem:[#allocation4 + $0x3ac] sm:$0xf]  ;;  %v4726_v35 = vld [vmem:[%s5111_s5 + $0x60] sm:$0xff] }
 0x15f   :  { %v1600_v58 = vpop.f32.mrf.mxu3  ;;  %v1613_v34 = vpop.f32.mrf.mxu2  ;;  %2564 = vmatpush.bf16.msrb.mxu2 %v4017_v51  ;;  %v4226_v51 = vld [vmem:[#allocation4 + $0x3b8] sm:$0xf0]  ;;  %v4699_v54 = vld [vmem:[#allocation4 + $0x38c] sm:$0xf] }
 0x160   :  { %v1644_v61 = vmax.f32 %v1638_v56, 0.0  ;;  %v1779_v56 = vperm.slane %v4985_v60, 0  ;;  %v4695_v58 = vld [vmem:[#allocation4 + $0x36c] sm:$0xf] }
 0x161   :  { %v4197_v59 = vor.u32 %v4695_v58, %v4194_v29  ;;  %v4731_v58 = vld [vmem:[%s5111_s5 + $0x88] sm:$0xff] }
 0x162   :  { %v4975_v38 = vpack.c.bf16 %v1644_v61, %v1644_v61  ;;  %2565 = vmatmul.bf16.vlgmr.msrb.gmra.mxu2 %v4967_v1  ;;  %v4691_v61 = vld [vmem:[#allocation4 + $0x34c] sm:$0xf] }
 0x163   :  { %2609 = vmatpush.bf16.msra.mxu2 %v4133_v52  ;;  %v1639_v7 = vpop.f32.mrf.mxu1  ;;  %v4229_v52 = vor.u32 %v4703_v49, %v4226_v51  ;;  %v4722_v49 = vld [vmem:[%s5111_s5 + $0x40] sm:$0xff] }
 0x164   :  { %2474 = vmatmul.bf16.vlgmr.msrb.gmra.mxu0 %v4975_v38  ;;  %v4734_v51 = vld [vmem:[%s5111_s5 + $0xa0] sm:$0xff] }
 0x165   :  { %2570 = vmatpush.bf16.msrb.mxu0 %v4257_v62 }
 0x167   :  { %2610 = vmatpush.bf16.msra.mxu2 %v4117_v39  ;;  %v4178_v39 = vld [vmem:[#allocation4 + $0x358] sm:$0xf0] }
 0x168   :  { %v4181_v3 = vor.u32 %v4691_v61, %v4178_v39  ;;  %v4730_v61 = vld [vmem:[%s5111_s5 + $0x80] sm:$0xff]  ;;  %v4745_v39 = vld [vmem:[%s5111_s5 + $0xf8] sm:$0xff] }
 0x169   :  { %2571 = vmatpush.bf16.msrb.mxu0 %v4241_v8  ;;  %v4683_v8 = vld [vmem:[#allocation4 + $0x30c] sm:$0xf] }
 0x16a   :  { %v4149_v12 = vor.u32 %v4683_v8, %v4146_v10 }
 0x16b   :  { %2611 = vmatpush.bf16.msra.mxu2 %v4101_v5  ;;  %v4162_v5 = vld [vmem:[#allocation4 + $0x338] sm:$0xf0] }
 0x16c   :  { %v4165_v7 = vor.u32 %v4687_v4, %v4162_v5  ;;  %v4743_v4 = vld [vmem:[%s5111_s5 + $0xe8] sm:$0xff] }
 0x16d   :  { %2572 = vmatpush.bf16.msrb.mxu0 %v4225_v15 }
 0x16f   :  { %2612 = vmatpush.bf16.msra.mxu2 %v4085_v13  ;;  %v1780_v13 = vperm.slane %v4985_v60, 1 }
 0x171   :  { %2573 = vmatpush.bf16.msrb.mxu0 %v4209_v48  ;;  %v4720_v48 = vld [vmem:[%s5111_s5 + $0x30] sm:$0xff] }
 0x172   :  { %2904 = vmatpush.bf16.msrb.mxu3 %v4720_v48 }
 0x173   :  { %2613 = vmatpush.bf16.msra.mxu2 %v4069_v57  ;;  %v1781_v57 = vperm.slane %v4985_v60, 2  ;;  %v4732_v60 = vld [vmem:[%s5111_s5 + $0x90] sm:$0xff] }
 0x174   :  { %2526 = vmatmul.bf16.vlgmr.msra.gmra.mxu0 %v4975_v38 }
 0x175   :  { %2574 = vmatpush.bf16.msrb.mxu0 %v4193_v25 }
 0x176   :  { %2905 = vmatpush.bf16.msrb.mxu3 %v4719_v22 }
 0x177   :  { %v2436_v31 = vpop.f32.mrf.mxu3  ;;  %2614 = vmatpush.bf16.msra.mxu2 %v4053_v24  ;;  %v4718_v24 = vld [vmem:[%s5111_s5 + $0x20] sm:$0xff] }
 0x178   :  { %v2437_v34 = vadd.f32 %v2436_v31, %v1779_v56  ;;  %v4728_v31 = vld [vmem:[%s5111_s5 + $0x70] sm:$0xff] }
 0x179   :  { %2575 = vmatpush.bf16.msrb.mxu0 %v4177_v42  ;;  %2917 = vmatpush.bf16.msrb.mxu1 %v4728_v31  ;;  %v4727_v42 = vld [vmem:[%s5111_s5 + $0x68] sm:$0xff] }
 0x17a   :  { %2906 = vmatpush.bf16.msrb.mxu3 %v4718_v24 }
 0x17b   :  { %2615 = vmatpush.bf16.msra.mxu2 %v4037_v53  ;;  %v4715_v53 = vld [vmem:[%s5111_s5 + $0x8] sm:$0xff] }
 0x17d   :  { %2576 = vmatpush.bf16.msrb.mxu0 %v4161_v40  ;;  %2918 = vmatpush.bf16.msrb.mxu1 %v4727_v42  ;;  %v4737_v40 = vld [vmem:[%s5111_s5 + $0xb8] sm:$0xff] }
 0x17e   :  { %2907 = vmatpush.bf16.msrb.mxu3 %v4717_v26 }
 0x17f   :  { %v2438_v45 = vpop.f32.mrf.mxu3  ;;  %2616 = vmatpush.bf16.msra.mxu2 %v4021_v37  ;;  %v4725_v37 = vld [vmem:[%s5111_s5 + $0x58] sm:$0xff] }
 0x180   :  { %v4724_v45 = vld [vmem:[%s5111_s5 + $0x50] sm:$0xff] }
 0x181   :  { %2577 = vmatpush.bf16.msrb.mxu0 %v4145_v9  ;;  %2919 = vmatpush.bf16.msrb.mxu1 %v4726_v35 }
 0x182   :  { %2617 = vmatmul.bf16.vlgmr.msra.gmra.mxu2 %v4967_v1  ;;  %v4213_v1 = vor.u32 %v4699_v54, %v4210_v55  ;;  %2908 = vmatpush.bf16.msrb.mxu3 %v4716_v30  ;;  %v4733_v55 = vld [vmem:[%s5111_s5 + $0x98] sm:$0xff] }
 0x183   :  { %2929 = vmatpush.bf16.msrb.mxu2 %v4737_v40 }
 0x184   :  { %2578 = vmatmul.bf16.vlgmr.msrb.gmra.mxu0 %v4975_v38 }
 0x185   :  { %2622 = vmatpush.bf16.msra.mxu0 %v4261_v20  ;;  %2920 = vmatpush.bf16.msrb.mxu1 %v4725_v37 }
 0x186   :  { %2909 = vmatpush.bf16.msrb.mxu3 %v4715_v53 }
 0x187   :  { %v2449_v62 = vpop.f32.mrf.mxu1  ;;  %2930 = vmatpush.bf16.msrb.mxu2 %v4736_v46 }
 0x188   :  { %v4988_v0 = vadd.f32 %v2449_v62, %v2437_v34 }
 0x189   :  { %2623 = vmatpush.bf16.msra.mxu0 %v4245_v32  ;;  %2921 = vmatpush.bf16.msrb.mxu1 %v4724_v45 }
 0x18a   :  { %2910 = vmatpush.bf16.msrb.mxu3 %v4714_v6 }
 0x18b   :  { %2931 = vmatpush.bf16.msrb.mxu2 %v4735_v11 }
 0x18d   :  { %2624 = vmatpush.bf16.msra.mxu0 %v4229_v52  ;;  %2922 = vmatpush.bf16.msrb.mxu1 %v4723_v14 }
 0x18f   :  { %v2451_v50 = vpop.f32.mrf.mxu1  ;;  %2932 = vmatpush.bf16.msrb.mxu2 %v4734_v51 }
 0x191   :  { %2625 = vmatpush.bf16.msra.mxu0 %v4213_v1  ;;  %2923 = vmatpush.bf16.msrb.mxu1 %v4722_v49 }
 0x193   :  { %2933 = vmatpush.bf16.msrb.mxu2 %v4733_v55 }
 0x195   :  { %2626 = vmatpush.bf16.msra.mxu0 %v4197_v59 }
 0x197   :  { %v2488_v63 = vpop.f32.mrf.mxu3  ;;  %v2501_v16 = vpop.f32.mrf.mxu1  ;;  %2934 = vmatpush.bf16.msrb.mxu2 %v4732_v60 }
 0x198   :  { %v2489_v15 = vadd.f32 %v2488_v63, %v1780_v13 }
 0x199   :  { %2627 = vmatpush.bf16.msra.mxu0 %v4181_v3 }
 0x19a   :  { %v4991_v17 = vadd.f32 %v2501_v16, %v2489_v15  ;;  %v4740_v15 = vld [vmem:[%s5111_s5 + $0xd0] sm:$0xff] }
 0x19b   :  { %2935 = vmatpush.bf16.msrb.mxu2 %v4731_v58 }
 0x19d   :  { %2628 = vmatpush.bf16.msra.mxu0 %v4165_v7  ;;  %v4742_v7 = vld [vmem:[%s5111_s5 + $0xe0] sm:$0xff] }
 0x19f   :  { %v2490_v41 = vpop.f32.mrf.mxu3  ;;  %v2503_v19 = vpop.f32.mrf.mxu1  ;;  %2936 = vmatpush.bf16.msrb.mxu2 %v4730_v61 }
 0x1a0   :  { %v4741_v41 = vld [vmem:[%s5111_s5 + $0xd8] sm:$0xff]  ;;  %v4738_v19 = vld [vmem:[%s5111_s5 + $0xc0] sm:$0xff] }
 0x1a1   :  { %2629 = vmatpush.bf16.msra.mxu0 %v4149_v12 }
 0x1a4   :  { %2630 = vmatmul.bf16.vlgmr.msra.gmra.mxu0 %v4975_v38 }
 0x1a5   :  { %2942 = vmatpush.bf16.msrb.mxu0 %v4745_v39 }
 0x1af   :  { %v2553_v38 = vpop.f32.mrf.mxu1 }
 0x1b7   :  { %v2540_v21 = vpop.f32.mrf.mxu3  ;;  %v2555_v28 = vpop.f32.mrf.mxu1 }
 0x1b8   :  { %v2541_v2 = vadd.f32 %v2540_v21, %v1781_v57 }
 0x1ba   :  { %v5004_v23 = vadd.f32 %v2553_v38, %v2541_v2 }
 0x1bf   :  { %v2542_v25 = vpop.f32.mrf.mxu3 }
 0x1c3   :  { %v2462_v33 = vpop.f32.mrf.mxu2 }
 0x1c4   :  { %v2463_v56 = vadd.f32 %v2462_v33, %v4988_v0  ;;  %v4744_v0 = vld [vmem:[%s5111_s5 + $0xf0] sm:$0xff] }
 0x1c5   :  { %2943 = vmatpush.bf16.msrb.mxu0 %v4744_v0 }
 0x1c9   :  { %2944 = vmatpush.bf16.msrb.mxu0 %v4743_v4 }
 0x1cb   :  { %v2464_v9 = vpop.f32.mrf.mxu2 }
 0x1cd   :  { %2945 = vmatpush.bf16.msrb.mxu0 %v4742_v7 }
 0x1cf   :  { %v2605_v47 = vpop.f32.mrf.mxu1 }
 0x1d1   :  { %2946 = vmatpush.bf16.msrb.mxu0 %v4741_v41 }
 0x1d3   :  { %v2514_v54 = vpop.f32.mrf.mxu2 }
 0x1d4   :  { %v2515_v8 = vadd.f32 %v2514_v54, %v4991_v17  ;;  %v4739_v17 = vld [vmem:[%s5111_s5 + $0xc8] sm:$0xff] }
 0x1d5   :  { %2947 = vmatpush.bf16.msrb.mxu0 %v4740_v15 }
 0x1d7   :  { %v2592_v43 = vpop.f32.mrf.mxu3  ;;  %v2607_v52 = vpop.f32.mrf.mxu1 }
 0x1d8   :  { %v2593_v44 = vadd.f32 %v2592_v43, %v1782_v36  ;;  %v4750_v36 = vld [vmem:[%s5112_s6] ss:$0 sm:$0xff] }
 0x1d9   :  { %2948 = vmatpush.bf16.msrb.mxu0 %v4739_v17 }
 0x1da   :  { %v5046_v20 = vadd.f32 %v2605_v47, %v2593_v44 }
 0x1db   :  { %v2516_v1 = vpop.f32.mrf.mxu2 }
 0x1dd   :  { %2949 = vmatpush.bf16.msrb.mxu0 %v4738_v19 }
 0x1df   :  { %v2594_v32 = vpop.f32.mrf.mxu3 }
 0x1e1   :  { %v2475_v29 = vpop.f32.mrf.mxu0 }
 0x1e2   :  { %v2476_v59 = vadd.f32 %v2475_v29, %v2463_v56 }
 0x1e4   :  { %v2635_v34 = vmax.f32 %v2476_v59, 0.0 }
 0x1e5   :  { %v2566_v62 = vpop.f32.mrf.mxu2 }
 0x1e6   :  { %v2639_v63 = vpack.c.bf16 %v2635_v34, %v2635_v34  ;;  %v2567_v18 = vadd.f32 %v2566_v62, %v5004_v23 }
 0x1e8   :  { %2911 = vmatmul.bf16.vlgmr.msrb.gmra.mxu3 %v2639_v63 }
 0x1e9   :  { %v2477_v3 = vpop.f32.mrf.mxu0 }
 0x1ed   :  { %v2568_v5 = vpop.f32.mrf.mxu2 }
 0x1f1   :  { %v2527_v10 = vpop.f32.mrf.mxu0 }
 0x1f2   :  { %v2528_v50 = vadd.f32 %v2527_v10, %v2515_v8 }
 0x1f4   :  { %v2636_v12 = vmax.f32 %v2528_v50, 0.0 }
 0x1f6   :  { %v2640_v13 = vpack.c.bf16 %v2636_v12, %v2636_v12 }
 0x1f8   :  { %2924 = vmatmul.bf16.vlgmr.msrb.gmra.mxu1 %v2640_v13 }
 0x1f9   :  { %v2529_v16 = vpop.f32.mrf.mxu0 }
 0x201   :  { %v2579_v57 = vpop.f32.mrf.mxu0 }
 0x202   :  { %v2580_v48 = vadd.f32 %v2579_v57, %v2567_v18 }
 0x204   :  { %v2637_v2 = vmax.f32 %v2580_v48, 0.0 }
 0x205   :  { %v2618_v21 = vpop.f32.mrf.mxu2 }
 0x206   :  { %v2641_v22 = vpack.c.bf16 %v2637_v2, %v2637_v2  ;;  %v2619_v25 = vadd.f32 %v2618_v21, %v5046_v20 }
 0x208   :  { %2937 = vmatmul.bf16.vlgmr.msrb.gmra.mxu2 %v2641_v22 }
 0x209   :  { %v2581_v38 = vpop.f32.mrf.mxu0 }
 0x20d   :  { %v2620_v24 = vpop.f32.mrf.mxu2 }
 0x221   :  { %v2631_v26 = vpop.f32.mrf.mxu0 }
 0x222   :  { %v2632_v27 = vadd.f32 %v2631_v26, %v2619_v25 }
 0x224   :  { %v2638_v28 = vmax.f32 %v2632_v27, 0.0 }
 0x226   :  { %v2642_v30 = vpack.c.bf16 %v2638_v28, %v2638_v28 }
 0x228   :  { %2950 = vmatmul.bf16.vlgmr.msrb.gmra.mxu0 %v2642_v30 }
 0x229   :  { %v2633_v23 = vpop.f32.mrf.mxu0 }
 0x26b   :  { %v2912_v31 = vpop.f32.mrf.mxu3 }
 0x26c   :  { %v2913_v37 = vadd.f32 %v4750_v36, %v2912_v31 }
 0x273   :  { %v2914_v53 = vpop.f32.mrf.mxu3 }
 0x275   :  { %v2925_v42 = vpop.f32.mrf.mxu1 }
 0x276   :  { %v2926_v40 = vadd.f32 %v2925_v42, %v2913_v37 }
 0x27d   :  { %v2927_v6 = vpop.f32.mrf.mxu1 }
 0x28b   :  { %v2938_v35 = vpop.f32.mrf.mxu2 }
 0x28c   :  { %v2939_v43 = vadd.f32 %v2938_v35, %v2926_v40 }
 0x293   :  { %v2940_v33 = vpop.f32.mrf.mxu2 }
 0x2a5   :  { %v2951_v44 = vpop.f32.mrf.mxu0 }
 0x2a6   :  { %v2952_v45 = vadd.f32 %v2951_v44, %v2939_v43 }
 0x2a8   :  { %2955 = vst [vmem:[%s5113_s7] sm:$0xff] %v2952_v45 }
 0x2ad   :  { %v2953_v46 = vpop.f32.mrf.mxu0 }
 0x2ae   :  { %2960 = vsyncpa [#allocation3], 1 }
 0x2af   :  { %2961 = vsyncpa [#allocation5], 1 }

// kernel: mlp_forward.1
= control target key start
LH: loop header
LB: loop body
LE: loop exit
PB: predicated region body
PF: predicated region fallthrough
CT: control target
= control target key end

     0   :  { %12 = vsyncpa [#allocation3], 0  ;;  %s5106_s0 = inlined_call_operand.vmem [shape: bf16[8,784], index: 0, kind: input, shape index: {}]   ;;  %s5107_s1 = inlined_call_operand.hbm [shape: bf16[784,512], index: 1, kind: input, shape index: {}]   ;;  %s5108_s2 = inlined_call_operand.vmem [shape: f32[1,512], index: 2, kind: input, shape index: {}]   ;;  %s5109_s3 = inlined_call_operand.hbm [shape: bf16[512,512], index: 3, kind: input, shape index: {}]   ;;  %s5110_s4 = inlined_call_operand.vmem [shape: f32[1,512], index: 4, kind: input, shape index: {}]   ;;  %s5111_s5 = inlined_call_operand.vmem [shape: bf16[512,128], index: 5, kind: input, shape index: {}]   ;;  %s5112_s6 = inlined_call_operand.vmem [shape: f32[1,128], index: 6, kind: input, shape index: {}]   ;;  %s5113_s7 = inlined_call_operand.vmem [shape: f32[8,128], index: 7, kind: output, shape index: {}]  }
   0x1   :  { %s20_s26 = sshll.u32 %s5107_s1, 4  ;;  %s21_s26 = int_to_ptr.hbm [resolvable:$true] %s20_s26 }
   0x2   :  { %13 = vsyncpa [#allocation5], 0  ;;  %s4803_s27 = smov [#allocation2]   ;;  %s35_s8 = sshll.u32 %s5109_s3, 4  ;;  %s36_s8 = int_to_ptr.hbm [resolvable:$true] %s35_s8 }
   0x3   :  { %s22_s28 = sshll.u32 %s4803_s27, 4  ;;  %s4804_s9 = smov 256   ;;  %s23_s28 = int_to_ptr.vmem [resolvable:$true] %s22_s28 }
   0x4   :  { %s4805_s10 = smov 16   ;;  %s4806_s11 = smov [#allocation4]  }
   0x5   :  { %28 = dma.hbm_to_vmem [thread:$0]  %s21_s26, 25088, %s23_s28, [#allocation3], %s4804_s9, %s4804_s9, %s4805_s10  }
   0x6   :  { %s37_s12 = sshll.u32 %s4806_s11, 4  ;;  %s38_s12 = int_to_ptr.vmem [resolvable:$true] %s37_s12 }
   0x7   :  { %43 = dma.hbm_to_vmem [thread:$0]  %s36_s8, 16384, %s38_s12, [#allocation5], %s4804_s9, %s4804_s9, %s4805_s10  }
   0x8   :  { %4799 = dma.done.wait [#allocation3], 25088  }
   0x9   :  { %4800 = vsyncadd [#allocation3], 4294942208 }
   0xa   :  { %4801 = dma.done.wait [#allocation5], 16384  }
   0xb   :  { %4802 = vsyncadd [#allocation5], 4294950912  ;;  %v3076_v0 = vld [vmem:[#allocation2 + $0xe0] sm:$0xf]  ;;  %v4420_v1 = vld [vmem:[#allocation2 + $0xec] sm:$0xf0] }
   0xc   :  { %v3204_v2 = vld [vmem:[#allocation2 + $0x1e0] sm:$0xf]  ;;  %v3077_v3 = vor.u32 %v4420_v1, %v3076_v0  ;;  %v4452_v4 = vld [vmem:[#allocation2 + $0x1ec] sm:$0xf0]  ;;  %vm1273_vm0 = vcmask 130048  }
   0xd   :  { %v3332_v5 = vld [vmem:[#allocation2 + $0x2e0] sm:$0xf]  ;;  %v4484_v6 = vld [vmem:[#allocation2 + $0x2ec] sm:$0xf0]  ;;  %v3205_v7 = vor.u32 %v4452_v4, %v3204_v2 }
   0xe   :  { %v3333_v8 = vor.u32 %v4484_v6, %v3332_v5  ;;  %v3460_v9 = vld [vmem:[#allocation2 + $0x3e0] sm:$0xf]  ;;  %v4516_v10 = vld [vmem:[#allocation2 + $0x3ec] sm:$0xf0]  ;;  %1277 = vmatpush.bf16.msra.mxu0 %v3077_v3 }
   0xf   :  { %v3060_v11 = vld [vmem:[#allocation2 + $0xc0] sm:$0xf]  ;;  %v3461_v12 = vor.u32 %v4516_v10, %v3460_v9  ;;  %v4416_v13 = vld [vmem:[#allocation2 + $0xcc] sm:$0xf0]  ;;  %1290 = vmatpush.bf16.msra.mxu1 %v3205_v7 }
  0x10   :  { %v3188_v14 = vld [vmem:[#allocation2 + $0x1c0] sm:$0xf]  ;;  %v4448_v15 = vld [vmem:[#allocation2 + $0x1cc] sm:$0xf0]  ;;  %1303 = vmatpush.bf16.msra.mxu2 %v3333_v8  ;;  %v3061_v16 = vor.u32 %v4416_v13, %v3060_v11 }
  0x11   :  { %v3189_v17 = vor.u32 %v4448_v15, %v3188_v14  ;;  %v3316_v18 = vld [vmem:[#allocation2 + $0x2c0] sm:$0xf]  ;;  %v4480_v19 = vld [vmem:[#allocation2 + $0x2cc] sm:$0xf0]  ;;  %1316 = vmatpush.bf16.msra.mxu3 %v3461_v12 }
  0x12   :  { %v3444_v20 = vld [vmem:[#allocation2 + $0x3c0] sm:$0xf]  ;;  %v3317_v21 = vor.u32 %v4480_v19, %v3316_v18  ;;  %v4512_v22 = vld [vmem:[#allocation2 + $0x3cc] sm:$0xf0]  ;;  %1278 = vmatpush.bf16.msra.mxu0 %v3061_v16 }
  0x13   :  { %v3044_v23 = vld [vmem:[#allocation2 + $0xa0] sm:$0xf]  ;;  %v4412_v24 = vld [vmem:[#allocation2 + $0xac] sm:$0xf0]  ;;  %v3445_v25 = vor.u32 %v4512_v22, %v3444_v20  ;;  %1291 = vmatpush.bf16.msra.mxu1 %v3189_v17 }
  0x14   :  { %v3172_v26 = vld [vmem:[#allocation2 + $0x1a0] sm:$0xf]  ;;  %v4444_v27 = vld [vmem:[#allocation2 + $0x1ac] sm:$0xf0]  ;;  %v3045_v29 = vor.u32 %v4412_v24, %v3044_v23  ;;  %1304 = vmatpush.bf16.msra.mxu2 %v3317_v21 }
  0x15   :  { %v3300_v28 = vld [vmem:[#allocation2 + $0x2a0] sm:$0xf]  ;;  %v4476_v30 = vld [vmem:[#allocation2 + $0x2ac] sm:$0xf0]  ;;  %v3173_v33 = vor.u32 %v4444_v27, %v3172_v26  ;;  %1317 = vmatpush.bf16.msra.mxu3 %v3445_v25  ;;  %v60_v25 = vld [vmem:[%s5106_s0 + $0x8] sm:$0xff] }
  0x16   :  { %v3428_v31 = vld [vmem:[#allocation2 + $0x3a0] sm:$0xf]  ;;  %v4508_v32 = vld [vmem:[#allocation2 + $0x3ac] sm:$0xf0]  ;;  %v3301_v34 = vor.u32 %v4476_v30, %v3300_v28  ;;  %1279 = vmatpush.bf16.msra.mxu0 %v3045_v29 }
  0x17   :  { %v3028_v35 = vld [vmem:[#allocation2 + $0x80] sm:$0xf]  ;;  %v4408_v36 = vld [vmem:[#allocation2 + $0x8c] sm:$0xf0]  ;;  %v3429_v38 = vor.u32 %v4508_v32, %v3428_v31  ;;  %1292 = vmatpush.bf16.msra.mxu1 %v3173_v33 }
  0x18   :  { %v3156_v37 = vld [vmem:[#allocation2 + $0x180] sm:$0xf]  ;;  %v4440_v39 = vld [vmem:[#allocation2 + $0x18c] sm:$0xf0]  ;;  %v3029_v44 = vor.u32 %v4408_v36, %v3028_v35  ;;  %1305 = vmatpush.bf16.msra.mxu2 %v3301_v34  ;;  %v4418_v34 = vld [vmem:[#allocation2 + $0xe4] sm:$0xf]  ;;  %v275_v36 = vunpack.c.l.b16 %v60_v25 }
  0x19   :  { %v3284_v40 = vld [vmem:[#allocation2 + $0x280] sm:$0xf]  ;;  %v4472_v41 = vld [vmem:[#allocation2 + $0x28c] sm:$0xf0]  ;;  %v3157_v45 = vor.u32 %v4440_v39, %v3156_v37  ;;  %1318 = vmatpush.bf16.msra.mxu3 %v3429_v38  ;;  %v3078_v35 = vld [vmem:[#allocation2 + $0xf0] sm:$0xf0] }
  0x1a   :  { %v3412_v42 = vld [vmem:[#allocation2 + $0x380] sm:$0xf]  ;;  %v4504_v43 = vld [vmem:[#allocation2 + $0x38c] sm:$0xf0]  ;;  %v3285_v46 = vor.u32 %v4472_v41, %v3284_v40  ;;  %1280 = vmatpush.bf16.msra.mxu0 %v3029_v44 }
  0x1b   :  { %v3012_v47 = vld [vmem:[#allocation2 + $0x60] sm:$0xf]  ;;  %v4404_v48 = vld [vmem:[#allocation2 + $0x6c] sm:$0xf0]  ;;  %v3413_v50 = vor.u32 %v4504_v43, %v3412_v42  ;;  %1293 = vmatpush.bf16.msra.mxu1 %v3157_v45  ;;  %v276_v42 = vunpack.c.h.b16 %v60_v25  ;;  %v4438_v25 = vld [vmem:[#allocation2 + $0x184] sm:$0xf] }
  0x1c   :  { %v3140_v49 = vld [vmem:[#allocation2 + $0x160] sm:$0xf]  ;;  %v4436_v51 = vld [vmem:[#allocation2 + $0x16c] sm:$0xf0]  ;;  %v3013_v56 = vor.u32 %v4404_v48, %v3012_v47  ;;  %1306 = vmatpush.bf16.msra.mxu2 %v3285_v46  ;;  %v4450_v46 = vld [vmem:[#allocation2 + $0x1e4] sm:$0xf] }
  0x1d   :  { %v3268_v52 = vld [vmem:[#allocation2 + $0x260] sm:$0xf]  ;;  %v4468_v53 = vld [vmem:[#allocation2 + $0x26c] sm:$0xf0]  ;;  %v3141_v57 = vor.u32 %v4436_v51, %v3140_v49  ;;  %1319 = vmatpush.bf16.msra.mxu3 %v3413_v50  ;;  %v3206_v47 = vld [vmem:[#allocation2 + $0x1f0] sm:$0xf0]  ;;  %v3081_v49 = vor.u32 %v4418_v34, %v3078_v35 }
  0x1e   :  { %v3396_v54 = vld [vmem:[#allocation2 + $0x360] sm:$0xf]  ;;  %v4500_v55 = vld [vmem:[#allocation2 + $0x36c] sm:$0xf0]  ;;  %v3269_v58 = vor.u32 %v4468_v53, %v3268_v52  ;;  %1281 = vmatpush.bf16.msra.mxu0 %v3013_v56  ;;  %v4859_v53 = vpack.c.b16 %v275_v36, %v275_v36  ;;  %v3062_v56 = vld [vmem:[#allocation2 + $0xd0] sm:$0xf0] }
  0x1f   :  { %v2996_v59 = vld [vmem:[#allocation2 + $0x40] sm:$0xf]  ;;  %v4400_v60 = vld [vmem:[#allocation2 + $0x4c] sm:$0xf0]  ;;  %v3397_v62 = vor.u32 %v4500_v55, %v3396_v54  ;;  %1294 = vmatpush.bf16.msra.mxu1 %v3141_v57  ;;  %v4414_v55 = vld [vmem:[#allocation2 + $0xc4] sm:$0xf] }
  0x20   :  { %v3124_v61 = vld [vmem:[#allocation2 + $0x140] sm:$0xf]  ;;  %v4432_v63 = vld [vmem:[#allocation2 + $0x14c] sm:$0xf0]  ;;  %v2997_v4 = vor.u32 %v4400_v60, %v2996_v59  ;;  %1307 = vmatpush.bf16.msra.mxu2 %v3269_v58  ;;  %v4863_v60 = vpack.c.b16 %v276_v42, %v276_v42  ;;  %v3014_v34 = vld [vmem:[#allocation2 + $0x70] sm:$0xf0] }
  0x21   :  { %v3252_v0 = vld [vmem:[#allocation2 + $0x240] sm:$0xf]  ;;  %v4464_v1 = vld [vmem:[#allocation2 + $0x24c] sm:$0xf0]  ;;  %v3125_v5 = vor.u32 %v4432_v63, %v3124_v61  ;;  %1320 = vmatpush.bf16.msra.mxu3 %v3397_v62  ;;  %v3209_v61 = vor.u32 %v4450_v46, %v3206_v47  ;;  %v4446_v63 = vld [vmem:[#allocation2 + $0x1c4] sm:$0xf] }
  0x22   :  { %v3380_v2 = vld [vmem:[#allocation2 + $0x340] sm:$0xf]  ;;  %v4496_v3 = vld [vmem:[#allocation2 + $0x34c] sm:$0xf0]  ;;  %v3253_v6 = vor.u32 %v4464_v1, %v3252_v0  ;;  %1282 = vmatpush.bf16.msra.mxu0 %v2997_v4  ;;  %v3190_v0 = vld [vmem:[#allocation2 + $0x1d0] sm:$0xf0] }
  0x23   :  { %v2980_v7 = vld [vmem:[#allocation2 + $0x20] sm:$0xf]  ;;  %v4396_v8 = vld [vmem:[#allocation2 + $0x2c] sm:$0xf0]  ;;  %v3381_v10 = vor.u32 %v4496_v3, %v3380_v2  ;;  %1295 = vmatpush.bf16.msra.mxu1 %v3125_v5  ;;  %v3065_v2 = vor.u32 %v4414_v55, %v3062_v56  ;;  %v4398_v46 = vld [vmem:[#allocation2 + $0x44] sm:$0xf] }
  0x24   :  { %v3108_v9 = vld [vmem:[#allocation2 + $0x120] sm:$0xf]  ;;  %v4428_v11 = vld [vmem:[#allocation2 + $0x12c] sm:$0xf0]  ;;  %v2981_v17 = vor.u32 %v4396_v8, %v2980_v7  ;;  %1308 = vmatpush.bf16.msra.mxu2 %v3253_v6  ;;  %v4410_v7 = vld [vmem:[#allocation2 + $0xa4] sm:$0xf] }
  0x25   :  { %v3236_v12 = vld [vmem:[#allocation2 + $0x220] sm:$0xf]  ;;  %v4460_v13 = vld [vmem:[#allocation2 + $0x22c] sm:$0xf0]  ;;  %v3109_v21 = vor.u32 %v4428_v11, %v3108_v9  ;;  %1321 = vmatpush.bf16.msra.mxu3 %v3381_v10  ;;  %v3046_v8 = vld [vmem:[#allocation2 + $0xb0] sm:$0xf0]  ;;  %v3193_v10 = vor.u32 %v4446_v63, %v3190_v0 }
  0x26   :  { %v3364_v14 = vld [vmem:[#allocation2 + $0x320] sm:$0xf]  ;;  %v4492_v15 = vld [vmem:[#allocation2 + $0x32c] sm:$0xf0]  ;;  %v3237_v22 = vor.u32 %v4460_v13, %v3236_v12  ;;  %1283 = vmatpush.bf16.msra.mxu0 %v2981_v17  ;;  %v4442_v12 = vld [vmem:[#allocation2 + $0x1a4] sm:$0xf] }
  0x27   :  { %v2964_v16 = vld [vmem:[#allocation2] sm:$0xf]  ;;  %v4392_v18 = vld [vmem:[#allocation2 + $0xc] sm:$0xf0]  ;;  %v3365_v26 = vor.u32 %v4492_v15, %v3364_v14  ;;  %1296 = vmatpush.bf16.msra.mxu1 %v3109_v21  ;;  %v3174_v13 = vld [vmem:[#allocation2 + $0x1b0] sm:$0xf0]  ;;  %v3049_v15 = vor.u32 %v4410_v7, %v3046_v8 }
  0x28   :  { %v3092_v19 = vld [vmem:[#allocation2 + $0x100] sm:$0xf]  ;;  %v4424_v20 = vld [vmem:[#allocation2 + $0x10c] sm:$0xf0]  ;;  %v2965_v33 = vor.u32 %v4392_v18, %v2964_v16  ;;  %1309 = vmatpush.bf16.msra.mxu2 %v3237_v22  ;;  %v3030_v21 = vld [vmem:[#allocation2 + $0x90] sm:$0xf0] }
  0x29   :  { %v3220_v23 = vld [vmem:[#allocation2 + $0x200] sm:$0xf]  ;;  %v4456_v24 = vld [vmem:[#allocation2 + $0x20c] sm:$0xf0]  ;;  %v3093_v38 = vor.u32 %v4424_v20, %v3092_v19  ;;  %1322 = vmatpush.bf16.msra.mxu3 %v3365_v26  ;;  %v4406_v20 = vld [vmem:[#allocation2 + $0x84] sm:$0xf] }
  0x2a   :  { %v3348_v27 = vld [vmem:[#allocation2 + $0x300] sm:$0xf]  ;;  %v4488_v28 = vld [vmem:[#allocation2 + $0x30c] sm:$0xf0]  ;;  %v3221_v39 = vor.u32 %v4456_v24, %v3220_v23  ;;  %1284 = vmatpush.bf16.msra.mxu0 %v2965_v33  ;;  %v62_v22 = vld [vmem:[%s5106_s0 + $0x18] sm:$0xf]  ;;  %v3177_v23 = vor.u32 %v4442_v12, %v3174_v13 }
  0x2b   :  { %v3588_v29 = vld [vmem:[#allocation2 + $0x4e0] sm:$0xf]  ;;  %v4548_v30 = vld [vmem:[#allocation2 + $0x4ec] sm:$0xf0]  ;;  %v3349_v43 = vor.u32 %v4488_v28, %v3348_v27  ;;  %1297 = vmatpush.bf16.msra.mxu1 %v3093_v38  ;;  %v3158_v26 = vld [vmem:[#allocation2 + $0x190] sm:$0xf0]  ;;  %v3033_v28 = vor.u32 %v4406_v20, %v3030_v21  ;;  %v279_v35 = vunpack.c.l.b16 %v62_v22 }
  0x2c   :  { %v3716_v31 = vld [vmem:[#allocation2 + $0x5e0] sm:$0xf]  ;;  %v4580_v32 = vld [vmem:[#allocation2 + $0x5ec] sm:$0xf0]  ;;  %v3589_v44 = vor.u32 %v4548_v30, %v3588_v29  ;;  %1310 = vmatpush.bf16.msra.mxu2 %v3221_v39  ;;  %v4402_v33 = vld [vmem:[#allocation2 + $0x64] sm:$0xf]  ;;  %v3161_v36 = vor.u32 %v4438_v25, %v3158_v26 }
  0x2d   :  { %v59_v37 = vld [vmem:[%s5106_s0] sm:$0xff]  ;;  %v4584_v45 = vld [vmem:[#allocation2 + $0x60c] sm:$0xf0]  ;;  %v3717_v48 = vor.u32 %v4580_v32, %v3716_v31  ;;  %1323 = vmatpush.bf16.msra.mxu3 %v3349_v43  ;;  %v3142_v39 = vld [vmem:[#allocation2 + $0x170] sm:$0xf0] }
  0x2e   :  { %v3732_v40 = vld [vmem:[#allocation2 + $0x600] sm:$0xf]  ;;  %v273_v41 = vunpack.c.l.b16 %v59_v37  ;;  %v4544_v51 = vld [vmem:[#allocation2 + $0x4cc] sm:$0xf0]  ;;  %v274_v58 = vunpack.c.h.b16 %v59_v37  ;;  %1329 = vmatpush.bf16.msrb.mxu0 %v3589_v44  ;;  %v4434_v38 = vld [vmem:[#allocation2 + $0x164] sm:$0xf] }
  0x2f   :  { %v3572_v50 = vld [vmem:[#allocation2 + $0x4c0] sm:$0xf]  ;;  %v4576_v54 = vld [vmem:[#allocation2 + $0x5cc] sm:$0xf0]  ;;  %v3733_v59 = vor.u32 %v4584_v45, %v3732_v40  ;;  %1342 = vmatpush.bf16.msrb.mxu1 %v3717_v48  ;;  %1311 = vmatmul.bf16.vlgmr.msra.gmra.mxu2 %v4859_v53  ;;  %v2998_v47 = vld [vmem:[#allocation2 + $0x50] sm:$0xf0]  ;;  %v4874_v48 = vpack.c.b16 %v279_v35, %v279_v35 }
  0x30   :  { %v3700_v52 = vld [vmem:[#allocation2 + $0x5c0] sm:$0xf]  ;;  %v4861_v57 = vpack.c.b16 %v273_v41, %v273_v41  ;;  %v3573_v62 = vor.u32 %v4544_v51, %v3572_v50  ;;  %v4540_v4 = vld [vmem:[#allocation2 + $0x4ac] sm:$0xf0]  ;;  %v4867_v9 = vpack.c.b16 %v274_v58, %v274_v58  ;;  %1324 = vmatmul.bf16.vlgmr.msra.gmra.mxu3 %v4863_v60  ;;  %v3017_v41 = vor.u32 %v4402_v33, %v3014_v34  ;;  %v4430_v51 = vld [vmem:[#allocation2 + $0x144] sm:$0xf] }
  0x31   :  { %1368 = vmatpush.bf16.msrb.mxu3 %v3081_v49  ;;  %v3701_v1 = vor.u32 %v4576_v54, %v3700_v52  ;;  %v3556_v3 = vld [vmem:[#allocation2 + $0x4a0] sm:$0xf]  ;;  %v4572_v6 = vld [vmem:[#allocation2 + $0x5ac] sm:$0xf0]  ;;  %1362 = vmatpush.bf16.msrb.mxu2 %v3733_v59  ;;  %v3145_v49 = vor.u32 %v4434_v38, %v3142_v39  ;;  %v3126_v52 = vld [vmem:[#allocation2 + $0x150] sm:$0xf0]  ;;  %v3001_v55 = vor.u32 %v4398_v46, %v2998_v47 }
  0x32   :  { %v3684_v5 = vld [vmem:[#allocation2 + $0x5a0] sm:$0xf]  ;;  %1285 = vmatmul.bf16.vlgmr.msra.gmra.mxu0 %v4861_v57  ;;  %v3557_v11 = vor.u32 %v4540_v4, %v3556_v3  ;;  %v4536_v17 = vld [vmem:[#allocation2 + $0x48c] sm:$0xf0]  ;;  %1298 = vmatmul.bf16.vlgmr.msra.gmra.mxu1 %v4867_v9  ;;  %v2982_v63 = vld [vmem:[#allocation2 + $0x30] sm:$0xf0] }
  0x33   :  { %1330 = vmatpush.bf16.msrb.mxu0 %v3573_v62  ;;  %1343 = vmatpush.bf16.msrb.mxu1 %v3701_v1  ;;  %v3685_v14 = vor.u32 %v4572_v6, %v3684_v5  ;;  %v3540_v16 = vld [vmem:[#allocation2 + $0x480] sm:$0xf]  ;;  %v4568_v19 = vld [vmem:[#allocation2 + $0x58c] sm:$0xf0]  ;;  %v4394_v62 = vld [vmem:[#allocation2 + $0x24] sm:$0xf]  ;;  %v3129_v1 = vor.u32 %v4430_v51, %v3126_v52 }
  0x34   :  { %v3668_v18 = vld [vmem:[#allocation2 + $0x580] sm:$0xf]  ;;  %v3541_v24 = vor.u32 %v4536_v17, %v3540_v16  ;;  %v4532_v30 = vld [vmem:[#allocation2 + $0x46c] sm:$0xf0]  ;;  %v4426_v0 = vld [vmem:[#allocation2 + $0x124] sm:$0xf]  ;;  %v2985_v7 = vor.u32 %v4394_v62, %v2982_v63 }
  0x35   :  { %1381 = vmatpush.bf16.msra.mxu2 %v3209_v61  ;;  %1369 = vmatpush.bf16.msrb.mxu3 %v3065_v2  ;;  %v3669_v27 = vor.u32 %v4568_v19, %v3668_v18  ;;  %v3524_v29 = vld [vmem:[#allocation2 + $0x460] sm:$0xf]  ;;  %v4564_v32 = vld [vmem:[#allocation2 + $0x56c] sm:$0xf0]  ;;  %v3110_v3 = vld [vmem:[#allocation2 + $0x130] sm:$0xf0] }
  0x36   :  { %v3652_v31 = vld [vmem:[#allocation2 + $0x560] sm:$0xf]  ;;  %v3525_v37 = vor.u32 %v4532_v30, %v3524_v29  ;;  %v4528_v43 = vld [vmem:[#allocation2 + $0x44c] sm:$0xf0]  ;;  %v4390_v12 = vld [vmem:[#allocation2 + $0x4] sm:$0xf]  ;;  %v3113_v19 = vor.u32 %v4426_v0, %v3110_v3 }
  0x37   :  { %1331 = vmatpush.bf16.msrb.mxu0 %v3557_v11  ;;  %1344 = vmatpush.bf16.msrb.mxu1 %v3685_v14  ;;  %v3653_v40 = vor.u32 %v4564_v32, %v3652_v31  ;;  %v3508_v42 = vld [vmem:[#allocation2 + $0x440] sm:$0xf]  ;;  %v4560_v45 = vld [vmem:[#allocation2 + $0x54c] sm:$0xf0]  ;;  %v2966_v13 = vld [vmem:[#allocation2 + $0x10] sm:$0xf0] }
  0x38   :  { %v3636_v44 = vld [vmem:[#allocation2 + $0x540] sm:$0xf]  ;;  %v3509_v50 = vor.u32 %v4528_v43, %v3508_v42  ;;  %v4524_v58 = vld [vmem:[#allocation2 + $0x42c] sm:$0xf0]  ;;  %v4482_v14 = vld [vmem:[#allocation2 + $0x2e4] sm:$0xf]  ;;  %v2969_v25 = vor.u32 %v4390_v12, %v2966_v13 }
  0x39   :  { %1382 = vmatpush.bf16.msra.mxu2 %v3193_v10  ;;  %1370 = vmatpush.bf16.msrb.mxu3 %v3049_v15  ;;  %v3637_v54 = vor.u32 %v4560_v45, %v3636_v44  ;;  %v3492_v56 = vld [vmem:[#allocation2 + $0x420] sm:$0xf]  ;;  %v4556_v61 = vld [vmem:[#allocation2 + $0x52c] sm:$0xf0]  ;;  %v3334_v15 = vld [vmem:[#allocation2 + $0x2f0] sm:$0xf0] }
  0x3a   :  { %v3620_v59 = vld [vmem:[#allocation2 + $0x520] sm:$0xf]  ;;  %v3493_v2 = vor.u32 %v4524_v58, %v3492_v56  ;;  %v61_v5 = vld [vmem:[%s5106_s0 + $0x10] sm:$0xff]  ;;  %v4514_v16 = vld [vmem:[#allocation2 + $0x3e4] sm:$0xf] }
  0x3b   :  { %1332 = vmatpush.bf16.msrb.mxu0 %v3541_v24  ;;  %1345 = vmatpush.bf16.msrb.mxu1 %v3669_v27  ;;  %v3476_v4 = vld [vmem:[#allocation2 + $0x400] sm:$0xf]  ;;  %v3621_v6 = vor.u32 %v4556_v61, %v3620_v59  ;;  %v4520_v8 = vld [vmem:[#allocation2 + $0x40c] sm:$0xf0]  ;;  %v3462_v17 = vld [vmem:[#allocation2 + $0x3f0] sm:$0xf0]  ;;  %v277_v18 = vunpack.c.l.b16 %v61_v5 }
  0x3c   :  { %v3604_v10 = vld [vmem:[#allocation2 + $0x500] sm:$0xf]  ;;  %v4552_v11 = vld [vmem:[#allocation2 + $0x50c] sm:$0xf0]  ;;  %v3477_v20 = vor.u32 %v4520_v8, %v3476_v4  ;;  %v4546_v21 = vld [vmem:[#allocation2 + $0x4e4] sm:$0xf]  ;;  %v3465_v29 = vor.u32 %v4514_v16, %v3462_v17 }
  0x3d   :  { %1383 = vmatpush.bf16.msra.mxu2 %v3177_v23  ;;  %1371 = vmatpush.bf16.msrb.mxu3 %v3033_v28  ;;  %v3590_v22 = vld [vmem:[#allocation2 + $0x4f0] sm:$0xf0]  ;;  %v278_v23 = vunpack.c.h.b16 %v61_v5  ;;  %v3605_v24 = vor.u32 %v4552_v11, %v3604_v10  ;;  %v4422_v26 = vld [vmem:[#allocation2 + $0x104] sm:$0xf]  ;;  %v3337_v28 = vor.u32 %v4482_v14, %v3334_v15  ;;  %v4881_v34 = vpack.c.b16 %v277_v18, %v277_v18 }
  0x3e   :  { %v3094_v27 = vld [vmem:[#allocation2 + $0x110] sm:$0xf0]  ;;  %v4578_v30 = vld [vmem:[#allocation2 + $0x5e4] sm:$0xf]  ;;  %v3593_v33 = vor.u32 %v4546_v21, %v3590_v22 }
  0x3f   :  { %1333 = vmatpush.bf16.msrb.mxu0 %v3525_v37  ;;  %1346 = vmatpush.bf16.msrb.mxu1 %v3653_v40  ;;  %v3718_v31 = vld [vmem:[#allocation2 + $0x5f0] sm:$0xf0]  ;;  %v4478_v32 = vld [vmem:[#allocation2 + $0x2c4] sm:$0xf]  ;;  %v3097_v38 = vor.u32 %v4422_v26, %v3094_v27  ;;  %v4883_v39 = vpack.c.b16 %v278_v23, %v278_v23 }
  0x40   :  { %3746 = vmatmul.msk.bf16.vlgmr.msrb.gmra.mxu2 %vm1273_vm0, %v4874_v48  ;;  %v3318_v35 = vld [vmem:[#allocation2 + $0x2d0] sm:$0xf0]  ;;  %v4542_v40 = vld [vmem:[#allocation2 + $0x4c4] sm:$0xf]  ;;  %v3721_v42 = vor.u32 %v4578_v30, %v3718_v31 }
  0x41   :  { %1384 = vmatpush.bf16.msra.mxu2 %v3161_v36  ;;  %1372 = vmatpush.bf16.msrb.mxu3 %v3017_v41  ;;  %v4510_v36 = vld [vmem:[#allocation2 + $0x3c4] sm:$0xf]  ;;  %v3446_v37 = vld [vmem:[#allocation2 + $0x3d0] sm:$0xf0]  ;;  %v3321_v43 = vor.u32 %v4478_v32, %v3318_v35 }
  0x42   :  { %v3574_v41 = vld [vmem:[#allocation2 + $0x4d0] sm:$0xf0]  ;;  %v3449_v44 = vor.u32 %v4510_v36, %v3446_v37  ;;  %v4574_v45 = vld [vmem:[#allocation2 + $0x5c4] sm:$0xf] }
  0x43   :  { %1334 = vmatpush.bf16.msrb.mxu0 %v3509_v50  ;;  %1347 = vmatpush.bf16.msrb.mxu1 %v3637_v54  ;;  %v3702_v46 = vld [vmem:[#allocation2 + $0x5d0] sm:$0xf0]  ;;  %v4474_v47 = vld [vmem:[#allocation2 + $0x2a4] sm:$0xf] }
  0x44   :  { %v3302_v50 = vld [vmem:[#allocation2 + $0x2b0] sm:$0xf0]  ;;  %v4506_v51 = vld [vmem:[#allocation2 + $0x3a4] sm:$0xf]  ;;  %v3705_v56 = vor.u32 %v4574_v45, %v3702_v46 }
  0x45   :  { %1385 = vmatpush.bf16.msra.mxu2 %v3145_v49  ;;  %1373 = vmatpush.bf16.msrb.mxu3 %v3001_v55  ;;  %v3577_v49 = vor.u32 %v4542_v40, %v3574_v41  ;;  %v3430_v52 = vld [vmem:[#allocation2 + $0x3b0] sm:$0xf0]  ;;  %v4538_v54 = vld [vmem:[#allocation2 + $0x4a4] sm:$0xf]  ;;  %v3305_v58 = vor.u32 %v4474_v47, %v3302_v50 }
  0x46   :  { %v3558_v55 = vld [vmem:[#allocation2 + $0x4b0] sm:$0xf0]  ;;  %v3433_v59 = vor.u32 %v4506_v51, %v3430_v52  ;;  %v4570_v61 = vld [vmem:[#allocation2 + $0x5a4] sm:$0xf] }
  0x47   :  { %1335 = vmatpush.bf16.msrb.mxu0 %v3493_v2  ;;  %1348 = vmatpush.bf16.msrb.mxu1 %v3621_v6  ;;  %v3686_v62 = vld [vmem:[#allocation2 + $0x5b0] sm:$0xf0]  ;;  %v4470_v63 = vld [vmem:[#allocation2 + $0x284] sm:$0xf]  ;;  %v3561_v0 = vor.u32 %v4538_v54, %v3558_v55 }
  0x48   :  { %v4502_v2 = vld [vmem:[#allocation2 + $0x384] sm:$0xf]  ;;  %v3414_v3 = vld [vmem:[#allocation2 + $0x390] sm:$0xf0]  ;;  %v3689_v6 = vor.u32 %v4570_v61, %v3686_v62  ;;  %v3084_v61 = vld [vmem:[#allocation2 + $0xe8] sm:$0xf] }
  0x49   :  { %1386 = vmatpush.bf16.msra.mxu2 %v3129_v1  ;;  %1374 = vmatpush.bf16.msrb.mxu3 %v2985_v7  ;;  %v3286_v1 = vld [vmem:[#allocation2 + $0x290] sm:$0xf0]  ;;  %v4534_v4 = vld [vmem:[#allocation2 + $0x484] sm:$0xf]  ;;  %v3417_v8 = vor.u32 %v4502_v2, %v3414_v3  ;;  %v4421_v62 = vld [vmem:[#allocation2 + $0xf4] sm:$0xf0] }
  0x4a   :  { %v3542_v5 = vld [vmem:[#allocation2 + $0x490] sm:$0xf0]  ;;  %v3289_v7 = vor.u32 %v4470_v63, %v3286_v1  ;;  %v4566_v10 = vld [vmem:[#allocation2 + $0x584] sm:$0xf]  ;;  %v3340_v2 = vld [vmem:[#allocation2 + $0x2e8] sm:$0xf] }
  0x4b   :  { %1336 = vmatpush.bf16.msrb.mxu0 %v3477_v20  ;;  %1349 = vmatpush.bf16.msrb.mxu1 %v3605_v24  ;;  %v3670_v11 = vld [vmem:[#allocation2 + $0x590] sm:$0xf0]  ;;  %v4466_v12 = vld [vmem:[#allocation2 + $0x264] sm:$0xf]  ;;  %v3545_v13 = vor.u32 %v4534_v4, %v3542_v5  ;;  %v4485_v3 = vld [vmem:[#allocation2 + $0x2f4] sm:$0xf0] }
  0x4c   :  { %v3270_v14 = vld [vmem:[#allocation2 + $0x270] sm:$0xf0]  ;;  %v4498_v15 = vld [vmem:[#allocation2 + $0x364] sm:$0xf] }
  0x4d   :  { %1387 = vmatpush.bf16.msra.mxu2 %v3113_v19  ;;  %1375 = vmatpush.bf16.msrb.mxu3 %v2969_v25  ;;  %v3398_v16 = vld [vmem:[#allocation2 + $0x370] sm:$0xf0]  ;;  %v4530_v17 = vld [vmem:[#allocation2 + $0x464] sm:$0xf]  ;;  %v3673_v19 = vor.u32 %v4566_v10, %v3670_v11  ;;  %v3273_v20 = vor.u32 %v4466_v12, %v3270_v14  ;;  %v3085_v10 = vor.u32 %v4421_v62, %v3084_v61  ;;  %v3468_v11 = vld [vmem:[#allocation2 + $0x3e8] sm:$0xf] }
  0x4e   :  { %1337 = vmatmul.bf16.vlgmr.msrb.gmra.mxu0 %v4881_v34  ;;  %1350 = vmatmul.bf16.vlgmr.msrb.gmra.mxu1 %v4883_v39  ;;  %v3526_v18 = vld [vmem:[#allocation2 + $0x470] sm:$0xf0]  ;;  %v3401_v21 = vor.u32 %v4498_v15, %v3398_v16  ;;  %v4562_v22 = vld [vmem:[#allocation2 + $0x564] sm:$0xf]  ;;  %v4517_v12 = vld [vmem:[#allocation2 + $0x3f4] sm:$0xf0]  ;;  %v3341_v16 = vor.u32 %v4485_v3, %v3340_v2 }
  0x4f   :  { %1394 = vmatpush.bf16.msra.mxu0 %v3337_v28  ;;  %1407 = vmatpush.bf16.msra.mxu1 %v3465_v29  ;;  %v3654_v23 = vld [vmem:[#allocation2 + $0x570] sm:$0xf0]  ;;  %v4462_v24 = vld [vmem:[#allocation2 + $0x244] sm:$0xf]  ;;  %v3529_v25 = vor.u32 %v4530_v17, %v3526_v18  ;;  %v3212_v14 = vld [vmem:[#allocation2 + $0x1e8] sm:$0xf] }
  0x50   :  { %1376 = vmatmul.bf16.vlgmr.msrb.gmra.mxu3 %v4861_v57  ;;  %v3254_v26 = vld [vmem:[#allocation2 + $0x250] sm:$0xf0]  ;;  %v4494_v27 = vld [vmem:[#allocation2 + $0x344] sm:$0xf]  ;;  %v3657_v31 = vor.u32 %v4562_v22, %v3654_v23  ;;  %v4453_v15 = vld [vmem:[#allocation2 + $0x1f4] sm:$0xf0] }
  0x51   :  { %1420 = vmatpush.bf16.msra.mxu3 %v3593_v33  ;;  %1388 = vmatpush.bf16.msra.mxu2 %v3097_v38  ;;  %v3382_v28 = vld [vmem:[#allocation2 + $0x350] sm:$0xf0]  ;;  %v4526_v29 = vld [vmem:[#allocation2 + $0x444] sm:$0xf]  ;;  %v3257_v33 = vor.u32 %v4462_v24, %v3254_v26  ;;  %v3068_v18 = vld [vmem:[#allocation2 + $0xc8] sm:$0xf]  ;;  %v3213_v23 = vor.u32 %v4453_v15, %v3212_v14 }
  0x52   :  { %v3510_v30 = vld [vmem:[#allocation2 + $0x450] sm:$0xf0]  ;;  %v4558_v32 = vld [vmem:[#allocation2 + $0x544] sm:$0xf]  ;;  %v3385_v35 = vor.u32 %v4494_v27, %v3382_v28  ;;  %v4481_v22 = vld [vmem:[#allocation2 + $0x2d4] sm:$0xf0] }
  0x53   :  { %1395 = vmatpush.bf16.msra.mxu0 %v3321_v43  ;;  %1408 = vmatpush.bf16.msra.mxu1 %v3449_v44  ;;  %v3638_v36 = vld [vmem:[#allocation2 + $0x550] sm:$0xf0]  ;;  %v4458_v37 = vld [vmem:[#allocation2 + $0x224] sm:$0xf]  ;;  %v3513_v40 = vor.u32 %v4526_v29, %v3510_v30  ;;  %v3452_v24 = vld [vmem:[#allocation2 + $0x3c8] sm:$0xf] }
  0x54   :  { %1389 = vmatmul.bf16.vlgmr.msra.gmra.mxu2 %v4867_v9  ;;  %v3238_v38 = vld [vmem:[#allocation2 + $0x230] sm:$0xf0]  ;;  %v4490_v41 = vld [vmem:[#allocation2 + $0x324] sm:$0xf]  ;;  %v3641_v45 = vor.u32 %v4558_v32, %v3638_v36  ;;  %v3196_v27 = vld [vmem:[#allocation2 + $0x1c8] sm:$0xf] }
  0x55   :  { %1433 = vmatpush.bf16.msrb.mxu2 %v3721_v42  ;;  %1421 = vmatpush.bf16.msra.mxu3 %v3577_v49  ;;  %v3366_v42 = vld [vmem:[#allocation2 + $0x330] sm:$0xf0]  ;;  %v4522_v43 = vld [vmem:[#allocation2 + $0x424] sm:$0xf]  ;;  %v3241_v49 = vor.u32 %v4458_v37, %v3238_v38  ;;  %v4449_v28 = vld [vmem:[#allocation2 + $0x1d4] sm:$0xf0] }
  0x56   :  { %v3494_v44 = vld [vmem:[#allocation2 + $0x430] sm:$0xf0]  ;;  %v4554_v46 = vld [vmem:[#allocation2 + $0x524] sm:$0xf]  ;;  %v3369_v50 = vor.u32 %v4490_v41, %v3366_v42  ;;  %v3052_v30 = vld [vmem:[#allocation2 + $0xa8] sm:$0xf]  ;;  %v3197_v36 = vor.u32 %v4449_v28, %v3196_v27 }
  0x57   :  { %1396 = vmatpush.bf16.msra.mxu0 %v3305_v58  ;;  %1409 = vmatpush.bf16.msra.mxu1 %v3433_v59  ;;  %v3622_v47 = vld [vmem:[#allocation2 + $0x530] sm:$0xf0]  ;;  %v4454_v51 = vld [vmem:[#allocation2 + $0x204] sm:$0xf]  ;;  %v3497_v55 = vor.u32 %v4522_v43, %v3494_v44  ;;  %v3436_v37 = vld [vmem:[#allocation2 + $0x3a8] sm:$0xf] }
  0x58   :  { %v3222_v52 = vld [vmem:[#allocation2 + $0x210] sm:$0xf0]  ;;  %v4486_v54 = vld [vmem:[#allocation2 + $0x304] sm:$0xf]  ;;  %v4509_v38 = vld [vmem:[#allocation2 + $0x3b4] sm:$0xf0] }
  0x59   :  { %1434 = vmatpush.bf16.msrb.mxu2 %v3705_v56  ;;  %1422 = vmatpush.bf16.msra.mxu3 %v3561_v0  ;;  %v3350_v56 = vld [vmem:[#allocation2 + $0x310] sm:$0xf0]  ;;  %v4518_v58 = vld [vmem:[#allocation2 + $0x404] sm:$0xf]  ;;  %v3625_v0 = vor.u32 %v4554_v46, %v3622_v47  ;;  %v3225_v4 = vor.u32 %v4454_v51, %v3222_v52  ;;  %v3180_v41 = vld [vmem:[#allocation2 + $0x1a8] sm:$0xf]  ;;  %v3437_v46 = vor.u32 %v4509_v38, %v3436_v37 }
  0x5a   :  { %v3478_v59 = vld [vmem:[#allocation2 + $0x410] sm:$0xf0]  ;;  %v4582_v63 = vld [vmem:[#allocation2 + $0x604] sm:$0xf]  ;;  %v3353_v5 = vor.u32 %v4486_v54, %v3350_v56  ;;  %v4445_v42 = vld [vmem:[#allocation2 + $0x1b4] sm:$0xf0] }
  0x5b   :  { %1397 = vmatpush.bf16.msra.mxu0 %v3289_v7  ;;  %1410 = vmatpush.bf16.msra.mxu1 %v3417_v8  ;;  %v3734_v1 = vld [vmem:[#allocation2 + $0x610] sm:$0xf0]  ;;  %v3481_v8 = vor.u32 %v4518_v58, %v3478_v59  ;;  %v3036_v44 = vld [vmem:[#allocation2 + $0x88] sm:$0xf]  ;;  %v4505_v52 = vld [vmem:[#allocation2 + $0x394] sm:$0xf0] }
  0x5c   :  { %v3606_v7 = vld [vmem:[#allocation2 + $0x510] sm:$0xf0]  ;;  %v3292_v47 = vld [vmem:[#allocation2 + $0x288] sm:$0xf]  ;;  %v4441_v56 = vld [vmem:[#allocation2 + $0x194] sm:$0xf0] }
  0x5d   :  { %1435 = vmatpush.bf16.msrb.mxu2 %v3689_v6  ;;  %1423 = vmatpush.bf16.msra.mxu3 %v3545_v13  ;;  %v4550_v6 = vld [vmem:[#allocation2 + $0x504] sm:$0xf]  ;;  %v3737_v13 = vor.u32 %v4582_v63, %v3734_v1  ;;  %v3420_v51 = vld [vmem:[#allocation2 + $0x388] sm:$0xf]  ;;  %v4405_v61 = vld [vmem:[#allocation2 + $0x74] sm:$0xf0] }
  0x5e   :  { %v3609_v17 = vor.u32 %v4550_v6, %v3606_v7  ;;  %v3020_v59 = vld [vmem:[#allocation2 + $0x68] sm:$0xf]  ;;  %v3421_v62 = vor.u32 %v4505_v52, %v3420_v51  ;;  %v4501_v3 = vld [vmem:[#allocation2 + $0x374] sm:$0xf0]  ;;  %v4419_v51 = vld [vmem:[#allocation2 + $0xec] sm:$0xf] }
  0x5f   :  { %1398 = vmatpush.bf16.msra.mxu0 %v3273_v20  ;;  %1411 = vmatpush.bf16.msra.mxu1 %v3401_v21  ;;  %v3469_v20 = vor.u32 %v4517_v12, %v3468_v11  ;;  %v3324_v21 = vld [vmem:[#allocation2 + $0x2c8] sm:$0xf]  ;;  %v4437_v6 = vld [vmem:[#allocation2 + $0x174] sm:$0xf0]  ;;  %v3086_v52 = vld [vmem:[#allocation2 + $0xf8] sm:$0xf0] }
  0x60   :  { %v3325_v29 = vor.u32 %v4481_v22, %v3324_v21  ;;  %v3276_v63 = vld [vmem:[#allocation2 + $0x268] sm:$0xf]  ;;  %v4397_v22 = vld [vmem:[#allocation2 + $0x34] sm:$0xf0] }
  0x61   :  { %1436 = vmatpush.bf16.msrb.mxu2 %v3673_v19  ;;  %1424 = vmatpush.bf16.msra.mxu3 %v3529_v25  ;;  %v4417_v19 = vld [vmem:[#allocation2 + $0xd4] sm:$0xf0]  ;;  %v3404_v2 = vld [vmem:[#allocation2 + $0x368] sm:$0xf] }
  0x62   :  { %v4513_v25 = vld [vmem:[#allocation2 + $0x3d4] sm:$0xf0]  ;;  %v3069_v26 = vor.u32 %v4417_v19, %v3068_v18  ;;  %v3405_v11 = vor.u32 %v4501_v3, %v3404_v2  ;;  %v3260_v12 = vld [vmem:[#allocation2 + $0x248] sm:$0xf]  ;;  %v3089_v3 = vor.u32 %v4419_v51, %v3086_v52 }
  0x63   :  { %1399 = vmatpush.bf16.msra.mxu0 %v3257_v33  ;;  %1412 = vmatpush.bf16.msra.mxu1 %v3385_v35  ;;  %v3453_v32 = vor.u32 %v4513_v25, %v3452_v24  ;;  %v3308_v33 = vld [vmem:[#allocation2 + $0x2a8] sm:$0xf]  ;;  %v4477_v35 = vld [vmem:[#allocation2 + $0x2b4] sm:$0xf0] }
  0x64   :  { %v3309_v43 = vor.u32 %v4477_v35, %v3308_v33  ;;  %v3388_v15 = vld [vmem:[#allocation2 + $0x348] sm:$0xf]  ;;  %v4433_v19 = vld [vmem:[#allocation2 + $0x154] sm:$0xf0] }
  0x65   :  { %1437 = vmatpush.bf16.msrb.mxu2 %v3657_v31  ;;  %1425 = vmatpush.bf16.msra.mxu3 %v3513_v40  ;;  %v4413_v31 = vld [vmem:[#allocation2 + $0xb4] sm:$0xf0]  ;;  %v3132_v18 = vld [vmem:[#allocation2 + $0x148] sm:$0xf] }
  0x66   :  { %v3053_v40 = vor.u32 %v4413_v31, %v3052_v30  ;;  %v2988_v21 = vld [vmem:[#allocation2 + $0x28] sm:$0xf]  ;;  %v4461_v25 = vld [vmem:[#allocation2 + $0x234] sm:$0xf0] }
  0x67   :  { %1400 = vmatpush.bf16.msra.mxu0 %v3241_v49  ;;  %1413 = vmatpush.bf16.msra.mxu1 %v3369_v50  ;;  %v4473_v49 = vld [vmem:[#allocation2 + $0x294] sm:$0xf0]  ;;  %v3181_v50 = vor.u32 %v4445_v42, %v3180_v41  ;;  %v3244_v24 = vld [vmem:[#allocation2 + $0x228] sm:$0xf] }
  0x68   :  { %v3293_v58 = vor.u32 %v4473_v49, %v3292_v47  ;;  %v3372_v27 = vld [vmem:[#allocation2 + $0x328] sm:$0xf]  ;;  %v4493_v28 = vld [vmem:[#allocation2 + $0x334] sm:$0xf0]  ;;  %v3245_v33 = vor.u32 %v4461_v25, %v3244_v24 }
  0x69   :  { %1438 = vmatpush.bf16.msrb.mxu2 %v3641_v45  ;;  %1426 = vmatpush.bf16.msra.mxu3 %v3497_v55  ;;  %v4409_v45 = vld [vmem:[#allocation2 + $0x94] sm:$0xf0]  ;;  %v3164_v55 = vld [vmem:[#allocation2 + $0x188] sm:$0xf]  ;;  %v3373_v38 = vor.u32 %v4493_v28, %v3372_v27  ;;  %v3182_v27 = vld [vmem:[#allocation2 + $0x1b8] sm:$0xf0] }
  0x6a   :  { %v3037_v54 = vor.u32 %v4409_v45, %v3036_v44  ;;  %v3165_v1 = vor.u32 %v4441_v56, %v3164_v55  ;;  %v3116_v30 = vld [vmem:[#allocation2 + $0x128] sm:$0xf]  ;;  %v4429_v31 = vld [vmem:[#allocation2 + $0x134] sm:$0xf0] }
  0x6b   :  { %1401 = vmatpush.bf16.msra.mxu0 %v3225_v4  ;;  %1414 = vmatpush.bf16.msra.mxu1 %v3353_v5  ;;  %v3021_v4 = vor.u32 %v4405_v61, %v3020_v59  ;;  %v3148_v5 = vld [vmem:[#allocation2 + $0x168] sm:$0xf]  ;;  %v4393_v35 = vld [vmem:[#allocation2 + $0x14] sm:$0xf0]  ;;  %v3117_v44 = vor.u32 %v4429_v31, %v3116_v30  ;;  %v4407_v30 = vld [vmem:[#allocation2 + $0x8c] sm:$0xf] }
  0x6c   :  { %v3149_v14 = vor.u32 %v4437_v6, %v3148_v5  ;;  %v4549_v37 = vld [vmem:[#allocation2 + $0x4f4] sm:$0xf0]  ;;  %v3228_v41 = vld [vmem:[#allocation2 + $0x208] sm:$0xf]  ;;  %v4415_v5 = vld [vmem:[#allocation2 + $0xcc] sm:$0xf] }
  0x6d   :  { %1439 = vmatpush.bf16.msrb.mxu2 %v3625_v0  ;;  %1427 = vmatpush.bf16.msra.mxu3 %v3481_v8  ;;  %v4469_v0 = vld [vmem:[#allocation2 + $0x274] sm:$0xf0]  ;;  %v3004_v8 = vld [vmem:[#allocation2 + $0x48] sm:$0xf]  ;;  %v3070_v6 = vld [vmem:[#allocation2 + $0xd8] sm:$0xf0] }
  0x6e   :  { %1402 = vmatmul.bf16.vlgmr.msra.gmra.mxu0 %v4859_v53  ;;  %1415 = vmatmul.bf16.vlgmr.msra.gmra.mxu1 %v4863_v60  ;;  %v3277_v7 = vor.u32 %v4469_v0, %v3276_v63  ;;  %v4457_v42 = vld [vmem:[#allocation2 + $0x214] sm:$0xf0]  ;;  %v3724_v56 = vld [vmem:[#allocation2 + $0x5e8] sm:$0xf]  ;;  %v4451_v0 = vld [vmem:[#allocation2 + $0x1ec] sm:$0xf] }
  0x6f   :  { %1459 = vmatpush.bf16.msrb.mxu1 %v3085_v10  ;;  %1485 = vmatpush.bf16.msrb.mxu0 %v3341_v16  ;;  %v4401_v10 = vld [vmem:[#allocation2 + $0x54] sm:$0xf0]  ;;  %v3229_v55 = vor.u32 %v4457_v42, %v3228_v41  ;;  %v3580_v59 = vld [vmem:[#allocation2 + $0x4c8] sm:$0xf]  ;;  %v3038_v31 = vld [vmem:[#allocation2 + $0x98] sm:$0xf0] }
  0x70   :  { %1428 = vmatmul.bf16.vlgmr.msra.gmra.mxu3 %v4881_v34  ;;  %v4497_v16 = vld [vmem:[#allocation2 + $0x354] sm:$0xf0]  ;;  %v3548_v24 = vld [vmem:[#allocation2 + $0x488] sm:$0xf]  ;;  %v3166_v41 = vld [vmem:[#allocation2 + $0x198] sm:$0xf0]  ;;  %v3041_v42 = vor.u32 %v4407_v30, %v3038_v31 }
  0x71   :  { %1453 = vmatpush.bf16.msrb.mxu3 %v3737_v13  ;;  %1440 = vmatpush.bf16.msrb.mxu2 %v3609_v17  ;;  %v4465_v13 = vld [vmem:[#allocation2 + $0x254] sm:$0xf0]  ;;  %v3005_v17 = vor.u32 %v4401_v10, %v3004_v8  ;;  %v3708_v10 = vld [vmem:[#allocation2 + $0x5c8] sm:$0xf]  ;;  %v3470_v30 = vld [vmem:[#allocation2 + $0x3f8] sm:$0xf0] }
  0x72   :  { %v4489_v45 = vld [vmem:[#allocation2 + $0x314] sm:$0xf0]  ;;  %v3516_v51 = vld [vmem:[#allocation2 + $0x448] sm:$0xf] }
  0x73   :  { %1460 = vmatpush.bf16.msrb.mxu1 %v3069_v26  ;;  %1486 = vmatpush.bf16.msrb.mxu0 %v3325_v29  ;;  %v3133_v26 = vor.u32 %v4433_v19, %v3132_v18  ;;  %v2989_v29 = vor.u32 %v4397_v22, %v2988_v21  ;;  %v4585_v47 = vld [vmem:[#allocation2 + $0x614] sm:$0xf0]  ;;  %v4411_v18 = vld [vmem:[#allocation2 + $0xac] sm:$0xf]  ;;  %v3054_v19 = vld [vmem:[#allocation2 + $0xb8] sm:$0xf0] }
  0x74   :  { %1441 = vmatmul.bf16.vlgmr.msrb.gmra.mxu2 %v4883_v39  ;;  %v3692_v22 = vld [vmem:[#allocation2 + $0x5a8] sm:$0xf]  ;;  %v4537_v25 = vld [vmem:[#allocation2 + $0x494] sm:$0xf0]  ;;  %v3057_v28 = vor.u32 %v4411_v18, %v3054_v19  ;;  %v3118_v18 = vld [vmem:[#allocation2 + $0x138] sm:$0xf0] }
  0x75   :  { %1498 = vmatpush.bf16.msra.mxu2 %v3469_v20  ;;  %1472 = vmatpush.bf16.msra.mxu3 %v3213_v23  ;;  %v3261_v20 = vor.u32 %v4465_v13, %v3260_v12  ;;  %v3389_v23 = vor.u32 %v4497_v16, %v3388_v15  ;;  %v3564_v12 = vld [vmem:[#allocation2 + $0x4a8] sm:$0xf]  ;;  %v4541_v13 = vld [vmem:[#allocation2 + $0x4b4] sm:$0xf0]  ;;  %v3198_v15 = vld [vmem:[#allocation2 + $0x1d8] sm:$0xf0]  ;;  %v3073_v16 = vor.u32 %v4415_v5, %v3070_v6 }
  0x76   :  { %v4529_v52 = vld [vmem:[#allocation2 + $0x454] sm:$0xf0]  ;;  %v3134_v5 = vld [vmem:[#allocation2 + $0x158] sm:$0xf0] }
  0x77   :  { %1461 = vmatpush.bf16.msrb.mxu1 %v3053_v40  ;;  %1487 = vmatpush.bf16.msrb.mxu0 %v3309_v43  ;;  %v3100_v40 = vld [vmem:[#allocation2 + $0x108] sm:$0xf] }
  0x78   :  { %v3356_v43 = vld [vmem:[#allocation2 + $0x308] sm:$0xf] }
  0x79   :  { %1499 = vmatpush.bf16.msra.mxu2 %v3453_v32  ;;  %1473 = vmatpush.bf16.msra.mxu3 %v3197_v36  ;;  %v2972_v32 = vld [vmem:[#allocation2 + $0x8] sm:$0xf]  ;;  %v3357_v61 = vor.u32 %v4489_v45, %v3356_v43  ;;  %v3022_v45 = vld [vmem:[#allocation2 + $0x78] sm:$0xf0] }
  0x7a   :  { %v3596_v36 = vld [vmem:[#allocation2 + $0x4e8] sm:$0xf]  ;;  %v2973_v49 = vor.u32 %v4393_v35, %v2972_v32  ;;  %v3549_v32 = vor.u32 %v4537_v25, %v3548_v24  ;;  %v4391_v24 = vld [vmem:[#allocation2 + $0xc] sm:$0xf]  ;;  %v2974_v25 = vld [vmem:[#allocation2 + $0x18] sm:$0xf0] }
  0x7b   :  { %1462 = vmatpush.bf16.msrb.mxu1 %v3037_v54  ;;  %1488 = vmatpush.bf16.msrb.mxu0 %v3293_v58  ;;  %v3597_v54 = vor.u32 %v4549_v37, %v3596_v36  ;;  %v4581_v58 = vld [vmem:[#allocation2 + $0x5f4] sm:$0xf0]  ;;  %v3676_v35 = vld [vmem:[#allocation2 + $0x588] sm:$0xf] }
  0x7c   :  { %v4569_v36 = vld [vmem:[#allocation2 + $0x594] sm:$0xf0]  ;;  %v3532_v37 = vld [vmem:[#allocation2 + $0x468] sm:$0xf] }
  0x7d   :  { %1500 = vmatpush.bf16.msra.mxu2 %v3437_v46  ;;  %1474 = vmatpush.bf16.msra.mxu3 %v3181_v50  ;;  %v3740_v46 = vld [vmem:[#allocation2 + $0x608] sm:$0xf]  ;;  %v4425_v50 = vld [vmem:[#allocation2 + $0x114] sm:$0xf0]  ;;  %v3677_v43 = vor.u32 %v4569_v36, %v3676_v35  ;;  %v4479_v35 = vld [vmem:[#allocation2 + $0x2cc] sm:$0xf]  ;;  %v2977_v36 = vor.u32 %v4391_v24, %v2974_v25 }
  0x7e   :  { %v3741_v63 = vor.u32 %v4585_v47, %v3740_v46  ;;  %v3101_v2 = vor.u32 %v4425_v50, %v3100_v40  ;;  %v4439_v40 = vld [vmem:[#allocation2 + $0x18c] sm:$0xf]  ;;  %v4565_v50 = vld [vmem:[#allocation2 + $0x574] sm:$0xf0] }
  0x7f   :  { %1463 = vmatpush.bf16.msrb.mxu1 %v3021_v4  ;;  %1489 = vmatpush.bf16.msrb.mxu0 %v3277_v7  ;;  %v3725_v4 = vor.u32 %v4581_v58, %v3724_v56  ;;  %v3169_v47 = vor.u32 %v4439_v40, %v3166_v41  ;;  %v3102_v40 = vld [vmem:[#allocation2 + $0x118] sm:$0xf0]  ;;  %v4499_v24 = vld [vmem:[#allocation2 + $0x36c] sm:$0xf] }
  0x80   :  { %3747 = vmatmul.msk.bf16.vlgmr.msrb.gmra.mxu3 %vm1273_vm0, %v4874_v48 }
  0x81   :  { %1501 = vmatpush.bf16.msra.mxu2 %v3421_v62  ;;  %1475 = vmatpush.bf16.msra.mxu3 %v3165_v1  ;;  %v4545_v62 = vld [vmem:[#allocation2 + $0x4d4] sm:$0xf0]  ;;  %v3214_v1 = vld [vmem:[#allocation2 + $0x1f8] sm:$0xf0] }
  0x82   :  { %v3581_v7 = vor.u32 %v4545_v62, %v3580_v59  ;;  %v3217_v8 = vor.u32 %v4451_v0, %v3214_v1  ;;  %v4399_v59 = vld [vmem:[#allocation2 + $0x4c] sm:$0xf]  ;;  %v3517_v62 = vor.u32 %v4529_v52, %v3516_v51  ;;  %v3644_v0 = vld [vmem:[#allocation2 + $0x548] sm:$0xf]  ;;  %v4561_v1 = vld [vmem:[#allocation2 + $0x554] sm:$0xf0] }
  0x83   :  { %1464 = vmatpush.bf16.msrb.mxu1 %v3005_v17  ;;  %1490 = vmatpush.bf16.msrb.mxu0 %v3261_v20  ;;  %v3565_v20 = vor.u32 %v4541_v13, %v3564_v12  ;;  %v3628_v13 = vld [vmem:[#allocation2 + $0x528] sm:$0xf]  ;;  %v4543_v51 = vld [vmem:[#allocation2 + $0x4cc] sm:$0xf]  ;;  %v3582_v52 = vld [vmem:[#allocation2 + $0x4d8] sm:$0xf0] }
  0x85   :  { %1502 = vmatpush.bf16.msra.mxu2 %v3405_v11  ;;  %1476 = vmatpush.bf16.msra.mxu3 %v3149_v14  ;;  %v4577_v11 = vld [vmem:[#allocation2 + $0x5d4] sm:$0xf0]  ;;  %v4447_v14 = vld [vmem:[#allocation2 + $0x1cc] sm:$0xf] }
  0x86   :  { %v3709_v17 = vor.u32 %v4577_v11, %v3708_v10  ;;  %v3201_v21 = vor.u32 %v4447_v14, %v3198_v15  ;;  %v2990_v10 = vld [vmem:[#allocation2 + $0x38] sm:$0xf0]  ;;  %v4557_v14 = vld [vmem:[#allocation2 + $0x534] sm:$0xf0]  ;;  %v3484_v15 = vld [vmem:[#allocation2 + $0x408] sm:$0xf] }
  0x87   :  { %1465 = vmatpush.bf16.msrb.mxu1 %v2989_v29  ;;  %1491 = vmatpush.bf16.msrb.mxu0 %v3245_v33 }
  0x89   :  { %1503 = vmatpush.bf16.msra.mxu2 %v3389_v23  ;;  %1477 = vmatpush.bf16.msra.mxu3 %v3133_v26  ;;  %v4573_v23 = vld [vmem:[#allocation2 + $0x5b4] sm:$0xf0]  ;;  %v4443_v26 = vld [vmem:[#allocation2 + $0x1ac] sm:$0xf] }
  0x8a   :  { %v3693_v29 = vor.u32 %v4573_v23, %v3692_v22  ;;  %v3185_v33 = vor.u32 %v4443_v26, %v3182_v27  ;;  %v3629_v22 = vor.u32 %v4557_v14, %v3628_v13  ;;  %v3612_v23 = vld [vmem:[#allocation2 + $0x508] sm:$0xf]  ;;  %v3422_v14 = vld [vmem:[#allocation2 + $0x398] sm:$0xf0] }
  0x8b   :  { %1466 = vmatpush.bf16.msrb.mxu1 %v2973_v49  ;;  %1492 = vmatpush.bf16.msrb.mxu0 %v3229_v55  ;;  %v3660_v49 = vld [vmem:[#allocation2 + $0x568] sm:$0xf]  ;;  %v3150_v55 = vld [vmem:[#allocation2 + $0x178] sm:$0xf0] }
  0x8c   :  { %v3661_v58 = vor.u32 %v4565_v50, %v3660_v49  ;;  %v3454_v50 = vld [vmem:[#allocation2 + $0x3d8] sm:$0xf0] }
  0x8d   :  { %1504 = vmatpush.bf16.msra.mxu2 %v3373_v38  ;;  %1478 = vmatpush.bf16.msra.mxu3 %v3117_v44  ;;  %v4533_v38 = vld [vmem:[#allocation2 + $0x474] sm:$0xf0]  ;;  %v4403_v44 = vld [vmem:[#allocation2 + $0x6c] sm:$0xf] }
  0x8e   :  { %1493 = vmatmul.bf16.vlgmr.msrb.gmra.mxu0 %v4859_v53  ;;  %1467 = vmatmul.bf16.vlgmr.msrb.gmra.mxu1 %v4861_v57  ;;  %v3533_v46 = vor.u32 %v4533_v38, %v3532_v37  ;;  %v3025_v56 = vor.u32 %v4403_v44, %v3022_v45  ;;  %v3326_v37 = vld [vmem:[#allocation2 + $0x2d8] sm:$0xf0]  ;;  %v4423_v38 = vld [vmem:[#allocation2 + $0x10c] sm:$0xf] }
  0x8f   :  { %1511 = vmatpush.bf16.msra.mxu1 %v3597_v54  ;;  %1544 = vmatpush.bf16.msra.mxu0 %v3741_v63  ;;  %v4435_v54 = vld [vmem:[#allocation2 + $0x16c] sm:$0xf]  ;;  %v3105_v49 = vor.u32 %v4423_v38, %v3102_v40 }
  0x90   :  { %v3153_v63 = vor.u32 %v4435_v54, %v3150_v55  ;;  %v4475_v55 = vld [vmem:[#allocation2 + $0x2ac] sm:$0xf] }
  0x91   :  { %1505 = vmatpush.bf16.msra.mxu2 %v3357_v61  ;;  %1479 = vmatpush.bf16.msra.mxu3 %v3101_v2  ;;  %v3006_v61 = vld [vmem:[#allocation2 + $0x58] sm:$0xf0]  ;;  %v3500_v2 = vld [vmem:[#allocation2 + $0x428] sm:$0xf]  ;;  %v4495_v38 = vld [vmem:[#allocation2 + $0x34c] sm:$0xf] }
  0x92   :  { %v3009_v6 = vor.u32 %v4399_v59, %v3006_v61  ;;  %v3710_v59 = vld [vmem:[#allocation2 + $0x5d8] sm:$0xf0] }
  0x93   :  { %1512 = vmatpush.bf16.msra.mxu1 %v3581_v7  ;;  %1563 = vmatpush.bf16.msrb.mxu0 %v3217_v8  ;;  %v3645_v7 = vor.u32 %v4561_v1, %v3644_v0  ;;  %v4395_v8 = vld [vmem:[#allocation2 + $0x2c] sm:$0xf]  ;;  %v3438_v1 = vld [vmem:[#allocation2 + $0x3b8] sm:$0xf0] }
  0x94   :  { %1480 = vmatmul.bf16.vlgmr.msra.gmra.mxu3 %v4867_v9  ;;  %1506 = vmatmul.bf16.vlgmr.msra.gmra.mxu2 %v4863_v60  ;;  %v2993_v19 = vor.u32 %v4395_v8, %v2990_v10  ;;  %v3694_v8 = vld [vmem:[#allocation2 + $0x5b8] sm:$0xf0] }
  0x95   :  { %1550 = vmatpush.bf16.msrb.mxu2 %v3089_v3  ;;  %1524 = vmatpush.bf16.msrb.mxu3 %v3725_v4  ;;  %v4525_v3 = vld [vmem:[#allocation2 + $0x434] sm:$0xf0]  ;;  %v4431_v4 = vld [vmem:[#allocation2 + $0x14c] sm:$0xf] }
  0x96   :  { %v3501_v11 = vor.u32 %v4525_v3, %v3500_v2  ;;  %v3137_v12 = vor.u32 %v4431_v4, %v3134_v5  ;;  %v4539_v2 = vld [vmem:[#allocation2 + $0x4ac] sm:$0xf]  ;;  %v3566_v3 = vld [vmem:[#allocation2 + $0x4b8] sm:$0xf0] }
  0x97   :  { %1513 = vmatpush.bf16.msra.mxu1 %v3565_v20  ;;  %1564 = vmatpush.bf16.msrb.mxu0 %v3201_v21  ;;  %v4483_v20 = vld [vmem:[#allocation2 + $0x2ec] sm:$0xf]  ;;  %v3342_v21 = vld [vmem:[#allocation2 + $0x2f8] sm:$0xf0] }
  0x98   :  { %v3345_v31 = vor.u32 %v4483_v20, %v3342_v21  ;;  %v4471_v5 = vld [vmem:[#allocation2 + $0x28c] sm:$0xf]  ;;  %v3678_v21 = vld [vmem:[#allocation2 + $0x598] sm:$0xf0] }
  0x99   :  { %1551 = vmatpush.bf16.msrb.mxu2 %v3073_v16  ;;  %1525 = vmatpush.bf16.msrb.mxu3 %v3709_v17  ;;  %v4521_v16 = vld [vmem:[#allocation2 + $0x414] sm:$0xf0]  ;;  %v4427_v17 = vld [vmem:[#allocation2 + $0x12c] sm:$0xf] }
  0x9a   :  { %v3485_v26 = vor.u32 %v4521_v16, %v3484_v15  ;;  %v3121_v27 = vor.u32 %v4427_v17, %v3118_v18  ;;  %v4535_v15 = vld [vmem:[#allocation2 + $0x48c] sm:$0xf]  ;;  %v3550_v16 = vld [vmem:[#allocation2 + $0x498] sm:$0xf0] }
  0x9b   :  { %1514 = vmatpush.bf16.msra.mxu1 %v3549_v32  ;;  %1565 = vmatpush.bf16.msrb.mxu0 %v3185_v33  ;;  %v4547_v32 = vld [vmem:[#allocation2 + $0x4ec] sm:$0xf]  ;;  %v3598_v33 = vld [vmem:[#allocation2 + $0x4f8] sm:$0xf0] }
  0x9c   :  { %v3601_v45 = vor.u32 %v4547_v32, %v3598_v33  ;;  %v4467_v18 = vld [vmem:[#allocation2 + $0x26c] sm:$0xf]  ;;  %v3662_v33 = vld [vmem:[#allocation2 + $0x578] sm:$0xf0] }
  0x9d   :  { %1552 = vmatpush.bf16.msrb.mxu2 %v3057_v28  ;;  %1526 = vmatpush.bf16.msrb.mxu3 %v3693_v29  ;;  %v4553_v28 = vld [vmem:[#allocation2 + $0x514] sm:$0xf0]  ;;  %v4515_v29 = vld [vmem:[#allocation2 + $0x3ec] sm:$0xf] }
  0x9e   :  { %3748 = vmatmul.msk.bf16.vlgmr.msra.gmra.mxu0 %vm1273_vm0, %v4874_v48  ;;  %v3613_v41 = vor.u32 %v4553_v28, %v3612_v23  ;;  %v3473_v44 = vor.u32 %v4515_v29, %v3470_v30  ;;  %v3553_v23 = vor.u32 %v4535_v15, %v3550_v16  ;;  %v3534_v28 = vld [vmem:[#allocation2 + $0x478] sm:$0xf0]  ;;  %v4463_v30 = vld [vmem:[#allocation2 + $0x24c] sm:$0xf] }
  0x9f   :  { %1515 = vmatpush.bf16.msra.mxu1 %v3533_v46  ;;  %1566 = vmatpush.bf16.msrb.mxu0 %v3169_v47  ;;  %v4511_v46 = vld [vmem:[#allocation2 + $0x3cc] sm:$0xf]  ;;  %v3329_v47 = vor.u32 %v4479_v35, %v3326_v37  ;;  %v3486_v15 = vld [vmem:[#allocation2 + $0x418] sm:$0xf0] }
  0xa0   :  { %v3457_v61 = vor.u32 %v4511_v46, %v3454_v50  ;;  %v4563_v32 = vld [vmem:[#allocation2 + $0x56c] sm:$0xf] }
  0xa1   :  { %1553 = vmatpush.bf16.msrb.mxu2 %v3041_v42  ;;  %1527 = vmatpush.bf16.msrb.mxu3 %v3677_v43  ;;  %v4579_v42 = vld [vmem:[#allocation2 + $0x5ec] sm:$0xf]  ;;  %v3726_v43 = vld [vmem:[#allocation2 + $0x5f8] sm:$0xf0] }
  0xa2   :  { %v3729_v54 = vor.u32 %v4579_v42, %v3726_v43  ;;  %v3390_v42 = vld [vmem:[#allocation2 + $0x358] sm:$0xf0]  ;;  %v4527_v43 = vld [vmem:[#allocation2 + $0x44c] sm:$0xf] }
  0xa3   :  { %1516 = vmatpush.bf16.msra.mxu1 %v3517_v62  ;;  %1567 = vmatpush.bf16.msrb.mxu0 %v3153_v63  ;;  %v3585_v62 = vor.u32 %v4543_v51, %v3582_v52  ;;  %v4507_v63 = vld [vmem:[#allocation2 + $0x3ac] sm:$0xf]  ;;  %v3646_v51 = vld [vmem:[#allocation2 + $0x558] sm:$0xf0]  ;;  %v3393_v52 = vor.u32 %v4495_v38, %v3390_v42  ;;  %v3832_v42 = vld [vmem:[#allocation4 + $0xa0] sm:$0xf] }
  0xa4   :  { %v3441_v10 = vor.u32 %v4507_v63, %v3438_v1  ;;  %v4459_v46 = vld [vmem:[#allocation2 + $0x22c] sm:$0xf] }
  0xa5   :  { %1554 = vmatpush.bf16.msrb.mxu2 %v3025_v56  ;;  %1528 = vmatpush.bf16.msrb.mxu3 %v3661_v58  ;;  %v3310_v56 = vld [vmem:[#allocation2 + $0x2b8] sm:$0xf0]  ;;  %v4575_v58 = vld [vmem:[#allocation2 + $0x5cc] sm:$0xf] }
  0xa6   :  { %v3313_v0 = vor.u32 %v4475_v55, %v3310_v56  ;;  %v3713_v4 = vor.u32 %v4575_v58, %v3710_v59  ;;  %v4559_v50 = vld [vmem:[#allocation2 + $0x54c] sm:$0xf]  ;;  %v3374_v58 = vld [vmem:[#allocation2 + $0x338] sm:$0xf0] }
  0xa7   :  { %1517 = vmatpush.bf16.msra.mxu1 %v3501_v11  ;;  %1568 = vmatpush.bf16.msrb.mxu0 %v3137_v12  ;;  %v3569_v11 = vor.u32 %v4539_v2, %v3566_v3  ;;  %v4503_v12 = vld [vmem:[#allocation2 + $0x38c] sm:$0xf]  ;;  %v3630_v3 = vld [vmem:[#allocation2 + $0x538] sm:$0xf0] }
  0xa8   :  { %v4491_v55 = vld [vmem:[#allocation2 + $0x32c] sm:$0xf] }
  0xa9   :  { %1555 = vmatpush.bf16.msrb.mxu2 %v3009_v6  ;;  %1529 = vmatpush.bf16.msrb.mxu3 %v3645_v7  ;;  %v3294_v6 = vld [vmem:[#allocation2 + $0x298] sm:$0xf0]  ;;  %v4571_v7 = vld [vmem:[#allocation2 + $0x5ac] sm:$0xf] }
  0xaa   :  { %v3297_v13 = vor.u32 %v4471_v5, %v3294_v6  ;;  %v3697_v17 = vor.u32 %v4571_v7, %v3694_v8  ;;  %v4523_v59 = vld [vmem:[#allocation2 + $0x42c] sm:$0xf]  ;;  %v3742_v5 = vld [vmem:[#allocation2 + $0x618] sm:$0xf0]  ;;  %v4916_v6 = vld [vmem:[%s5108_s2] sm:$0xf]  ;;  %v3377_v8 = vor.u32 %v4491_v55, %v3374_v58 }
  0xab   :  { %1518 = vmatpush.bf16.msra.mxu1 %v3485_v26  ;;  %1569 = vmatpush.bf16.msrb.mxu0 %v3121_v27  ;;  %v3406_v26 = vld [vmem:[#allocation2 + $0x378] sm:$0xf0]  ;;  %v4531_v27 = vld [vmem:[#allocation2 + $0x46c] sm:$0xf] }
  0xac   :  { %v3537_v37 = vor.u32 %v4531_v27, %v3534_v28  ;;  %v4455_v63 = vld [vmem:[#allocation2 + $0x20c] sm:$0xf] }
  0xad   :  { %1556 = vmatpush.bf16.msrb.mxu2 %v2993_v19  ;;  %1530 = vmatpush.bf16.msrb.mxu3 %v3629_v22  ;;  %v3278_v19 = vld [vmem:[#allocation2 + $0x278] sm:$0xf0]  ;;  %v3425_v22 = vor.u32 %v4503_v12, %v3422_v14  ;;  %v4555_v1 = vld [vmem:[#allocation2 + $0x52c] sm:$0xf] }
  0xae   :  { %1519 = vmatmul.bf16.vlgmr.msra.gmra.mxu1 %v4881_v34  ;;  %v3281_v25 = vor.u32 %v4467_v18, %v3278_v19  ;;  %v4519_v14 = vld [vmem:[#allocation2 + $0x40c] sm:$0xf]  ;;  %v3864_v18 = vld [vmem:[#allocation4 + $0xe0] sm:$0xf]  ;;  %v4616_v19 = vld [vmem:[#allocation4 + $0xec] sm:$0xf0] }
  0xaf   :  { %1576 = vmatpush.bf16.msrb.mxu1 %v3345_v31  ;;  %1570 = vmatpush.bf16.msrb.mxu0 %v3105_v49  ;;  %v4905_v20 = vpop.f32.mrf.mxu0  ;;  %v4907_v29 = vpop.f32.mrf.mxu1  ;;  %v3262_v31 = vld [vmem:[#allocation2 + $0x258] sm:$0xf0]  ;;  %v3489_v27 = vor.u32 %v4519_v14, %v3486_v15  ;;  %v3865_v28 = vor.u32 %v4616_v19, %v3864_v18  ;;  %v3896_v15 = vld [vmem:[#allocation4 + $0x120] sm:$0xf]  ;;  %v4588_v19 = vld [vmem:[#allocation4 + $0xc] sm:$0xf0] }
  0xb0   :  { %v3265_v40 = vor.u32 %v4463_v30, %v3262_v31  ;;  %v3848_v30 = vld [vmem:[#allocation4 + $0xc0] sm:$0xf]  ;;  %v4612_v31 = vld [vmem:[#allocation4 + $0xcc] sm:$0xf0] }
  0xb1   :  { %1557 = vmatpush.bf16.msrb.mxu2 %v2977_v36  ;;  %1531 = vmatpush.bf16.msrb.mxu3 %v3613_v41  ;;  %v3409_v36 = vor.u32 %v4499_v24, %v3406_v26  ;;  %v4648_v24 = vld [vmem:[#allocation4 + $0x1ec] sm:$0xf0]  ;;  %v3752_v18 = vld [vmem:[#allocation4] sm:$0xf] }
  0xb2   :  { %1571 = vmatmul.bf16.vlgmr.msrb.gmra.mxu0 %v4867_v9  ;;  %v4909_v35 = vpop.f32.mrf.mxu2 }
  0xb3   :  { %1577 = vmatpush.bf16.msrb.mxu1 %v3329_v47  ;;  %1615 = vmatpush.bf16.msra.mxu0 %v3729_v54  ;;  %v4911_v41 = vpop.f32.mrf.mxu3  ;;  %v3246_v47 = vld [vmem:[#allocation2 + $0x238] sm:$0xf0] }
  0xb4   :  { %1532 = vmatmul.bf16.vlgmr.msrb.gmra.mxu3 %v4883_v39  ;;  %1558 = vmatmul.bf16.vlgmr.msrb.gmra.mxu2 %v4861_v57  ;;  %v4567_v57 = vld [vmem:[#allocation2 + $0x58c] sm:$0xf]  ;;  %v3249_v56 = vor.u32 %v4459_v46, %v3246_v47  ;;  %v4640_v46 = vld [vmem:[#allocation4 + $0x1ac] sm:$0xf0] }
  0xb5   :  { %1589 = vmatpush.bf16.msra.mxu3 %v3473_v44  ;;  %1602 = vmatpush.bf16.msra.mxu2 %v3601_v45  ;;  %v3681_v9 = vor.u32 %v4567_v57, %v3678_v21  ;;  %v3518_v44 = vld [vmem:[#allocation2 + $0x458] sm:$0xf0]  ;;  %v3665_v45 = vor.u32 %v4563_v32, %v3662_v33  ;;  %v4551_v57 = vld [vmem:[#allocation2 + $0x50c] sm:$0xf]  ;;  %v3976_v33 = vld [vmem:[#allocation4 + $0x1c0] sm:$0xf] }
  0xb6   :  { %v3521_v54 = vor.u32 %v4527_v43, %v3518_v44  ;;  %v4608_v43 = vld [vmem:[#allocation4 + $0xac] sm:$0xf0] }
  0xb7   :  { %1578 = vmatpush.bf16.msrb.mxu1 %v3313_v0  ;;  %1616 = vmatpush.bf16.msra.mxu0 %v3713_v4  ;;  %v1288_v49 = vpop.f32.mrf.mxu0  ;;  %v3230_v0 = vld [vmem:[#allocation2 + $0x218] sm:$0xf0]  ;;  %v1301_v2 = vpop.f32.mrf.mxu1  ;;  %v4583_v4 = vld [vmem:[#allocation2 + $0x60c] sm:$0xf] }
  0xb8   :  { %v3233_v12 = vor.u32 %v4455_v63, %v3230_v0  ;;  %v3745_v21 = vor.u32 %v4583_v4, %v3742_v5  ;;  %v4604_v49 = vld [vmem:[#allocation4 + $0x8c] sm:$0xf0]  ;;  %v3912_v4 = vld [vmem:[#allocation4 + $0x140] sm:$0xf] }
  0xb9   :  { %1590 = vmatpush.bf16.msra.mxu3 %v3457_v61  ;;  %1603 = vmatpush.bf16.msra.mxu2 %v3585_v62  ;;  %v3502_v61 = vld [vmem:[#allocation2 + $0x438] sm:$0xf0]  ;;  %v3649_v62 = vor.u32 %v4559_v50, %v3646_v51  ;;  %v4596_v2 = vld [vmem:[#allocation4 + $0x4c] sm:$0xf0] }
  0xba   :  { %v1314_v7 = vpop.f32.mrf.mxu2  ;;  %v4628_v5 = vld [vmem:[#allocation4 + $0x14c] sm:$0xf0] }
  0xbb   :  { %1579 = vmatpush.bf16.msrb.mxu1 %v3297_v13  ;;  %1617 = vmatpush.bf16.msra.mxu0 %v3697_v17  ;;  %v3358_v13 = vld [vmem:[#allocation2 + $0x318] sm:$0xf0]  ;;  %v1327_v16 = vpop.f32.mrf.mxu3  ;;  %v3633_v17 = vor.u32 %v4555_v1, %v3630_v3  ;;  %v3784_v1 = vld [vmem:[#allocation4 + $0x40] sm:$0xf]  ;;  %v3913_v14 = vor.u32 %v4628_v5, %v3912_v4  ;;  %v4664_v4 = vld [vmem:[#allocation4 + $0x26c] sm:$0xf0] }
  0xbc   :  { %v4624_v16 = vld [vmem:[#allocation4 + $0x12c] sm:$0xf0]  ;;  %v262_v5 = vperm.slane %v4916_v6, 1 }
  0xbd   :  { %1591 = vmatpush.bf16.msra.mxu3 %v3441_v10  ;;  %1604 = vmatpush.bf16.msra.mxu2 %v3569_v11  ;;  %v3505_v10 = vor.u32 %v4523_v59, %v3502_v61  ;;  %v4487_v11 = vld [vmem:[#allocation2 + $0x30c] sm:$0xf]  ;;  %v4600_v59 = vld [vmem:[#allocation4 + $0x6c] sm:$0xf0]  ;;  %v3928_v61 = vld [vmem:[#allocation4 + $0x160] sm:$0xf] }
  0xbe   :  { %v3361_v26 = vor.u32 %v4487_v11, %v3358_v13  ;;  %v4592_v13 = vld [vmem:[#allocation4 + $0x2c] sm:$0xf0] }
  0xbf   :  { %1580 = vmatpush.bf16.msrb.mxu1 %v3281_v25  ;;  %1618 = vmatpush.bf16.msra.mxu0 %v3681_v9  ;;  %v261_v25 = vperm.slane %v4916_v6, 0 }
  0xc1   :  { %1592 = vmatpush.bf16.msra.mxu3 %v3425_v22  ;;  %1605 = vmatpush.bf16.msra.mxu2 %v3553_v23  ;;  %v3614_v22 = vld [vmem:[#allocation2 + $0x518] sm:$0xf0]  ;;  %v3992_v23 = vld [vmem:[#allocation4 + $0x1e0] sm:$0xf] }
  0xc2   :  { %v3617_v9 = vor.u32 %v4551_v57, %v3614_v22  ;;  %v3993_v32 = vor.u32 %v4648_v24, %v3992_v23  ;;  %v4120_v22 = vld [vmem:[#allocation4 + $0x2e0] sm:$0xf]  ;;  %v4680_v23 = vld [vmem:[#allocation4 + $0x2ec] sm:$0xf0] }
  0xc3   :  { %1581 = vmatpush.bf16.msrb.mxu1 %v3265_v40  ;;  %1619 = vmatpush.bf16.msra.mxu0 %v3665_v45  ;;  %v4921_v38 = vpop.f32.mrf.mxu2  ;;  %v3849_v40 = vor.u32 %v4612_v31, %v3848_v30  ;;  %v3960_v45 = vld [vmem:[#allocation4 + $0x1a0] sm:$0xf]  ;;  %v3994_v30 = vld [vmem:[#allocation4 + $0x1f0] sm:$0xf0]  ;;  %v3753_v31 = vor.u32 %v4588_v19, %v3752_v18  ;;  %v4594_v19 = vld [vmem:[#allocation4 + $0x44] sm:$0xf] }
  0xc4   :  { %v3961_v50 = vor.u32 %v4640_v46, %v3960_v45  ;;  %v4642_v46 = vld [vmem:[#allocation4 + $0x1c4] sm:$0xf] }
  0xc5   :  { %1593 = vmatpush.bf16.msra.mxu3 %v3409_v36  ;;  %1606 = vmatpush.bf16.msra.mxu2 %v3537_v37  ;;  %v4644_v36 = vld [vmem:[#allocation4 + $0x1cc] sm:$0xf0]  ;;  %v1287_v37 = vadd.f32 %v4905_v20, %v261_v25  ;;  %v3816_v20 = vld [vmem:[#allocation4 + $0x80] sm:$0xf]  ;;  %v3866_v25 = vld [vmem:[#allocation4 + $0xf0] sm:$0xf0] }
  0xc6   :  { %v3977_v44 = vor.u32 %v4644_v36, %v3976_v33  ;;  %v3817_v58 = vor.u32 %v4604_v49, %v3816_v20  ;;  %v4088_v49 = vld [vmem:[#allocation4 + $0x2a0] sm:$0xf] }
  0xc7   :  { %1582 = vmatpush.bf16.msrb.mxu1 %v3249_v56  ;;  %1620 = vmatpush.bf16.msra.mxu0 %v3649_v62  ;;  %v1300_v47 = vadd.f32 %v4907_v29, %v1287_v37  ;;  %v3800_v29 = vld [vmem:[#allocation4 + $0x60] sm:$0xf] }
  0xc8   :  { %v3801_v63 = vor.u32 %v4600_v59, %v3800_v29  ;;  %v4072_v29 = vld [vmem:[#allocation4 + $0x280] sm:$0xf]  ;;  %v4668_v59 = vld [vmem:[#allocation4 + $0x28c] sm:$0xf0] }
  0xc9   :  { %1594 = vmatpush.bf16.msra.mxu3 %v3393_v52  ;;  %1607 = vmatpush.bf16.msra.mxu2 %v3521_v54  ;;  %v3944_v52 = vld [vmem:[#allocation4 + $0x180] sm:$0xf]  ;;  %v4636_v54 = vld [vmem:[#allocation4 + $0x18c] sm:$0xf0]  ;;  %v1313_v55 = vadd.f32 %v4909_v35, %v1300_v47  ;;  %v3978_v47 = vld [vmem:[#allocation4 + $0x1d0] sm:$0xf0] }
  0xcb   :  { %1583 = vmatpush.bf16.msrb.mxu1 %v3233_v12  ;;  %1621 = vmatpush.bf16.msra.mxu0 %v3633_v17  ;;  %v1338_v51 = vpop.f32.mrf.mxu0  ;;  %v1366_v56 = vpop.f32.mrf.mxu2  ;;  %v1326_v62 = vadd.f32 %v4911_v41, %v1313_v55  ;;  %v3768_v12 = vld [vmem:[#allocation4 + $0x20] sm:$0xf] }
  0xcc   :  { %v3769_v17 = vor.u32 %v4592_v13, %v3768_v12  ;;  %v3962_v56 = vld [vmem:[#allocation4 + $0x1b0] sm:$0xf0]  ;;  %v4630_v13 = vld [vmem:[#allocation4 + $0x164] sm:$0xf] }
  0xcd   :  { %1595 = vmatpush.bf16.msra.mxu3 %v3377_v8  ;;  %1608 = vmatpush.bf16.msra.mxu2 %v3505_v10  ;;  %v1339_v0 = vadd.f32 %v1338_v51, %v1326_v62  ;;  %v3785_v10 = vor.u32 %v4596_v2, %v3784_v1  ;;  %v4606_v51 = vld [vmem:[#allocation4 + $0xa4] sm:$0xf]  ;;  %v4073_v62 = vor.u32 %v4668_v59, %v4072_v29 }
  0xce   :  { %1584 = vmatmul.bf16.vlgmr.msrb.gmra.mxu1 %v4859_v53  ;;  %v3833_v53 = vor.u32 %v4608_v43, %v3832_v42  ;;  %v4610_v42 = vld [vmem:[#allocation4 + $0xc4] sm:$0xf]  ;;  %v3850_v43 = vld [vmem:[#allocation4 + $0xd0] sm:$0xf0] }
  0xcf   :  { %1635 = vmatpush.bf16.msra.mxu1 %v3745_v21  ;;  %1622 = vmatpush.bf16.msra.mxu0 %v3617_v9  ;;  %v3897_v21 = vor.u32 %v4624_v16, %v3896_v15  ;;  %v4646_v9 = vld [vmem:[#allocation4 + $0x1e4] sm:$0xf]  ;;  %v3853_v20 = vor.u32 %v4610_v42, %v3850_v43  ;;  %v4040_v16 = vld [vmem:[#allocation4 + $0x240] sm:$0xf] }
  0xd0   :  { %v4586_v42 = vld [vmem:[#allocation4 + $0x4] sm:$0xf] }
  0xd1   :  { %1596 = vmatpush.bf16.msra.mxu3 %v3361_v26  ;;  %1609 = vmatpush.bf16.msra.mxu2 %v3489_v27  ;;  %v3880_v26 = vld [vmem:[#allocation4 + $0x100] sm:$0xf]  ;;  %v4620_v27 = vld [vmem:[#allocation4 + $0x10c] sm:$0xf0] }
  0xd2   :  { %1623 = vmatmul.bf16.vlgmr.msra.gmra.mxu0 %v4883_v39  ;;  %v4632_v39 = vld [vmem:[#allocation4 + $0x16c] sm:$0xf0]  ;;  %v3881_v37 = vor.u32 %v4620_v27, %v3880_v26 }
  0xd3   :  { %2440 = vmatpush.bf16.msrb.mxu1 %v3993_v32  ;;  %v3929_v3 = vor.u32 %v4632_v39, %v3928_v61  ;;  %v4929_v35 = vpop.f32.mrf.mxu3  ;;  %v1340_v7 = vpop.f32.mrf.mxu0  ;;  %v3818_v61 = vld [vmem:[#allocation4 + $0x90] sm:$0xf0] }
  0xd4   :  { %1597 = vmatmul.bf16.vlgmr.msra.gmra.mxu3 %v4863_v60  ;;  %1610 = vmatmul.bf16.vlgmr.msra.gmra.mxu2 %v4881_v34  ;;  %v1351_v60 = vpop.f32.mrf.mxu1  ;;  %v3945_v34 = vor.u32 %v4636_v54, %v3944_v52  ;;  %v3834_v52 = vld [vmem:[#allocation4 + $0xb0] sm:$0xf0]  ;;  %v3981_v54 = vor.u32 %v4642_v46, %v3978_v47  ;;  %v1378_v18 = vadd.f32 %v4929_v35, %v262_v5  ;;  %v4652_v46 = vld [vmem:[#allocation4 + $0x20c] sm:$0xf0]  ;;  %v3872_v47 = vld [vmem:[#allocation4 + $0xe8] sm:$0xf] }
  0xd5   :  { %2427 = vmatpush.bf16.msrb.mxu3 %v3865_v28  ;;  %v1352_v41 = vadd.f32 %v1351_v60, %v1339_v0  ;;  %v4121_v28 = vor.u32 %v4680_v23, %v4120_v22  ;;  %v4638_v60 = vld [vmem:[#allocation4 + $0x1a4] sm:$0xf]  ;;  %v3946_v0 = vld [vmem:[#allocation4 + $0x190] sm:$0xf0] }
  0xd6   :  { %v3965_v39 = vor.u32 %v4638_v60, %v3962_v56  ;;  %v4626_v23 = vld [vmem:[#allocation4 + $0x144] sm:$0xf] }
  0xd7   :  { %2441 = vmatpush.bf16.msrb.mxu1 %v3977_v44  ;;  %v4933_v11 = vpop.f32.mrf.mxu2  ;;  %v1365_v57 = vadd.f32 %v4921_v38, %v1352_v41  ;;  %2453 = vmatpush.bf16.msrb.mxu2 %v4121_v28  ;;  %v4104_v38 = vld [vmem:[#allocation4 + $0x2c0] sm:$0xf]  ;;  %v3997_v44 = vor.u32 %v4646_v9, %v3994_v30  ;;  %v4656_v9 = vld [vmem:[#allocation4 + $0x22c] sm:$0xf0] }
  0xd8   :  { %v4024_v28 = vld [vmem:[#allocation4 + $0x220] sm:$0xf]  ;;  %v1391_v30 = vadd.f32 %v4933_v11, %v1378_v18  ;;  %v4000_v18 = vld [vmem:[#allocation4 + $0x1e8] sm:$0xf] }
  0xd9   :  { %2428 = vmatpush.bf16.msrb.mxu3 %v3849_v40  ;;  %v1641_v33 = vmax.f32 %v1365_v57, 0.0  ;;  %v4676_v40 = vld [vmem:[#allocation4 + $0x2cc] sm:$0xf0]  ;;  %v3786_v57 = vld [vmem:[#allocation4 + $0x50] sm:$0xf0] }
  0xda   :  { %v4105_v45 = vor.u32 %v4676_v40, %v4104_v38  ;;  %v3789_v27 = vor.u32 %v4594_v19, %v3786_v57  ;;  %v3898_v38 = vld [vmem:[#allocation4 + $0x130] sm:$0xf0]  ;;  %v4649_v19 = vld [vmem:[#allocation4 + $0x1f4] sm:$0xf0] }
  0xdb   :  { %2442 = vmatpush.bf16.msrb.mxu1 %v3961_v50  ;;  %v1379_v24 = vpop.f32.mrf.mxu3  ;;  %v4672_v50 = vld [vmem:[#allocation4 + $0x2ac] sm:$0xf0] }
  0xdc   :  { %v1353_v8 = vpop.f32.mrf.mxu1  ;;  %2454 = vmatpush.bf16.msrb.mxu2 %v4105_v45  ;;  %v4089_v55 = vor.u32 %v4672_v50, %v4088_v49  ;;  %v3914_v24 = vld [vmem:[#allocation4 + $0x150] sm:$0xf0]  ;;  %v4008_v45 = vld [vmem:[#allocation4 + $0x200] sm:$0xf]  ;;  %v4678_v49 = vld [vmem:[#allocation4 + $0x2e4] sm:$0xf] }
  0xdd   :  { %2429 = vmatpush.bf16.msrb.mxu3 %v3833_v53  ;;  %v4936_v53 = vpack.c.bf16 %v1641_v33, %v1641_v33  ;;  %v4598_v8 = vld [vmem:[#allocation4 + $0x64] sm:$0xf]  ;;  %v3917_v35 = vor.u32 %v4626_v23, %v3914_v24  ;;  %v4009_v11 = vor.u32 %v4652_v46, %v4008_v45  ;;  %v4122_v50 = vld [vmem:[#allocation4 + $0x2f0] sm:$0xf0]  ;;  %v4605_v23 = vld [vmem:[#allocation4 + $0x94] sm:$0xf0] }
  0xde   :  { %3749 = vmatmul.msk.bf16.vlgmr.msra.gmra.mxu1 %vm1273_vm0, %v4874_v48  ;;  %v4614_v48 = vld [vmem:[#allocation4 + $0xe4] sm:$0xf]  ;;  %v4125_v60 = vor.u32 %v4678_v49, %v4122_v50  ;;  %v4200_v46 = vld [vmem:[#allocation4 + $0x380] sm:$0xf] }
  0xdf   :  { %2443 = vmatpush.bf16.msrb.mxu1 %v3945_v34  ;;  %v1392_v32 = vpop.f32.mrf.mxu2  ;;  %v3869_v36 = vor.u32 %v4614_v48, %v3866_v25  ;;  %v4602_v34 = vld [vmem:[#allocation4 + $0x84] sm:$0xf] }
  0xe0   :  { %2455 = vmatpush.bf16.msrb.mxu2 %v4089_v55  ;;  %v3821_v2 = vor.u32 %v4602_v34, %v3818_v61  ;;  %v3770_v32 = vld [vmem:[#allocation4 + $0x30] sm:$0xf0]  ;;  %v3856_v61 = vld [vmem:[#allocation4 + $0xc8] sm:$0xf]  ;;  %v4666_v24 = vld [vmem:[#allocation4 + $0x284] sm:$0xf] }
  0xe1   :  { %2430 = vmatpush.bf16.msrb.mxu3 %v3817_v58  ;;  %v3837_v58 = vor.u32 %v4606_v51, %v3834_v52  ;;  %v4617_v52 = vld [vmem:[#allocation4 + $0xf4] sm:$0xf0]  ;;  %v3882_v55 = vld [vmem:[#allocation4 + $0x110] sm:$0xf0] }
  0xe2   :  { %v3873_v34 = vor.u32 %v4617_v52, %v3872_v47  ;;  %v4700_v47 = vld [vmem:[#allocation4 + $0x38c] sm:$0xf0]  ;;  %v3792_v52 = vld [vmem:[#allocation4 + $0x48] sm:$0xf] }
  0xe3   :  { %2444 = vmatpush.bf16.msrb.mxu1 %v3929_v3  ;;  %v4056_v3 = vld [vmem:[#allocation4 + $0x260] sm:$0xf]  ;;  %v4201_v49 = vor.u32 %v4700_v47, %v4200_v46  ;;  %v4710_v46 = vld [vmem:[#allocation4 + $0x3e4] sm:$0xf]  ;;  %v4250_v47 = vld [vmem:[#allocation4 + $0x3f0] sm:$0xf0] }
  0xe4   :  { %2456 = vmatpush.bf16.msrb.mxu2 %v4073_v62  ;;  %v4057_v12 = vor.u32 %v4664_v4, %v4056_v3  ;;  %v4674_v62 = vld [vmem:[#allocation4 + $0x2c4] sm:$0xf]  ;;  %v4712_v3 = vld [vmem:[#allocation4 + $0x3ec] sm:$0xf0] }
  0xe5   :  { %2431 = vmatpush.bf16.msrb.mxu3 %v3801_v63  ;;  %v4634_v63 = vld [vmem:[#allocation4 + $0x184] sm:$0xf] }
  0xe6   :  { %v3949_v41 = vor.u32 %v4634_v63, %v3946_v0  ;;  %v4106_v63 = vld [vmem:[#allocation4 + $0x2d0] sm:$0xf0]  ;;  %v4613_v0 = vld [vmem:[#allocation4 + $0xd4] sm:$0xf0] }
  0xe7   :  { %2445 = vmatpush.bf16.msrb.mxu1 %v3913_v14  ;;  %v3930_v14 = vld [vmem:[#allocation4 + $0x170] sm:$0xf0] }
  0xe8   :  { %2457 = vmatpush.bf16.msrb.mxu2 %v4057_v12  ;;  %v3933_v48 = vor.u32 %v4630_v13, %v3930_v14  ;;  %v4609_v13 = vld [vmem:[#allocation4 + $0xb4] sm:$0xf0] }
  0xe9   :  { %2432 = vmatpush.bf16.msrb.mxu3 %v3785_v10  ;;  %v3802_v10 = vld [vmem:[#allocation4 + $0x70] sm:$0xf0] }
  0xea   :  { %v3805_v15 = vor.u32 %v4598_v8, %v3802_v10  ;;  %v3840_v8 = vld [vmem:[#allocation4 + $0xa8] sm:$0xf]  ;;  %v4670_v10 = vld [vmem:[#allocation4 + $0x2a4] sm:$0xf] }
  0xeb   :  { %2446 = vmatpush.bf16.msrb.mxu1 %v3897_v21  ;;  %v1403_v1 = vpop.f32.mrf.mxu0  ;;  %v1416_v7 = vpop.f32.mrf.mxu1 }
  0xec   :  { %v1404_v40 = vadd.f32 %v1403_v1, %v1391_v30  ;;  %v4109_v1 = vor.u32 %v4674_v62, %v4106_v63  ;;  %v3984_v30 = vld [vmem:[#allocation4 + $0x1c8] sm:$0xf] }
  0xed   :  { %2433 = vmatpush.bf16.msrb.mxu3 %v3769_v17  ;;  %v4660_v17 = vld [vmem:[#allocation4 + $0x24c] sm:$0xf0]  ;;  %v3776_v63 = vld [vmem:[#allocation4 + $0x28] sm:$0xf] }
  0xee   :  { %v4041_v21 = vor.u32 %v4660_v17, %v4040_v16  ;;  %v1417_v56 = vadd.f32 %v1416_v7, %v1404_v40  ;;  %v3857_v7 = vor.u32 %v4613_v0, %v3856_v61  ;;  %v4708_v16 = vld [vmem:[#allocation4 + $0x3cc] sm:$0xf0]  ;;  %v4637_v61 = vld [vmem:[#allocation4 + $0x194] sm:$0xf0]  ;;  %v4654_v0 = vld [vmem:[#allocation4 + $0x224] sm:$0xf] }
  0xef   :  { %2447 = vmatpush.bf16.msrb.mxu1 %v3881_v37  ;;  %v4622_v37 = vld [vmem:[#allocation4 + $0x124] sm:$0xf] }
  0xf0   :  { %2458 = vmatpush.bf16.msrb.mxu2 %v4041_v21 }
  0xf1   :  { %2434 = vmatpush.bf16.msrb.mxu3 %v3753_v31  ;;  %v4590_v31 = vld [vmem:[#allocation4 + $0x24] sm:$0xf] }
  0xf2   :  { %v3773_v43 = vor.u32 %v4590_v31, %v3770_v32  ;;  %v4645_v31 = vld [vmem:[#allocation4 + $0x1d4] sm:$0xf0] }
  0xf3   :  { %2492 = vmatpush.bf16.msra.mxu1 %v3997_v44  ;;  %v1429_v22 = vpop.f32.mrf.mxu3  ;;  %v1405_v25 = vpop.f32.mrf.mxu0  ;;  %v3754_v44 = vld [vmem:[#allocation4 + $0x10] sm:$0xf0] }
  0xf4   :  { %2435 = vmatmul.bf16.vlgmr.msrb.gmra.mxu3 %v4936_v53  ;;  %v1418_v33 = vpop.f32.mrf.mxu1  ;;  %v1430_v59 = vadd.f32 %v1429_v22, %v1417_v56  ;;  %v3841_v22 = vor.u32 %v4609_v13, %v3840_v8  ;;  %v4001_v25 = vor.u32 %v4649_v19, %v4000_v18  ;;  %v4597_v56 = vld [vmem:[#allocation4 + $0x54] sm:$0xf0]  ;;  %v4168_v8 = vld [vmem:[#allocation4 + $0x340] sm:$0xf]  ;;  %v4650_v19 = vld [vmem:[#allocation4 + $0x204] sm:$0xf] }
  0xf5   :  { %2479 = vmatpush.bf16.msra.mxu3 %v3869_v36  ;;  %v4025_v36 = vor.u32 %v4656_v9, %v4024_v28  ;;  %v4704_v28 = vld [vmem:[#allocation4 + $0x3ac] sm:$0xf0]  ;;  %v3793_v62 = vor.u32 %v4597_v56, %v3792_v52  ;;  %v4589_v18 = vld [vmem:[#allocation4 + $0x14] sm:$0xf0]  ;;  %v3842_v56 = vld [vmem:[#allocation4 + $0xb8] sm:$0xf0] }
  0xf7   :  { %2493 = vmatpush.bf16.msra.mxu1 %v3981_v54  ;;  %v1442_v26 = vpop.f32.mrf.mxu2  ;;  %2459 = vmatpush.bf16.msrb.mxu2 %v4025_v36  ;;  %v4618_v54 = vld [vmem:[#allocation4 + $0x104] sm:$0xf]  ;;  %v3808_v36 = vld [vmem:[#allocation4 + $0x68] sm:$0xf] }
  0xf8   :  { %v1443_v5 = vadd.f32 %v1442_v26, %v1430_v59  ;;  %v4074_v26 = vld [vmem:[#allocation4 + $0x290] sm:$0xf0]  ;;  %v4696_v59 = vld [vmem:[#allocation4 + $0x36c] sm:$0xf0] }
  0xf9   :  { %2480 = vmatpush.bf16.msra.mxu3 %v3853_v20  ;;  %v3901_v20 = vor.u32 %v4622_v37, %v3898_v38  ;;  %v4077_v32 = vor.u32 %v4666_v24, %v4074_v26  ;;  %v4662_v37 = vld [vmem:[#allocation4 + $0x264] sm:$0xf]  ;;  %v4058_v38 = vld [vmem:[#allocation4 + $0x270] sm:$0xf0]  ;;  %v4688_v24 = vld [vmem:[#allocation4 + $0x32c] sm:$0xf0] }
  0xfa   :  { %v4061_v45 = vor.u32 %v4662_v37, %v4058_v38  ;;  %v4615_v26 = vld [vmem:[#allocation4 + $0xec] sm:$0xf] }
  0xfb   :  { %2494 = vmatpush.bf16.msra.mxu1 %v3965_v39  ;;  %v1431_v51 = vpop.f32.mrf.mxu3  ;;  %2460 = vmatpush.bf16.msrb.mxu2 %v4009_v11  ;;  %v3885_v39 = vor.u32 %v4618_v54, %v3882_v55  ;;  %v4641_v11 = vld [vmem:[#allocation4 + $0x1b4] sm:$0xf0]  ;;  %v4658_v54 = vld [vmem:[#allocation4 + $0x244] sm:$0xf]  ;;  %v4042_v55 = vld [vmem:[#allocation4 + $0x250] sm:$0xf0] }
  0xfd   :  { %2481 = vmatpush.bf16.msra.mxu3 %v3837_v58  ;;  %v3757_v58 = vor.u32 %v4586_v42, %v3754_v44  ;;  %v4601_v44 = vld [vmem:[#allocation4 + $0x74] sm:$0xf0] }
  0xfe   :  { %v3809_v51 = vor.u32 %v4601_v44, %v3808_v36  ;;  %v4611_v36 = vld [vmem:[#allocation4 + $0xcc] sm:$0xf]  ;;  %v3858_v44 = vld [vmem:[#allocation4 + $0xd8] sm:$0xf0] }
  0xff   :  { %2495 = vmatpush.bf16.msra.mxu1 %v3949_v41  ;;  %v1444_v29 = vpop.f32.mrf.mxu2  ;;  %2505 = vmatpush.bf16.msra.mxu2 %v4125_v60  ;;  %v4090_v41 = vld [vmem:[#allocation4 + $0x2b0] sm:$0xf0]  ;;  %v3861_v52 = vor.u32 %v4611_v36, %v3858_v44  ;;  %v3778_v44 = vld [vmem:[#allocation4 + $0x38] sm:$0xf0] }
 0x100   :  { %v4093_v14 = vor.u32 %v4670_v10, %v4090_v41  ;;  %v4184_v29 = vld [vmem:[#allocation4 + $0x360] sm:$0xf]  ;;  %v4692_v10 = vld [vmem:[#allocation4 + $0x34c] sm:$0xf0]  ;;  %v3936_v41 = vld [vmem:[#allocation4 + $0x168] sm:$0xf] }
 0x101   :  { %2482 = vmatpush.bf16.msra.mxu3 %v3821_v2  ;;  %v4248_v2 = vld [vmem:[#allocation4 + $0x3e0] sm:$0xf]  ;;  %v4169_v13 = vor.u32 %v4692_v10, %v4168_v8  ;;  %v4643_v10 = vld [vmem:[#allocation4 + $0x1cc] sm:$0xf] }
 0x102   :  { %v4249_v4 = vor.u32 %v4712_v3, %v4248_v2 }
 0x103   :  { %2496 = vmatpush.bf16.msra.mxu1 %v3933_v48  ;;  %2506 = vmatpush.bf16.msra.mxu2 %v4109_v1  ;;  %v1455_v12 = vpop.f32.mrf.mxu3  ;;  %v3824_v48 = vld [vmem:[#allocation4 + $0x88] sm:$0xf]  ;;  %v4026_v1 = vld [vmem:[#allocation4 + $0x230] sm:$0xf0] }
 0x104   :  { %2466 = vmatpush.bf16.msrb.mxu0 %v4249_v4  ;;  %v1456_v17 = vadd.f32 %v1455_v12, %v1443_v5  ;;  %v3825_v33 = vor.u32 %v4605_v23, %v3824_v48  ;;  %v4593_v5 = vld [vmem:[#allocation4 + $0x34] sm:$0xf0]  ;;  %v4152_v23 = vld [vmem:[#allocation4 + $0x320] sm:$0xf] }
 0x105   :  { %2483 = vmatpush.bf16.msra.mxu3 %v3805_v15  ;;  %v4232_v15 = vld [vmem:[#allocation4 + $0x3c0] sm:$0xf]  ;;  %v4633_v12 = vld [vmem:[#allocation4 + $0x174] sm:$0xf0] }
 0x106   :  { %v4233_v57 = vor.u32 %v4708_v16, %v4232_v15  ;;  %v1642_v21 = vmax.f32 %v1456_v17, 0.0  ;;  %v3760_v15 = vld [vmem:[#allocation4 + $0x8] sm:$0xf]  ;;  %v3777_v17 = vor.u32 %v4593_v5, %v3776_v63  ;;  %v3937_v48 = vor.u32 %v4633_v12, %v3936_v41  ;;  %v4702_v5 = vld [vmem:[#allocation4 + $0x3a4] sm:$0xf] }
 0x107   :  { %2497 = vmatpush.bf16.msra.mxu1 %v3917_v35  ;;  %2507 = vmatpush.bf16.msra.mxu2 %v4093_v14 }
 0x108   :  { %2467 = vmatpush.bf16.msrb.mxu0 %v4233_v57  ;;  %v4943_v9 = vpack.c.bf16 %v1642_v21, %v1642_v21  ;;  %v4010_v57 = vld [vmem:[#allocation4 + $0x210] sm:$0xf0]  ;;  %v3920_v21 = vld [vmem:[#allocation4 + $0x148] sm:$0xf] }
 0x109   :  { %2484 = vmatpush.bf16.msra.mxu3 %v3789_v27  ;;  %v4216_v27 = vld [vmem:[#allocation4 + $0x3a0] sm:$0xf] }
 0x10a   :  { %v4217_v35 = vor.u32 %v4704_v28, %v4216_v27  ;;  %2448 = vmatmul.bf16.vlgmr.msrb.gmra.mxu1 %v4943_v9  ;;  %v3874_v27 = vld [vmem:[#allocation4 + $0xf8] sm:$0xf0]  ;;  %v4153_v28 = vor.u32 %v4688_v24, %v4152_v23  ;;  %v4595_v23 = vld [vmem:[#allocation4 + $0x4c] sm:$0xf] }
 0x10b   :  { %2498 = vmatpush.bf16.msra.mxu1 %v3901_v20  ;;  %v1457_v40 = vpop.f32.mrf.mxu3  ;;  %v4946_v42 = vpop.f32.mrf.mxu0  ;;  %2508 = vmatpush.bf16.msra.mxu2 %v4077_v32  ;;  %v3968_v20 = vld [vmem:[#allocation4 + $0x1a8] sm:$0xf]  ;;  %v4625_v32 = vld [vmem:[#allocation4 + $0x134] sm:$0xf0] }
 0x10c   :  { %2468 = vmatpush.bf16.msrb.mxu0 %v4217_v35  ;;  %v4948_v50 = vpop.f32.mrf.mxu1  ;;  %v3969_v60 = vor.u32 %v4641_v11, %v3968_v20  ;;  %v4136_v40 = vld [vmem:[#allocation4 + $0x300] sm:$0xf]  ;;  %v263_v20 = vperm.slane %v4916_v6, 2 }
 0x10d   :  { %2485 = vmatpush.bf16.msra.mxu3 %v3773_v43  ;;  %v3985_v43 = vor.u32 %v4645_v31, %v3984_v30  ;;  %v3761_v30 = vor.u32 %v4589_v18, %v3760_v15  ;;  %v3904_v31 = vld [vmem:[#allocation4 + $0x128] sm:$0xf]  ;;  %v4599_v15 = vld [vmem:[#allocation4 + $0x6c] sm:$0xf]  ;;  %v4698_v18 = vld [vmem:[#allocation4 + $0x384] sm:$0xf] }
 0x10f   :  { %2499 = vmatpush.bf16.msra.mxu1 %v3885_v39  ;;  %2509 = vmatpush.bf16.msra.mxu2 %v4061_v45  ;;  %v4185_v39 = vor.u32 %v4696_v59, %v4184_v29  ;;  %v4234_v29 = vld [vmem:[#allocation4 + $0x3d0] sm:$0xf0]  ;;  %v1469_v59 = vadd.f32 %v4948_v50, %v263_v20  ;;  %v3986_v50 = vld [vmem:[#allocation4 + $0x1d8] sm:$0xf0]  ;;  %v4631_v20 = vld [vmem:[#allocation4 + $0x16c] sm:$0xf] }
 0x110   :  { %2469 = vmatpush.bf16.msrb.mxu0 %v4201_v49  ;;  %v4253_v49 = vor.u32 %v4710_v46, %v4250_v47  ;;  %v4170_v46 = vld [vmem:[#allocation4 + $0x350] sm:$0xf0] }
 0x111   :  { %2486 = vmatpush.bf16.msra.mxu3 %v3757_v58  ;;  %v4045_v58 = vor.u32 %v4658_v54, %v4042_v55  ;;  %v3888_v54 = vld [vmem:[#allocation4 + $0x108] sm:$0xf]  ;;  %v4621_v55 = vld [vmem:[#allocation4 + $0x114] sm:$0xf0] }
 0x113   :  { %2544 = vmatpush.bf16.msrb.mxu1 %v4001_v25  ;;  %v1496_v3 = vpop.f32.mrf.mxu0  ;;  %2510 = vmatpush.bf16.msra.mxu2 %v4045_v58  ;;  %v4629_v25 = vld [vmem:[#allocation4 + $0x154] sm:$0xf0]  ;;  %v4706_v58 = vld [vmem:[#allocation4 + $0x3c4] sm:$0xf] }
 0x114   :  { %2487 = vmatmul.bf16.vlgmr.msra.gmra.mxu3 %v4936_v53  ;;  %2470 = vmatpush.bf16.msrb.mxu0 %v4185_v39  ;;  %v1470_v16 = vpop.f32.mrf.mxu1  ;;  %v3921_v35 = vor.u32 %v4629_v25, %v3920_v21  ;;  %v4237_v39 = vor.u32 %v4706_v58, %v4234_v29  ;;  %v3970_v21 = vld [vmem:[#allocation4 + $0x1b8] sm:$0xf0]  ;;  %v4686_v29 = vld [vmem:[#allocation4 + $0x324] sm:$0xf] }
 0x115   :  { %2531 = vmatpush.bf16.msrb.mxu3 %v3873_v34  ;;  %v3952_v34 = vld [vmem:[#allocation4 + $0x188] sm:$0xf]  ;;  %v3989_v16 = vor.u32 %v4643_v10, %v3986_v50  ;;  %v3794_v25 = vld [vmem:[#allocation4 + $0x58] sm:$0xf0]  ;;  %v4138_v10 = vld [vmem:[#allocation4 + $0x310] sm:$0xf0] }
 0x116   :  { %v3953_v4 = vor.u32 %v4637_v61, %v3952_v34  ;;  %v4647_v34 = vld [vmem:[#allocation4 + $0x1ec] sm:$0xf]  ;;  %v4002_v61 = vld [vmem:[#allocation4 + $0x1f8] sm:$0xf0] }
 0x117   :  { %2545 = vmatpush.bf16.msrb.mxu1 %v3985_v43  ;;  %v4950_v2 = vpop.f32.mrf.mxu3  ;;  %v4952_v14 = vpop.f32.mrf.mxu2  ;;  %v4684_v43 = vld [vmem:[#allocation4 + $0x30c] sm:$0xf0]  ;;  %v4005_v3 = vor.u32 %v4647_v34, %v4002_v61  ;;  %v3762_v58 = vld [vmem:[#allocation4 + $0x18] sm:$0xf0]  ;;  %v4627_v61 = vld [vmem:[#allocation4 + $0x14c] sm:$0xf] }
 0x118   :  { %2471 = vmatpush.bf16.msrb.mxu0 %v4169_v13  ;;  %v4137_v45 = vor.u32 %v4684_v43, %v4136_v40  ;;  %v1482_v8 = vadd.f32 %v4950_v2, %v1469_v59  ;;  %v4154_v59 = vld [vmem:[#allocation4 + $0x330] sm:$0xf0]  ;;  %v4623_v50 = vld [vmem:[#allocation4 + $0x12c] sm:$0xf] }
 0x119   :  { %2532 = vmatpush.bf16.msrb.mxu3 %v3857_v7  ;;  %v4029_v7 = vor.u32 %v4654_v0, %v4026_v1  ;;  %v4603_v0 = vld [vmem:[#allocation4 + $0x8c] sm:$0xf] }
 0x11a   :  { %2500 = vmatmul.bf16.vlgmr.msra.gmra.mxu1 %v4943_v9 }
 0x11b   :  { %2546 = vmatpush.bf16.msrb.mxu1 %v3969_v60  ;;  %2511 = vmatpush.bf16.msra.mxu2 %v4029_v7  ;;  %v4955_v38 = vpop.f32.mrf.mxu0  ;;  %v4607_v60 = vld [vmem:[#allocation4 + $0xac] sm:$0xf]  ;;  %v4218_v7 = vld [vmem:[#allocation4 + $0x3b0] sm:$0xf0] }
 0x11c   :  { %2472 = vmatpush.bf16.msrb.mxu0 %v4153_v28  ;;  %v3845_v63 = vor.u32 %v4607_v60, %v3842_v56  ;;  %v4221_v41 = vor.u32 %v4702_v5, %v4218_v7  ;;  %v4587_v60 = vld [vmem:[#allocation4 + $0xc] sm:$0xf] }
 0x11d   :  { %2533 = vmatpush.bf16.msrb.mxu3 %v3841_v22  ;;  %v4013_v22 = vor.u32 %v4650_v19, %v4010_v57  ;;  %v4202_v19 = vld [vmem:[#allocation4 + $0x390] sm:$0xf0]  ;;  %v1495_v57 = vadd.f32 %v4946_v42, %v1482_v8  ;;  %v4682_v8 = vld [vmem:[#allocation4 + $0x304] sm:$0xf] }
 0x11e   :  { %v4205_v2 = vor.u32 %v4698_v18, %v4202_v19  ;;  %v4619_v19 = vld [vmem:[#allocation4 + $0x10c] sm:$0xf] }
 0x11f   :  { %2547 = vmatpush.bf16.msrb.mxu1 %v3953_v4  ;;  %v1483_v37 = vpop.f32.mrf.mxu3  ;;  %2512 = vmatpush.bf16.msra.mxu2 %v4013_v22  ;;  %v1509_v11 = vpop.f32.mrf.mxu2  ;;  %v3826_v4 = vld [vmem:[#allocation4 + $0x98] sm:$0xf0]  ;;  %v1508_v28 = vadd.f32 %v4952_v14, %v1495_v57 }
 0x120   :  { %2473 = vmatpush.bf16.msrb.mxu0 %v4137_v45  ;;  %v3829_v13 = vor.u32 %v4603_v0, %v3826_v4  ;;  %v4591_v37 = vld [vmem:[#allocation4 + $0x2c] sm:$0xf]  ;;  %v4690_v45 = vld [vmem:[#allocation4 + $0x344] sm:$0xf]  ;;  %v3938_v14 = vld [vmem:[#allocation4 + $0x178] sm:$0xf0] }
 0x121   :  { %2534 = vmatpush.bf16.msrb.mxu3 %v3825_v33  ;;  %v3877_v33 = vor.u32 %v4615_v26, %v3874_v27  ;;  %v4694_v26 = vld [vmem:[#allocation4 + $0x364] sm:$0xf]  ;;  %v4186_v27 = vld [vmem:[#allocation4 + $0x370] sm:$0xf0]  ;;  %v3941_v56 = vor.u32 %v4631_v20, %v3938_v14  ;;  %v4677_v4 = vld [vmem:[#allocation4 + $0x2d4] sm:$0xf0] }
 0x122   :  { %v4189_v42 = vor.u32 %v4694_v26, %v4186_v27  ;;  %v3890_v57 = vld [vmem:[#allocation4 + $0x118] sm:$0xf0]  ;;  %v4665_v26 = vld [vmem:[#allocation4 + $0x274] sm:$0xf0]  ;;  %v4679_v14 = vld [vmem:[#allocation4 + $0x2ec] sm:$0xf] }
 0x123   :  { %2548 = vmatpush.bf16.msrb.mxu1 %v3937_v48  ;;  %v1548_v1 = vpop.f32.mrf.mxu0  ;;  %v4639_v48 = vld [vmem:[#allocation4 + $0x1ac] sm:$0xf] }
 0x124   :  { %2518 = vmatpush.bf16.msra.mxu0 %v4253_v49  ;;  %v3973_v24 = vor.u32 %v4639_v48, %v3970_v21  ;;  %v4173_v49 = vor.u32 %v4690_v45, %v4170_v46  ;;  %v4080_v21 = vld [vmem:[#allocation4 + $0x288] sm:$0xf] }
 0x125   :  { %2535 = vmatpush.bf16.msrb.mxu3 %v3809_v51  ;;  %v3905_v51 = vor.u32 %v4625_v32, %v3904_v31  ;;  %v3954_v31 = vld [vmem:[#allocation4 + $0x198] sm:$0xf0] }
 0x127   :  { %2549 = vmatpush.bf16.msrb.mxu1 %v3921_v35 }
 0x128   :  { %2519 = vmatpush.bf16.msra.mxu0 %v4237_v39  ;;  %v3922_v39 = vld [vmem:[#allocation4 + $0x158] sm:$0xf0] }
 0x129   :  { %2536 = vmatpush.bf16.msrb.mxu3 %v3793_v62  ;;  %v3889_v62 = vor.u32 %v4621_v55, %v3888_v54  ;;  %v4128_v54 = vld [vmem:[#allocation4 + $0x2e8] sm:$0xf]  ;;  %v4681_v55 = vld [vmem:[#allocation4 + $0x2f4] sm:$0xf0]  ;;  %v3925_v5 = vor.u32 %v4627_v61, %v3922_v39 }
 0x12a   :  { %v4129_v0 = vor.u32 %v4681_v55, %v4128_v54  ;;  %v4675_v55 = vld [vmem:[#allocation4 + $0x2cc] sm:$0xf] }
 0x12b   :  { %2550 = vmatpush.bf16.msrb.mxu1 %v3905_v51  ;;  %v1520_v12 = vpop.f32.mrf.mxu1 }
 0x12c   :  { %2520 = vmatpush.bf16.msra.mxu0 %v4221_v41  ;;  %v1521_v35 = vadd.f32 %v1520_v12, %v1508_v28  ;;  %v3906_v41 = vld [vmem:[#allocation4 + $0x138] sm:$0xf0] }
 0x12d   :  { %2537 = vmatpush.bf16.msrb.mxu3 %v3777_v17  ;;  %v3810_v17 = vld [vmem:[#allocation4 + $0x78] sm:$0xf0]  ;;  %v3909_v18 = vor.u32 %v4623_v50, %v3906_v41  ;;  %v4224_v41 = vld [vmem:[#allocation4 + $0x3a8] sm:$0xf] }
 0x12e   :  { %v3813_v22 = vor.u32 %v4599_v15, %v3810_v17  ;;  %v4673_v17 = vld [vmem:[#allocation4 + $0x2b4] sm:$0xf0]  ;;  %v4082_v50 = vld [vmem:[#allocation4 + $0x298] sm:$0xf0] }
 0x12f   :  { %2551 = vmatpush.bf16.msrb.mxu1 %v3889_v62  ;;  %v4964_v32 = vpop.f32.mrf.mxu0 }
 0x130   :  { %2521 = vmatpush.bf16.msra.mxu0 %v4205_v2  ;;  %v4669_v2 = vld [vmem:[#allocation4 + $0x294] sm:$0xf0] }
 0x131   :  { %2538 = vmatpush.bf16.msrb.mxu3 %v3761_v30  ;;  %v4635_v30 = vld [vmem:[#allocation4 + $0x18c] sm:$0xf] }
 0x132   :  { %2552 = vmatmul.bf16.vlgmr.msrb.gmra.mxu1 %v4943_v9  ;;  %v3957_v43 = vor.u32 %v4635_v30, %v3954_v31  ;;  %v4048_v31 = vld [vmem:[#allocation4 + $0x248] sm:$0xf] }
 0x133   :  { %2596 = vmatpush.bf16.msra.mxu1 %v4005_v3  ;;  %v1522_v36 = vpop.f32.mrf.mxu1  ;;  %v4112_v3 = vld [vmem:[#allocation4 + $0x2c8] sm:$0xf] }
 0x134   :  { %2539 = vmatmul.bf16.vlgmr.msrb.gmra.mxu3 %v4936_v53  ;;  %2522 = vmatpush.bf16.msra.mxu0 %v4189_v42  ;;  %v4113_v15 = vor.u32 %v4677_v4, %v4112_v3  ;;  %v4657_v36 = vld [vmem:[#allocation4 + $0x234] sm:$0xf0]  ;;  %v4240_v3 = vld [vmem:[#allocation4 + $0x3c8] sm:$0xf] }
 0x135   :  { %2583 = vmatpush.bf16.msra.mxu3 %v3877_v33  ;;  %v3797_v33 = vor.u32 %v4595_v23, %v3794_v25  ;;  %v3893_v23 = vor.u32 %v4619_v19, %v3890_v57  ;;  %v4064_v25 = vld [vmem:[#allocation4 + $0x268] sm:$0xf]  ;;  %v4709_v4 = vld [vmem:[#allocation4 + $0x3d4] sm:$0xf0] }
 0x136   :  { %v4065_v30 = vor.u32 %v4665_v26, %v4064_v25  ;;  %v4701_v19 = vld [vmem:[#allocation4 + $0x394] sm:$0xf0]  ;;  %v4655_v26 = vld [vmem:[#allocation4 + $0x22c] sm:$0xf] }
 0x137   :  { %2597 = vmatpush.bf16.msra.mxu1 %v3989_v16  ;;  %v1533_v40 = vpop.f32.mrf.mxu3  ;;  %v1559_v11 = vpop.f32.mrf.mxu2  ;;  %v4096_v16 = vld [vmem:[#allocation4 + $0x2a8] sm:$0xf] }
 0x138   :  { %v1534_v47 = vadd.f32 %v1533_v40, %v1521_v35  ;;  %v1574_v62 = vpop.f32.mrf.mxu0  ;;  %2523 = vmatpush.bf16.msra.mxu0 %v4173_v49  ;;  %v4097_v48 = vor.u32 %v4673_v17, %v4096_v16  ;;  %v4663_v16 = vld [vmem:[#allocation4 + $0x26c] sm:$0xf]  ;;  %v4066_v17 = vld [vmem:[#allocation4 + $0x278] sm:$0xf0] }
 0x139   :  { %2584 = vmatpush.bf16.msra.mxu3 %v3861_v52  ;;  %v3781_v52 = vor.u32 %v4591_v37, %v3778_v44  ;;  %v4069_v57 = vor.u32 %v4663_v16, %v4066_v17 }
 0x13a   :  { %v1547_v51 = vadd.f32 %v4955_v38, %v1534_v47  ;;  %v3765_v38 = vor.u32 %v4587_v60, %v3762_v58  ;;  %v4016_v47 = vld [vmem:[#allocation4 + $0x208] sm:$0xf]  ;;  %v4114_v60 = vld [vmem:[#allocation4 + $0x2d8] sm:$0xf0] }
 0x13b   :  { %2598 = vmatpush.bf16.msra.mxu1 %v3973_v24  ;;  %v4081_v24 = vor.u32 %v4669_v2, %v4080_v21  ;;  %v4117_v39 = vor.u32 %v4675_v55, %v4114_v60  ;;  %v4659_v21 = vld [vmem:[#allocation4 + $0x24c] sm:$0xf]  ;;  %v4050_v2 = vld [vmem:[#allocation4 + $0x258] sm:$0xf0]  ;;  %v4985_v60 = vld [vmem:[%s5110_s4] sm:$0xf] }
 0x13c   :  { %v1643_v34 = vmax.f32 %v1547_v51, 0.0  ;;  %v4210_v55 = vld [vmem:[#allocation4 + $0x398] sm:$0xf0] }
 0x13d   :  { %2585 = vmatpush.bf16.msra.mxu3 %v3845_v63  ;;  %v4157_v63 = vor.u32 %v4686_v29, %v4154_v59  ;;  %v4256_v29 = vld [vmem:[#allocation4 + $0x3e8] sm:$0xf]  ;;  %v4713_v59 = vld [vmem:[#allocation4 + $0x3f4] sm:$0xf0] }
 0x13e   :  { %v4967_v1 = vpack.c.bf16 %v1643_v34, %v1643_v34  ;;  %v4257_v62 = vor.u32 %v4713_v59, %v4256_v29  ;;  %v4194_v29 = vld [vmem:[#allocation4 + $0x378] sm:$0xf0] }
 0x13f   :  { %2599 = vmatpush.bf16.msra.mxu1 %v3957_v43  ;;  %v1535_v7 = vpop.f32.mrf.mxu3  ;;  %v1561_v12 = vpop.f32.mrf.mxu2  ;;  %2524 = vmatpush.bf16.msra.mxu0 %v4157_v63  ;;  %v4671_v63 = vld [vmem:[#allocation4 + $0x2ac] sm:$0xf] }
 0x140   :  { %2461 = vmatmul.bf16.vlgmr.msrb.gmra.mxu2 %v4967_v1  ;;  %v4705_v12 = vld [vmem:[#allocation4 + $0x3b4] sm:$0xf0] }
 0x141   :  { %2586 = vmatpush.bf16.msra.mxu3 %v3829_v13  ;;  %v4141_v13 = vor.u32 %v4682_v8, %v4138_v10  ;;  %2557 = vmatpush.bf16.msrb.mxu2 %v4129_v0  ;;  %v4098_v0 = vld [vmem:[#allocation4 + $0x2b8] sm:$0xf0]  ;;  %v4241_v8 = vor.u32 %v4709_v4, %v4240_v3  ;;  %v4667_v10 = vld [vmem:[#allocation4 + $0x28c] sm:$0xf] }
 0x142   :  { %v4687_v4 = vld [vmem:[#allocation4 + $0x32c] sm:$0xf] }
 0x143   :  { %2600 = vmatpush.bf16.msra.mxu1 %v3941_v56  ;;  %2525 = vmatpush.bf16.msra.mxu0 %v4141_v13  ;;  %v4085_v13 = vor.u32 %v4667_v10, %v4082_v50  ;;  %v4146_v10 = vld [vmem:[#allocation4 + $0x318] sm:$0xf0] }
 0x145   :  { %2587 = vmatpush.bf16.msra.mxu3 %v3813_v22  ;;  %2558 = vmatpush.bf16.msrb.mxu2 %v4113_v15  ;;  %v264_v22 = vperm.slane %v4916_v6, 3  ;;  %v4225_v15 = vor.u32 %v4705_v12, %v4224_v41 }
 0x147   :  { %2601 = vmatpush.bf16.msra.mxu1 %v3925_v5  ;;  %v1560_v27 = vadd.f32 %v1559_v11, %v264_v22  ;;  %v4130_v11 = vld [vmem:[#allocation4 + $0x2f8] sm:$0xf0]  ;;  %v4101_v5 = vor.u32 %v4671_v63, %v4098_v0  ;;  %v4192_v22 = vld [vmem:[#allocation4 + $0x368] sm:$0xf] }
 0x149   :  { %2588 = vmatpush.bf16.msra.mxu3 %v3797_v33  ;;  %2559 = vmatpush.bf16.msrb.mxu2 %v4097_v48  ;;  %v1573_v42 = vadd.f32 %v4964_v32, %v1560_v27  ;;  %v4032_v33 = vld [vmem:[#allocation4 + $0x228] sm:$0xf]  ;;  %v4034_v27 = vld [vmem:[#allocation4 + $0x238] sm:$0xf0] }
 0x14a   :  { %v4033_v46 = vor.u32 %v4657_v36, %v4032_v33  ;;  %v4160_v33 = vld [vmem:[#allocation4 + $0x328] sm:$0xf]  ;;  %v4689_v36 = vld [vmem:[#allocation4 + $0x334] sm:$0xf0] }
 0x14b   :  { %2602 = vmatpush.bf16.msra.mxu1 %v3909_v18  ;;  %v1585_v28 = vpop.f32.mrf.mxu1  ;;  %v4208_v18 = vld [vmem:[#allocation4 + $0x388] sm:$0xf] }
 0x14c   :  { %v1586_v37 = vadd.f32 %v1585_v28, %v1573_v42  ;;  %v4209_v48 = vor.u32 %v4701_v19, %v4208_v18  ;;  %v4176_v28 = vld [vmem:[#allocation4 + $0x348] sm:$0xf]  ;;  %v4721_v18 = vld [vmem:[%s5111_s5 + $0x38] sm:$0xff] }
 0x14d   :  { %2589 = vmatpush.bf16.msra.mxu3 %v3781_v52  ;;  %2560 = vmatpush.bf16.msrb.mxu2 %v4081_v24  ;;  %v4133_v52 = vor.u32 %v4679_v14, %v4130_v11  ;;  %v4053_v24 = vor.u32 %v4659_v21, %v4050_v2  ;;  %v4707_v14 = vld [vmem:[#allocation4 + $0x3cc] sm:$0xf]  ;;  %v4242_v11 = vld [vmem:[#allocation4 + $0x3d8] sm:$0xf0] }
 0x14f   :  { %2603 = vmatpush.bf16.msra.mxu1 %v3893_v23  ;;  %v1624_v6 = vpop.f32.mrf.mxu0  ;;  %v4697_v23 = vld [vmem:[#allocation4 + $0x374] sm:$0xf0] }
 0x150   :  { %2513 = vmatmul.bf16.vlgmr.msra.gmra.mxu2 %v4967_v1  ;;  %v4193_v25 = vor.u32 %v4697_v23, %v4192_v22  ;;  %v4719_v22 = vld [vmem:[%s5111_s5 + $0x28] sm:$0xff] }
 0x151   :  { %2590 = vmatpush.bf16.msra.mxu3 %v3765_v38  ;;  %2561 = vmatpush.bf16.msrb.mxu2 %v4065_v30  ;;  %v4693_v30 = vld [vmem:[#allocation4 + $0x354] sm:$0xf0] }
 0x152   :  { %2604 = vmatmul.bf16.vlgmr.msra.gmra.mxu1 %v4943_v9  ;;  %v4653_v9 = vld [vmem:[#allocation4 + $0x214] sm:$0xf0]  ;;  %v4177_v42 = vor.u32 %v4693_v30, %v4176_v28  ;;  %v4716_v30 = vld [vmem:[%s5111_s5 + $0x10] sm:$0xff] }
 0x153   :  { %v1587_v40 = vpop.f32.mrf.mxu1  ;;  %v4017_v51 = vor.u32 %v4653_v9, %v4016_v47  ;;  %v4258_v47 = vld [vmem:[#allocation4 + $0x3f8] sm:$0xf0] }
 0x154   :  { %2591 = vmatmul.bf16.vlgmr.msra.gmra.mxu3 %v4936_v53  ;;  %v4661_v53 = vld [vmem:[#allocation4 + $0x254] sm:$0xf0]  ;;  %v4161_v40 = vor.u32 %v4689_v36, %v4160_v33  ;;  %v1782_v36 = vperm.slane %v4985_v60, 3 }
 0x155   :  { %v4049_v35 = vor.u32 %v4661_v53, %v4048_v31  ;;  %v4037_v53 = vor.u32 %v4655_v26, %v4034_v27  ;;  %2903 = vmatpush.bf16.msrb.mxu3 %v4721_v18  ;;  %v4717_v26 = vld [vmem:[%s5111_s5 + $0x18] sm:$0xff] }
 0x156   :  { %v4729_v27 = vld [vmem:[%s5111_s5 + $0x78] sm:$0xff] }
 0x157   :  { %v1598_v43 = vpop.f32.mrf.mxu3  ;;  %v1611_v45 = vpop.f32.mrf.mxu2  ;;  %2562 = vmatpush.bf16.msrb.mxu2 %v4049_v35  ;;  %v4018_v35 = vld [vmem:[#allocation4 + $0x218] sm:$0xf0]  ;;  %2916 = vmatpush.bf16.msrb.mxu1 %v4729_v27 }
 0x158   :  { %v1599_v44 = vadd.f32 %v1598_v43, %v1586_v37  ;;  %v1626_v32 = vpop.f32.mrf.mxu0  ;;  %v4144_v43 = vld [vmem:[#allocation4 + $0x308] sm:$0xf] }
 0x159   :  { %v4245_v32 = vor.u32 %v4707_v14, %v4242_v11  ;;  %v4723_v14 = vld [vmem:[%s5111_s5 + $0x48] sm:$0xff] }
 0x15a   :  { %v1612_v20 = vadd.f32 %v1611_v45, %v1599_v44  ;;  %v4685_v44 = vld [vmem:[#allocation4 + $0x314] sm:$0xf0]  ;;  %v4735_v11 = vld [vmem:[%s5111_s5 + $0xa8] sm:$0xff] }
 0x15b   :  { %2563 = vmatpush.bf16.msrb.mxu2 %v4033_v46  ;;  %v1637_v54 = vpop.f32.mrf.mxu1  ;;  %v4711_v46 = vld [vmem:[#allocation4 + $0x3ec] sm:$0xf]  ;;  %v4145_v9 = vor.u32 %v4685_v44, %v4144_v43 }
 0x15c   :  { %v1625_v49 = vadd.f32 %v1624_v6, %v1612_v20  ;;  %v4651_v6 = vld [vmem:[#allocation4 + $0x20c] sm:$0xf]  ;;  %v4261_v20 = vor.u32 %v4711_v46, %v4258_v47  ;;  %v4736_v46 = vld [vmem:[%s5111_s5 + $0xb0] sm:$0xff] }
 0x15d   :  { %v4021_v37 = vor.u32 %v4651_v6, %v4018_v35  ;;  %v4714_v6 = vld [vmem:[%s5111_s5] sm:$0xff] }
 0x15e   :  { %v1638_v56 = vadd.f32 %v1637_v54, %v1625_v49  ;;  %v4703_v49 = vld [vmem:[#allocation4 + $0x3ac] sm:$0xf]  ;;  %v4726_v35 = vld [vmem:[%s5111_s5 + $0x60] sm:$0xff] }
 0x15f   :  { %v1600_v58 = vpop.f32.mrf.mxu3  ;;  %v1613_v34 = vpop.f32.mrf.mxu2  ;;  %2564 = vmatpush.bf16.msrb.mxu2 %v4017_v51  ;;  %v4226_v51 = vld [vmem:[#allocation4 + $0x3b8] sm:$0xf0]  ;;  %v4699_v54 = vld [vmem:[#allocation4 + $0x38c] sm:$0xf] }
 0x160   :  { %v1644_v61 = vmax.f32 %v1638_v56, 0.0  ;;  %v1779_v56 = vperm.slane %v4985_v60, 0  ;;  %v4695_v58 = vld [vmem:[#allocation4 + $0x36c] sm:$0xf] }
 0x161   :  { %v4197_v59 = vor.u32 %v4695_v58, %v4194_v29  ;;  %v4731_v58 = vld [vmem:[%s5111_s5 + $0x88] sm:$0xff] }
 0x162   :  { %v4975_v38 = vpack.c.bf16 %v1644_v61, %v1644_v61  ;;  %2565 = vmatmul.bf16.vlgmr.msrb.gmra.mxu2 %v4967_v1  ;;  %v4691_v61 = vld [vmem:[#allocation4 + $0x34c] sm:$0xf] }
 0x163   :  { %2609 = vmatpush.bf16.msra.mxu2 %v4133_v52  ;;  %v1639_v7 = vpop.f32.mrf.mxu1  ;;  %v4229_v52 = vor.u32 %v4703_v49, %v4226_v51  ;;  %v4722_v49 = vld [vmem:[%s5111_s5 + $0x40] sm:$0xff] }
 0x164   :  { %2474 = vmatmul.bf16.vlgmr.msrb.gmra.mxu0 %v4975_v38  ;;  %v4734_v51 = vld [vmem:[%s5111_s5 + $0xa0] sm:$0xff] }
 0x165   :  { %2570 = vmatpush.bf16.msrb.mxu0 %v4257_v62 }
 0x167   :  { %2610 = vmatpush.bf16.msra.mxu2 %v4117_v39  ;;  %v4178_v39 = vld [vmem:[#allocation4 + $0x358] sm:$0xf0] }
 0x168   :  { %v4181_v3 = vor.u32 %v4691_v61, %v4178_v39  ;;  %v4730_v61 = vld [vmem:[%s5111_s5 + $0x80] sm:$0xff]  ;;  %v4745_v39 = vld [vmem:[%s5111_s5 + $0xf8] sm:$0xff] }
 0x169   :  { %2571 = vmatpush.bf16.msrb.mxu0 %v4241_v8  ;;  %v4683_v8 = vld [vmem:[#allocation4 + $0x30c] sm:$0xf] }
 0x16a   :  { %v4149_v12 = vor.u32 %v4683_v8, %v4146_v10 }
 0x16b   :  { %2611 = vmatpush.bf16.msra.mxu2 %v4101_v5  ;;  %v4162_v5 = vld [vmem:[#allocation4 + $0x338] sm:$0xf0] }
 0x16c   :  { %v4165_v7 = vor.u32 %v4687_v4, %v4162_v5  ;;  %v4743_v4 = vld [vmem:[%s5111_s5 + $0xe8] sm:$0xff] }
 0x16d   :  { %2572 = vmatpush.bf16.msrb.mxu0 %v4225_v15 }
 0x16f   :  { %2612 = vmatpush.bf16.msra.mxu2 %v4085_v13  ;;  %v1780_v13 = vperm.slane %v4985_v60, 1 }
 0x171   :  { %2573 = vmatpush.bf16.msrb.mxu0 %v4209_v48  ;;  %v4720_v48 = vld [vmem:[%s5111_s5 + $0x30] sm:$0xff] }
 0x172   :  { %2904 = vmatpush.bf16.msrb.mxu3 %v4720_v48 }
 0x173   :  { %2613 = vmatpush.bf16.msra.mxu2 %v4069_v57  ;;  %v1781_v57 = vperm.slane %v4985_v60, 2  ;;  %v4732_v60 = vld [vmem:[%s5111_s5 + $0x90] sm:$0xff] }
 0x174   :  { %2526 = vmatmul.bf16.vlgmr.msra.gmra.mxu0 %v4975_v38 }
 0x175   :  { %2574 = vmatpush.bf16.msrb.mxu0 %v4193_v25 }
 0x176   :  { %2905 = vmatpush.bf16.msrb.mxu3 %v4719_v22 }
 0x177   :  { %v2436_v31 = vpop.f32.mrf.mxu3  ;;  %2614 = vmatpush.bf16.msra.mxu2 %v4053_v24  ;;  %v4718_v24 = vld [vmem:[%s5111_s5 + $0x20] sm:$0xff] }
 0x178   :  { %v2437_v34 = vadd.f32 %v2436_v31, %v1779_v56  ;;  %v4728_v31 = vld [vmem:[%s5111_s5 + $0x70] sm:$0xff] }
 0x179   :  { %2575 = vmatpush.bf16.msrb.mxu0 %v4177_v42  ;;  %2917 = vmatpush.bf16.msrb.mxu1 %v4728_v31  ;;  %v4727_v42 = vld [vmem:[%s5111_s5 + $0x68] sm:$0xff] }
 0x17a   :  { %2906 = vmatpush.bf16.msrb.mxu3 %v4718_v24 }
 0x17b   :  { %2615 = vmatpush.bf16.msra.mxu2 %v4037_v53  ;;  %v4715_v53 = vld [vmem:[%s5111_s5 + $0x8] sm:$0xff] }
 0x17d   :  { %2576 = vmatpush.bf16.msrb.mxu0 %v4161_v40  ;;  %2918 = vmatpush.bf16.msrb.mxu1 %v4727_v42  ;;  %v4737_v40 = vld [vmem:[%s5111_s5 + $0xb8] sm:$0xff] }
 0x17e   :  { %2907 = vmatpush.bf16.msrb.mxu3 %v4717_v26 }
 0x17f   :  { %v2438_v45 = vpop.f32.mrf.mxu3  ;;  %2616 = vmatpush.bf16.msra.mxu2 %v4021_v37  ;;  %v4725_v37 = vld [vmem:[%s5111_s5 + $0x58] sm:$0xff] }
 0x180   :  { %v4724_v45 = vld [vmem:[%s5111_s5 + $0x50] sm:$0xff] }
 0x181   :  { %2577 = vmatpush.bf16.msrb.mxu0 %v4145_v9  ;;  %2919 = vmatpush.bf16.msrb.mxu1 %v4726_v35 }
 0x182   :  { %2617 = vmatmul.bf16.vlgmr.msra.gmra.mxu2 %v4967_v1  ;;  %v4213_v1 = vor.u32 %v4699_v54, %v4210_v55  ;;  %2908 = vmatpush.bf16.msrb.mxu3 %v4716_v30  ;;  %v4733_v55 = vld [vmem:[%s5111_s5 + $0x98] sm:$0xff] }
 0x183   :  { %2929 = vmatpush.bf16.msrb.mxu2 %v4737_v40 }
 0x184   :  { %2578 = vmatmul.bf16.vlgmr.msrb.gmra.mxu0 %v4975_v38 }
 0x185   :  { %2622 = vmatpush.bf16.msra.mxu0 %v4261_v20  ;;  %2920 = vmatpush.bf16.msrb.mxu1 %v4725_v37 }
 0x186   :  { %2909 = vmatpush.bf16.msrb.mxu3 %v4715_v53 }
 0x187   :  { %v2449_v62 = vpop.f32.mrf.mxu1  ;;  %2930 = vmatpush.bf16.msrb.mxu2 %v4736_v46 }
 0x188   :  { %v4988_v0 = vadd.f32 %v2449_v62, %v2437_v34 }
 0x189   :  { %2623 = vmatpush.bf16.msra.mxu0 %v4245_v32  ;;  %2921 = vmatpush.bf16.msrb.mxu1 %v4724_v45 }
 0x18a   :  { %2910 = vmatpush.bf16.msrb.mxu3 %v4714_v6 }
 0x18b   :  { %2931 = vmatpush.bf16.msrb.mxu2 %v4735_v11 }
 0x18d   :  { %2624 = vmatpush.bf16.msra.mxu0 %v4229_v52  ;;  %2922 = vmatpush.bf16.msrb.mxu1 %v4723_v14 }
 0x18f   :  { %v2451_v50 = vpop.f32.mrf.mxu1  ;;  %2932 = vmatpush.bf16.msrb.mxu2 %v4734_v51 }
 0x191   :  { %2625 = vmatpush.bf16.msra.mxu0 %v4213_v1  ;;  %2923 = vmatpush.bf16.msrb.mxu1 %v4722_v49 }
 0x193   :  { %2933 = vmatpush.bf16.msrb.mxu2 %v4733_v55 }
 0x195   :  { %2626 = vmatpush.bf16.msra.mxu0 %v4197_v59 }
 0x197   :  { %v2488_v63 = vpop.f32.mrf.mxu3  ;;  %v2501_v16 = vpop.f32.mrf.mxu1  ;;  %2934 = vmatpush.bf16.msrb.mxu2 %v4732_v60 }
 0x198   :  { %v2489_v15 = vadd.f32 %v2488_v63, %v1780_v13 }
 0x199   :  { %2627 = vmatpush.bf16.msra.mxu0 %v4181_v3 }
 0x19a   :  { %v4991_v17 = vadd.f32 %v2501_v16, %v2489_v15  ;;  %v4740_v15 = vld [vmem:[%s5111_s5 + $0xd0] sm:$0xff] }
 0x19b   :  { %2935 = vmatpush.bf16.msrb.mxu2 %v4731_v58 }
 0x19d   :  { %2628 = vmatpush.bf16.msra.mxu0 %v4165_v7  ;;  %v4742_v7 = vld [vmem:[%s5111_s5 + $0xe0] sm:$0xff] }
 0x19f   :  { %v2490_v41 = vpop.f32.mrf.mxu3  ;;  %v2503_v19 = vpop.f32.mrf.mxu1  ;;  %2936 = vmatpush.bf16.msrb.mxu2 %v4730_v61 }
 0x1a0   :  { %v4741_v41 = vld [vmem:[%s5111_s5 + $0xd8] sm:$0xff]  ;;  %v4738_v19 = vld [vmem:[%s5111_s5 + $0xc0] sm:$0xff] }
 0x1a1   :  { %2629 = vmatpush.bf16.msra.mxu0 %v4149_v12 }
 0x1a4   :  { %2630 = vmatmul.bf16.vlgmr.msra.gmra.mxu0 %v4975_v38 }
 0x1a5   :  { %2942 = vmatpush.bf16.msrb.mxu0 %v4745_v39 }
 0x1af   :  { %v2553_v38 = vpop.f32.mrf.mxu1 }
 0x1b7   :  { %v2540_v21 = vpop.f32.mrf.mxu3  ;;  %v2555_v28 = vpop.f32.mrf.mxu1 }
 0x1b8   :  { %v2541_v2 = vadd.f32 %v2540_v21, %v1781_v57 }
 0x1ba   :  { %v5004_v23 = vadd.f32 %v2553_v38, %v2541_v2 }
 0x1bf   :  { %v2542_v25 = vpop.f32.mrf.mxu3 }
 0x1c3   :  { %v2462_v33 = vpop.f32.mrf.mxu2 }
 0x1c4   :  { %v2463_v56 = vadd.f32 %v2462_v33, %v4988_v0  ;;  %v4744_v0 = vld [vmem:[%s5111_s5 + $0xf0] sm:$0xff] }
 0x1c5   :  { %2943 = vmatpush.bf16.msrb.mxu0 %v4744_v0 }
 0x1c9   :  { %2944 = vmatpush.bf16.msrb.mxu0 %v4743_v4 }
 0x1cb   :  { %v2464_v9 = vpop.f32.mrf.mxu2 }
 0x1cd   :  { %2945 = vmatpush.bf16.msrb.mxu0 %v4742_v7 }
 0x1cf   :  { %v2605_v47 = vpop.f32.mrf.mxu1 }
 0x1d1   :  { %2946 = vmatpush.bf16.msrb.mxu0 %v4741_v41 }
 0x1d3   :  { %v2514_v54 = vpop.f32.mrf.mxu2 }
 0x1d4   :  { %v2515_v8 = vadd.f32 %v2514_v54, %v4991_v17  ;;  %v4739_v17 = vld [vmem:[%s5111_s5 + $0xc8] sm:$0xff] }
 0x1d5   :  { %2947 = vmatpush.bf16.msrb.mxu0 %v4740_v15 }
 0x1d7   :  { %v2592_v43 = vpop.f32.mrf.mxu3  ;;  %v2607_v52 = vpop.f32.mrf.mxu1 }
 0x1d8   :  { %v2593_v44 = vadd.f32 %v2592_v43, %v1782_v36  ;;  %v4750_v36 = vld [vmem:[%s5112_s6] ss:$0 sm:$0xff] }
 0x1d9   :  { %2948 = vmatpush.bf16.msrb.mxu0 %v4739_v17 }
 0x1da   :  { %v5046_v20 = vadd.f32 %v2605_v47, %v2593_v44 }
 0x1db   :  { %v2516_v1 = vpop.f32.mrf.mxu2 }
 0x1dd   :  { %2949 = vmatpush.bf16.msrb.mxu0 %v4738_v19 }
 0x1df   :  { %v2594_v32 = vpop.f32.mrf.mxu3 }
 0x1e1   :  { %v2475_v29 = vpop.f32.mrf.mxu0 }
 0x1e2   :  { %v2476_v59 = vadd.f32 %v2475_v29, %v2463_v56 }
 0x1e4   :  { %v2635_v34 = vmax.f32 %v2476_v59, 0.0 }
 0x1e5   :  { %v2566_v62 = vpop.f32.mrf.mxu2 }
 0x1e6   :  { %v2639_v63 = vpack.c.bf16 %v2635_v34, %v2635_v34  ;;  %v2567_v18 = vadd.f32 %v2566_v62, %v5004_v23 }
 0x1e8   :  { %2911 = vmatmul.bf16.vlgmr.msrb.gmra.mxu3 %v2639_v63 }
 0x1e9   :  { %v2477_v3 = vpop.f32.mrf.mxu0 }
 0x1ed   :  { %v2568_v5 = vpop.f32.mrf.mxu2 }
 0x1f1   :  { %v2527_v10 = vpop.f32.mrf.mxu0 }
 0x1f2   :  { %v2528_v50 = vadd.f32 %v2527_v10, %v2515_v8 }
 0x1f4   :  { %v2636_v12 = vmax.f32 %v2528_v50, 0.0 }
 0x1f6   :  { %v2640_v13 = vpack.c.bf16 %v2636_v12, %v2636_v12 }
 0x1f8   :  { %2924 = vmatmul.bf16.vlgmr.msrb.gmra.mxu1 %v2640_v13 }
 0x1f9   :  { %v2529_v16 = vpop.f32.mrf.mxu0 }
 0x201   :  { %v2579_v57 = vpop.f32.mrf.mxu0 }
 0x202   :  { %v2580_v48 = vadd.f32 %v2579_v57, %v2567_v18 }
 0x204   :  { %v2637_v2 = vmax.f32 %v2580_v48, 0.0 }
 0x205   :  { %v2618_v21 = vpop.f32.mrf.mxu2 }
 0x206   :  { %v2641_v22 = vpack.c.bf16 %v2637_v2, %v2637_v2  ;;  %v2619_v25 = vadd.f32 %v2618_v21, %v5046_v20 }
 0x208   :  { %2937 = vmatmul.bf16.vlgmr.msrb.gmra.mxu2 %v2641_v22 }
 0x209   :  { %v2581_v38 = vpop.f32.mrf.mxu0 }
 0x20d   :  { %v2620_v24 = vpop.f32.mrf.mxu2 }
 0x221   :  { %v2631_v26 = vpop.f32.mrf.mxu0 }
 0x222   :  { %v2632_v27 = vadd.f32 %v2631_v26, %v2619_v25 }
 0x224   :  { %v2638_v28 = vmax.f32 %v2632_v27, 0.0 }
 0x226   :  { %v2642_v30 = vpack.c.bf16 %v2638_v28, %v2638_v28 }
 0x228   :  { %2950 = vmatmul.bf16.vlgmr.msrb.gmra.mxu0 %v2642_v30 }
 0x229   :  { %v2633_v23 = vpop.f32.mrf.mxu0 }
 0x26b   :  { %v2912_v31 = vpop.f32.mrf.mxu3 }
 0x26c   :  { %v2913_v37 = vadd.f32 %v4750_v36, %v2912_v31 }
 0x273   :  { %v2914_v53 = vpop.f32.mrf.mxu3 }
 0x275   :  { %v2925_v42 = vpop.f32.mrf.mxu1 }
 0x276   :  { %v2926_v40 = vadd.f32 %v2925_v42, %v2913_v37 }
 0x27d   :  { %v2927_v6 = vpop.f32.mrf.mxu1 }
 0x28b   :  { %v2938_v35 = vpop.f32.mrf.mxu2 }
 0x28c   :  { %v2939_v43 = vadd.f32 %v2938_v35, %v2926_v40 }
 0x293   :  { %v2940_v33 = vpop.f32.mrf.mxu2 }
 0x2a5   :  { %v2951_v44 = vpop.f32.mrf.mxu0 }
 0x2a6   :  { %v2952_v45 = vadd.f32 %v2951_v44, %v2939_v43 }
 0x2a8   :  { %2955 = vst [vmem:[%s5113_s7] sm:$0xff] %v2952_v45 }
 0x2ad   :  { %v2953_v46 = vpop.f32.mrf.mxu0 }
 0x2ae   :  { %2960 = vsyncpa [#allocation3], 1 }
 0x2af   :  { %2961 = vsyncpa [#allocation5], 1 }

</bundles_post_ra>
